<compile_context>
chip_gen: v7x
topology: tpu7x:2x2x1
jax: 0.10.0
libtpu: 0.0.40
codegen_flags: <defaults>
</compile_context>

<pallas_src>
import math

import jax
import jax.numpy as jnp
from jax.experimental import pallas as pl
from jax.experimental.pallas import tpu as pltpu


TILE_NODES = 256                    # row tile for the per-node kernel
TILE_EDGES = 256                    # row tile for the per-edge kernel
VMEM_LIMIT = 48 * 1024 * 1024       # sized for v7x's 64 MiB VMEM (headroom left)


# --------------------------------------------------------------------------
# Small helpers
# --------------------------------------------------------------------------
def _silu(x):
    return x * jax.nn.sigmoid(x)


def _round_up(x, m):
    return ((x + m - 1) // m) * m


def _pick_tile(n, cap):
    return min(cap, _round_up(max(n, 1), 8))


def _pad_rows(a, n_pad):
    pad = n_pad - a.shape[0]
    if pad == 0:
        return a
    return jnp.pad(a, ((0, pad),) + ((0, 0),) * (a.ndim - 1))


def _block_diag(w, n):
    """(d, d) -> (n*d, n*d) block-diagonal replication of w (exact copy of entries)."""
    d = w.shape[0]
    eye = jnp.eye(n, dtype=w.dtype)
    return jnp.einsum("op,cj->ocpj", eye, w).reshape(n * d, n * d)


# --------------------------------------------------------------------------
# Kernel A: per-node tile — fused EmbedNode MLP + EmbedCoeffs.f_e
# --------------------------------------------------------------------------
def _make_node_kernel(n_orb):
    def kernel(nz_ref, ne_ref, ce_ref,
               w1a_ref, w1b_ref, b1_ref, w2_ref, b2_ref,
               wfe1_ref, wfe2_ref,
               x_ref, ec_ref):
        # --- EmbedNode: x = SiLU(SiLU(node_z@W1a + node_e_sum@W1b + b1) @ W2 + b2)
        # (split W1 instead of concatenating inputs along lanes)
        h = (jnp.dot(nz_ref[...], w1a_ref[...], preferred_element_type=jnp.float32)
             + jnp.dot(ne_ref[...], w1b_ref[...], preferred_element_type=jnp.float32)
             + b1_ref[...])
        h = _silu(h)
        x = _silu(jnp.dot(h, w2_ref[...], preferred_element_type=jnp.float32) + b2_ref[...])
        x_ref[...] = x.astype(x_ref.dtype)

        # --- EmbedCoeffs.f_e on the lane-dense (tile_n, n_orb*emb_c) layout:
        #     ec = (SiLU(e @ Wf1_bd) @ Wf2_bd) * per_orbital_sum(e)
        e = ce_ref[...]                               # (tile_n, n_orb*emb_c)
        emb_c = e.shape[-1] // n_orb
        h2 = _silu(jnp.dot(e, wfe1_ref[...], preferred_element_type=jnp.float32))
        h2 = jnp.dot(h2, wfe2_ref[...], preferred_element_type=jnp.float32)
        parts = []
        for o in range(n_orb):                        # static, unrolled (n_orb small)
            sl = slice(o * emb_c, (o + 1) * emb_c)
            gate = jnp.sum(e[:, sl], axis=-1, keepdims=True)   # exact f32 per-orbital sum
            parts.append(h2[:, sl] * gate)
        ec_ref[...] = jnp.concatenate(parts, axis=-1).astype(ec_ref.dtype)  # 256-lane store

    return kernel


def node_coeff_call(node_z, node_e_sum, coeff_e_flat,
                    w1a, w1b, b1, w2, b2, wfe1_bd, wfe2_bd, n_orb):
    n = node_z.shape[0]
    tile_n = _pick_tile(n, TILE_NODES)
    n_pad = _round_up(n, tile_n)
    node_z = _pad_rows(node_z, n_pad)
    node_e_sum = _pad_rows(node_e_sum, n_pad)
    coeff_e_flat = _pad_rows(coeff_e_flat, n_pad)

    emb = node_z.shape[1]
    emb_ne = node_e_sum.shape[1]
    dcoeff = coeff_e_flat.shape[1]

    row = lambda i: (i, 0)
    const = lambda i: (0, 0)

    x_pad, ec_pad = pl.pallas_call(
        _make_node_kernel(n_orb),
        grid=(n_pad // tile_n,),
        in_specs=[
            pl.BlockSpec((tile_n, emb), row),
            pl.BlockSpec((tile_n, emb_ne), row),
            pl.BlockSpec((tile_n, dcoeff), row),
            pl.BlockSpec(w1a.shape, const),       # weights stay VMEM-resident
            pl.BlockSpec(w1b.shape, const),
            pl.BlockSpec(b1.shape, const),
            pl.BlockSpec(w2.shape, const),
            pl.BlockSpec(b2.shape, const),
            pl.BlockSpec(wfe1_bd.shape, const),
            pl.BlockSpec(wfe2_bd.shape, const),
        ],
        out_specs=(
            pl.BlockSpec((tile_n, emb), row),
            pl.BlockSpec((tile_n, dcoeff), row),
        ),
        out_shape=(
            jax.ShapeDtypeStruct((n_pad, emb), jnp.float32),
            jax.ShapeDtypeStruct((n_pad, dcoeff), jnp.float32),
        ),
        compiler_params=pltpu.CompilerParams(
            dimension_semantics=("parallel",),
            vmem_limit_bytes=VMEM_LIMIT),
    )(node_z, node_e_sum, coeff_e_flat, w1a, w1b, b1, w2, b2, wfe1_bd, wfe2_bd)

    # x is sliced back; ec is returned padded (padded rows are never gathered).
    return x_pad[:n], ec_pad


# --------------------------------------------------------------------------
# Kernel B: per-edge tile — in-kernel gathers + coeff_z path + combine
# --------------------------------------------------------------------------
def _edge_kernel(idx_s_ref, idx_t_ref, ec_ref, cz_ref, wzt_ref, o_ref, gzc_ref):
    tile_e = o_ref.shape[0]
    base = pl.program_id(0) * tile_e

    def gather_row(r, carry):
        s = idx_s_ref[base + r]
        t = idx_t_ref[base + r]
        # gather f_e(coeff_e)[idx_t] directly into the output block (no HBM round trip)
        o_ref[pl.ds(r, 1), :] = ec_ref[pl.ds(t, 1), :]
        # gather coeff_z[idx_s] + coeff_z[idx_t] into scratch
        gzc_ref[pl.ds(r, 1), :] = cz_ref[pl.ds(s, 1), :] + cz_ref[pl.ds(t, 1), :]
        return carry

    jax.lax.fori_loop(0, tile_e, gather_row, 0)

    # (coeff_z[s]+coeff_z[t]) @ Wz broadcast over orbitals, folded into a pre-tiled Wz
    zc = jnp.dot(gzc_ref[...], wzt_ref[...], preferred_element_type=jnp.float32)
    o_ref[...] = (o_ref[...] + zc).astype(o_ref.dtype)     # flat lane-dense add + 256-lane store


def coeff_edge_call(idx_s, idx_t, ec_nodes_pad, coeff_z, wz_tiled):
    e = idx_s.shape[0]
    tile_e = _pick_tile(e, TILE_EDGES)
    e_pad = _round_up(e, tile_e)
    pad = e_pad - e
    if pad:
        idx_s = jnp.pad(idx_s, (0, pad))
        idx_t = jnp.pad(idx_t, (0, pad))

    n_pad, dcoeff = ec_nodes_pad.shape
    n_node, emb_c = coeff_z.shape

    grid_spec = pltpu.PrefetchScalarGridSpec(
        num_scalar_prefetch=2,                        # idx_s, idx_t -> SMEM
        grid=(e_pad // tile_e,),
        in_specs=[
            pl.BlockSpec((n_pad, dcoeff), lambda i, *_: (0, 0)),   # ec_nodes resident
            pl.BlockSpec((n_node, emb_c), lambda i, *_: (0, 0)),   # coeff_z resident
            pl.BlockSpec((emb_c, dcoeff), lambda i, *_: (0, 0)),   # tiled Wz resident
        ],
        out_specs=pl.BlockSpec((tile_e, dcoeff), lambda i, *_: (i, 0)),
        scratch_shapes=[pltpu.VMEM((tile_e, emb_c), jnp.float32)],
    )

    out = pl.pallas_call(
        _edge_kernel,
        grid_spec=grid_spec,
        out_shape=jax.ShapeDtypeStruct((e_pad, dcoeff), jnp.float32),
        compiler_params=pltpu.CompilerParams(
            dimension_semantics=("parallel",),
            vmem_limit_bytes=VMEM_LIMIT),
    )(idx_s, idx_t, ec_nodes_pad, coeff_z, wz_tiled)
    return out[:e]


# --------------------------------------------------------------------------
# Parameter construction (deterministic, synthetic)
# --------------------------------------------------------------------------
def init_params(key, *, emb_size, emb_size_coeff, max_z, n_orb, max_elec, use_elec=True):
    emb_size_z = emb_size + emb_size_coeff
    emb_size_node_e = emb_size if use_elec else 0
    emb_size_e = emb_size_node_e + emb_size_coeff

    keys = jax.random.split(key, 10)
    s3 = math.sqrt(3.0)

    # EmbedZ: nn.Embedding(max_z + 1, emb_size_z), uniform(-sqrt3, sqrt3)
    z_table = jax.random.uniform(keys[0], (max_z + 1, emb_size_z), jnp.float32, -s3, s3)

    # EmbedElec: one embedding table per orbital, padding_idx=0 zeroed (extend_orb=False)
    e_table = jax.random.uniform(keys[1], (n_orb, max_elec + 1, emb_size_e), jnp.float32, -s3, s3)
    e_table = e_table.at[:, 0, :].set(0.0)

    # Synthetic electron-configuration table: (max_z+1, n_orb) ints in [0, max_elec]
    zz = jnp.arange(max_z + 1)[:, None]
    oo = jnp.arange(n_orb)[None, :]
    elec_table = ((zz * (oo + 1)) % (max_elec + 1)).astype(jnp.int32)
    elec_table = elec_table.at[0].set(0)

    def dense(k, fan_in, fan_out):
        lim = math.sqrt(6.0 / (fan_in + fan_out))
        return jax.random.uniform(k, (fan_in, fan_out), jnp.float32, -lim, lim)

    din_node = emb_size + emb_size_node_e
    params = dict(
        z_table=z_table,
        e_table=e_table,
        elec_table=elec_table,
        # EmbedNode MLP
        node_w1=dense(keys[2], din_node, emb_size),
        node_b1=jnp.zeros((1, emb_size), jnp.float32),
        node_w2=dense(keys[3], emb_size, emb_size),
        node_b2=jnp.zeros((1, emb_size), jnp.float32),
        # EmbedCoeffs
        coeff_wz=dense(keys[4], emb_size_coeff, emb_size_coeff),
        coeff_wfe1=dense(keys[5], emb_size_coeff, emb_size_coeff),
        coeff_wfe2=dense(keys[6], emb_size_coeff, emb_size_coeff),
    )
    cfg = dict(
        emb_size=emb_size,
        emb_size_coeff=emb_size_coeff,
        emb_size_node_e=emb_size_node_e,
        n_orb=n_orb,
    )
    return params, cfg


# --------------------------------------------------------------------------
# Forward pass (glue + Pallas kernels)
# --------------------------------------------------------------------------
def lcao_embedding_forward(params, cfg, z, idx_s, idx_t):
    emb = cfg["emb_size"]
    emb_c = cfg["emb_size_coeff"]
    emb_ne = cfg["emb_size_node_e"]
    n_orb = cfg["n_orb"]
    assert emb_ne > 0  # TODO(synk): use_elec=False path not wired through the Pallas kernels

    # --- embedding lookups (glue) ---
    z_emb = params["z_table"][z]                                  # (N, emb + emb_c)
    node_z, coeff_z = z_emb[:, :emb], z_emb[:, emb:]

    elec = params["elec_table"][z]                                # (N, n_orb) int
    e_emb = params["e_table"][jnp.arange(n_orb)[None, :], elec]   # (N, n_orb, emb_ne + emb_c)
    node_e, coeff_e = e_emb[..., :emb_ne], e_emb[..., emb_ne:]

    n_node = z.shape[0]
    node_e_sum = jnp.sum(node_e, axis=1)                          # (N, emb_ne): sum in glue
    coeff_e_flat = coeff_e.reshape(n_node, n_orb * emb_c)         # lane-dense (N, 256)

    # --- weight preprocessing (tiny, done in XLA, exact) ---
    w1 = params["node_w1"]
    w1a, w1b = w1[:emb], w1[emb:]                                 # split W1 -> no in-kernel concat
    wfe1_bd = _block_diag(params["coeff_wfe1"], n_orb)            # (256, 256)
    wfe2_bd = _block_diag(params["coeff_wfe2"], n_orb)            # (256, 256)
    wz_tiled = jnp.tile(params["coeff_wz"], (1, n_orb))           # (emb_c, 256)

    # --- Kernel A: fused EmbedNode + EmbedCoeffs.f_e (per-node tiles) ---
    x, ec_nodes_pad = node_coeff_call(
        node_z, node_e_sum, coeff_e_flat,
        w1a, w1b, params["node_b1"], params["node_w2"], params["node_b2"],
        wfe1_bd, wfe2_bd, n_orb)

    # --- Kernel B: per-edge tiles, in-kernel gathers + combine ---
    cst_flat = coeff_edge_call(idx_s, idx_t, ec_nodes_pad, coeff_z, wz_tiled)  # (E, 256)
    cst = cst_flat.reshape(idx_s.shape[0], n_orb, emb_c)
    return x, cst


# --------------------------------------------------------------------------
# Pure-JAX reference (for correctness check)
# --------------------------------------------------------------------------
def lcao_embedding_reference(params, cfg, z, idx_s, idx_t):
    emb = cfg["emb_size"]
    emb_c = cfg["emb_size_coeff"]
    emb_ne = cfg["emb_size_node_e"]
    n_orb = cfg["n_orb"]

    z_emb = params["z_table"][z]
    node_z, coeff_z = z_emb[:, :emb], z_emb[:, emb:]
    elec = params["elec_table"][z]
    e_emb = params["e_table"][jnp.arange(n_orb)[None, :], elec]
    node_e, coeff_e = e_emb[..., :emb_ne], e_emb[..., emb_ne:]

    ze = jnp.concatenate([node_z, node_e.sum(axis=1)], axis=-1)
    h = _silu(ze @ params["node_w1"] + params["node_b1"])
    x = _silu(h @ params["node_w2"] + params["node_b2"])

    ef = coeff_e.reshape(-1, emb_c)
    ec = _silu(ef @ params["coeff_wfe1"]) @ params["coeff_wfe2"]
    ec = ec * ef.sum(axis=-1, keepdims=True)
    ec = ec.reshape(coeff_e.shape[0], n_orb, emb_c)

    zc = (coeff_z[idx_s] + coeff_z[idx_t]) @ params["coeff_wz"]
    cst = ec[idx_t] + zc[:, None, :]
    return x, cst


# --------------------------------------------------------------------------
if __name__ == "__main__":
    # Small, module-consistent sizes (edge count chosen to exercise the edge row grid).
    N_NODE, N_EDGE = 64, 1024
    EMB_SIZE, EMB_SIZE_COEFF = 32, 32
    MAX_Z, N_ORB, MAX_ELEC = 9, 8, 6

    key = jax.random.PRNGKey(0)
    kp, kz, ks, kt = jax.random.split(key, 4)

    params, cfg = init_params(kp, emb_size=EMB_SIZE, emb_size_coeff=EMB_SIZE_COEFF,
                              max_z=MAX_Z, n_orb=N_ORB, max_elec=MAX_ELEC, use_elec=True)

    z = jax.random.randint(kz, (N_NODE,), 1, MAX_Z + 1, dtype=jnp.int32)
    idx_s = jax.random.randint(ks, (N_EDGE,), 0, N_NODE, dtype=jnp.int32)
    idx_t = jax.random.randint(kt, (N_EDGE,), 0, N_NODE, dtype=jnp.int32)

    fwd = jax.jit(lambda p, a, b, c: lcao_embedding_forward(p, cfg, a, b, c))
    x, cst = fwd(params, z, idx_s, idx_t)
    jax.block_until_ready((x, cst))

    x_ref, cst_ref = lcao_embedding_reference(params, cfg, z, idx_s, idx_t)
    assert x.shape == (N_NODE, EMB_SIZE)
    assert cst.shape == (N_EDGE, N_ORB, EMB_SIZE_COEFF)
    assert jnp.allclose(x, x_ref, rtol=1e-4, atol=1e-4), float(jnp.max(jnp.abs(x - x_ref)))
    assert jnp.allclose(cst, cst_ref, rtol=1e-4, atol=1e-4), float(jnp.max(jnp.abs(cst - cst_ref)))

    print("KERNEL_OK")
</pallas_src>

<mosaic_0001>
module attributes {stable_mosaic.version = 11 : i64} {
  func.func @kernel(%arg0: i32, %arg1: memref<64x32xf32, #tpu.memory_space<vmem>>, %arg2: memref<64x32xf32, #tpu.memory_space<vmem>>, %arg3: memref<64x256xf32, #tpu.memory_space<vmem>>, %arg4: memref<32x32xf32, #tpu.memory_space<vmem>>, %arg5: memref<32x32xf32, #tpu.memory_space<vmem>>, %arg6: memref<1x32xf32, #tpu.memory_space<vmem>>, %arg7: memref<32x32xf32, #tpu.memory_space<vmem>>, %arg8: memref<1x32xf32, #tpu.memory_space<vmem>>, %arg9: memref<256x256xf32, #tpu.memory_space<vmem>>, %arg10: memref<256x256xf32, #tpu.memory_space<vmem>>, %arg11: memref<64x32xf32, #tpu.memory_space<vmem>>, %arg12: memref<64x256xf32, #tpu.memory_space<vmem>>) attributes {dimension_semantics = [#tpu.dimension_semantics<parallel>], iteration_bounds = array<i64: 1>, scalar_prefetch = 0 : i64, scratch_operands = 0 : i64, tpu.core_type = #tpu.core_type<tc>, window_params = [{transform_indices = @transform_0, window_bounds = array<i64: 64, 32>}, {transform_indices = @transform_1, window_bounds = array<i64: 64, 32>}, {transform_indices = @transform_2, window_bounds = array<i64: 64, 256>}, {pipeline_mode = #tpu.pipeline_mode<synchronous>, transform_indices = @transform_3, window_bounds = array<i64: 32, 32>}, {pipeline_mode = #tpu.pipeline_mode<synchronous>, transform_indices = @transform_4, window_bounds = array<i64: 32, 32>}, {pipeline_mode = #tpu.pipeline_mode<synchronous>, transform_indices = @transform_5, window_bounds = array<i64: 1, 32>}, {pipeline_mode = #tpu.pipeline_mode<synchronous>, transform_indices = @transform_6, window_bounds = array<i64: 32, 32>}, {pipeline_mode = #tpu.pipeline_mode<synchronous>, transform_indices = @transform_7, window_bounds = array<i64: 1, 32>}, {pipeline_mode = #tpu.pipeline_mode<synchronous>, transform_indices = @transform_8, window_bounds = array<i64: 256, 256>}, {pipeline_mode = #tpu.pipeline_mode<synchronous>, transform_indices = @transform_9, window_bounds = array<i64: 256, 256>}, {transform_indices = @transform_10, window_bounds = array<i64: 64, 32>}, {transform_indices = @transform_11, window_bounds = array<i64: 64, 256>}]} {
    %c0 = arith.constant 0 : index
    %c0_0 = arith.constant 0 : index
    %0 = vector.load %arg1[%c0, %c0_0] : memref<64x32xf32, #tpu.memory_space<vmem>>, vector<64x32xf32>
    %c0_1 = arith.constant 0 : index
    %c0_2 = arith.constant 0 : index
    %1 = vector.load %arg4[%c0_1, %c0_2] : memref<32x32xf32, #tpu.memory_space<vmem>>, vector<32x32xf32>
    %cst = arith.constant dense<0.000000e+00> : vector<64x32xf32>
    %2 = tpu.matmul %0, %1, %cst {dimension_numbers = #tpu.dot_dimension_numbers<[1], [0], [0], [1], [0, 0, 1, 1], [], []>} : vector<64x32xf32>, vector<32x32xf32>, vector<64x32xf32> -> vector<64x32xf32>
    %c0_3 = arith.constant 0 : index
    %c0_4 = arith.constant 0 : index
    %3 = vector.load %arg2[%c0_3, %c0_4] : memref<64x32xf32, #tpu.memory_space<vmem>>, vector<64x32xf32>
    %c0_5 = arith.constant 0 : index
    %c0_6 = arith.constant 0 : index
    %4 = vector.load %arg5[%c0_5, %c0_6] : memref<32x32xf32, #tpu.memory_space<vmem>>, vector<32x32xf32>
    %cst_7 = arith.constant dense<0.000000e+00> : vector<64x32xf32>
    %5 = tpu.matmul %3, %4, %cst_7 {dimension_numbers = #tpu.dot_dimension_numbers<[1], [0], [0], [1], [0, 0, 1, 1], [], []>} : vector<64x32xf32>, vector<32x32xf32>, vector<64x32xf32> -> vector<64x32xf32>
    %6 = arith.addf %2, %5 : vector<64x32xf32>
    %c0_8 = arith.constant 0 : index
    %c0_9 = arith.constant 0 : index
    %7 = vector.load %arg6[%c0_8, %c0_9] : memref<1x32xf32, #tpu.memory_space<vmem>>, vector<1x32xf32>
    %8 = vector.broadcast %7 : vector<1x32xf32> to vector<64x32xf32>
    %9 = arith.addf %6, %8 : vector<64x32xf32>
    %10 = arith.negf %9 : vector<64x32xf32>
    %11 = math.exp %10 : vector<64x32xf32>
    %cst_10 = arith.constant 1.000000e+00 : f32
    %12 = vector.broadcast %cst_10 : f32 to vector<64x32xf32>
    %13 = arith.addf %12, %11 : vector<64x32xf32>
    %14 = arith.divf %12, %13 : vector<64x32xf32>
    %15 = arith.mulf %9, %14 : vector<64x32xf32>
    %c0_11 = arith.constant 0 : index
    %c0_12 = arith.constant 0 : index
    %16 = vector.load %arg7[%c0_11, %c0_12] : memref<32x32xf32, #tpu.memory_space<vmem>>, vector<32x32xf32>
    %cst_13 = arith.constant dense<0.000000e+00> : vector<64x32xf32>
    %17 = tpu.matmul %15, %16, %cst_13 {dimension_numbers = #tpu.dot_dimension_numbers<[1], [0], [0], [1], [0, 0, 1, 1], [], []>} : vector<64x32xf32>, vector<32x32xf32>, vector<64x32xf32> -> vector<64x32xf32>
    %c0_14 = arith.constant 0 : index
    %c0_15 = arith.constant 0 : index
    %18 = vector.load %arg8[%c0_14, %c0_15] : memref<1x32xf32, #tpu.memory_space<vmem>>, vector<1x32xf32>
    %19 = vector.broadcast %18 : vector<1x32xf32> to vector<64x32xf32>
    %20 = arith.addf %17, %19 : vector<64x32xf32>
    %21 = arith.negf %20 : vector<64x32xf32>
    %22 = math.exp %21 : vector<64x32xf32>
    %cst_16 = arith.constant 1.000000e+00 : f32
    %23 = vector.broadcast %cst_16 : f32 to vector<64x32xf32>
    %24 = arith.addf %23, %22 : vector<64x32xf32>
    %25 = arith.divf %23, %24 : vector<64x32xf32>
    %26 = arith.mulf %20, %25 : vector<64x32xf32>
    %c0_17 = arith.constant 0 : index
    %c0_18 = arith.constant 0 : index
    %27 = vector.load %arg11[%c0_17, %c0_18] : memref<64x32xf32, #tpu.memory_space<vmem>>, vector<64x32xf32>
    tpu.vector_store %arg11[%c0_17, %c0_18], %26 {strides = array<i32>} : memref<64x32xf32, #tpu.memory_space<vmem>>, vector<64x32xf32>,
    %c0_19 = arith.constant 0 : index
    %c0_20 = arith.constant 0 : index
    %28 = vector.load %arg3[%c0_19, %c0_20] : memref<64x256xf32, #tpu.memory_space<vmem>>, vector<64x256xf32>
    %c0_21 = arith.constant 0 : index
    %c0_22 = arith.constant 0 : index
    %29 = vector.load %arg9[%c0_21, %c0_22] : memref<256x256xf32, #tpu.memory_space<vmem>>, vector<256x256xf32>
    %cst_23 = arith.constant dense<0.000000e+00> : vector<64x256xf32>
    %30 = tpu.matmul %28, %29, %cst_23 {dimension_numbers = #tpu.dot_dimension_numbers<[1], [0], [0], [1], [0, 0, 1, 1], [], []>} : vector<64x256xf32>, vector<256x256xf32>, vector<64x256xf32> -> vector<64x256xf32>
    %31 = arith.negf %30 : vector<64x256xf32>
    %32 = math.exp %31 : vector<64x256xf32>
    %cst_24 = arith.constant 1.000000e+00 : f32
    %33 = vector.broadcast %cst_24 : f32 to vector<64x256xf32>
    %34 = arith.addf %33, %32 : vector<64x256xf32>
    %35 = arith.divf %33, %34 : vector<64x256xf32>
    %36 = arith.mulf %30, %35 : vector<64x256xf32>
    %c0_25 = arith.constant 0 : index
    %c0_26 = arith.constant 0 : index
    %37 = vector.load %arg10[%c0_25, %c0_26] : memref<256x256xf32, #tpu.memory_space<vmem>>, vector<256x256xf32>
    %cst_27 = arith.constant dense<0.000000e+00> : vector<64x256xf32>
    %38 = tpu.matmul %36, %37, %cst_27 {dimension_numbers = #tpu.dot_dimension_numbers<[1], [0], [0], [1], [0, 0, 1, 1], [], []>} : vector<64x256xf32>, vector<256x256xf32>, vector<64x256xf32> -> vector<64x256xf32>
    %39 = vector.extract_strided_slice %28 {offsets = [0, 0], sizes = [64, 32], strides = [1, 1]} : vector<64x256xf32> to vector<64x32xf32>
    %cst_28 = arith.constant dense<0.000000e+00> : vector<64xf32>
    %40 = vector.multi_reduction <add>, %39, %cst_28 [1] : vector<64x32xf32> to vector<64xf32>
    %41 = vector.shape_cast %40 : vector<64xf32> to vector<64x1xf32>
    %42 = vector.extract_strided_slice %38 {offsets = [0, 0], sizes = [64, 32], strides = [1, 1]} : vector<64x256xf32> to vector<64x32xf32>
    %43 = vector.broadcast %41 : vector<64x1xf32> to vector<64x32xf32>
    %44 = arith.mulf %42, %43 : vector<64x32xf32>
    %45 = vector.extract_strided_slice %28 {offsets = [0, 32], sizes = [64, 32], strides = [1, 1]} : vector<64x256xf32> to vector<64x32xf32>
    %cst_29 = arith.constant dense<0.000000e+00> : vector<64xf32>
    %46 = vector.multi_reduction <add>, %45, %cst_29 [1] : vector<64x32xf32> to vector<64xf32>
    %47 = vector.shape_cast %46 : vector<64xf32> to vector<64x1xf32>
    %48 = vector.extract_strided_slice %38 {offsets = [0, 32], sizes = [64, 32], strides = [1, 1]} : vector<64x256xf32> to vector<64x32xf32>
    %49 = vector.broadcast %47 : vector<64x1xf32> to vector<64x32xf32>
    %50 = arith.mulf %48, %49 : vector<64x32xf32>
    %51 = vector.extract_strided_slice %28 {offsets = [0, 64], sizes = [64, 32], strides = [1, 1]} : vector<64x256xf32> to vector<64x32xf32>
    %cst_30 = arith.constant dense<0.000000e+00> : vector<64xf32>
    %52 = vector.multi_reduction <add>, %51, %cst_30 [1] : vector<64x32xf32> to vector<64xf32>
    %53 = vector.shape_cast %52 : vector<64xf32> to vector<64x1xf32>
    %54 = vector.extract_strided_slice %38 {offsets = [0, 64], sizes = [64, 32], strides = [1, 1]} : vector<64x256xf32> to vector<64x32xf32>
    %55 = vector.broadcast %53 : vector<64x1xf32> to vector<64x32xf32>
    %56 = arith.mulf %54, %55 : vector<64x32xf32>
    %57 = vector.extract_strided_slice %28 {offsets = [0, 96], sizes = [64, 32], strides = [1, 1]} : vector<64x256xf32> to vector<64x32xf32>
    %cst_31 = arith.constant dense<0.000000e+00> : vector<64xf32>
    %58 = vector.multi_reduction <add>, %57, %cst_31 [1] : vector<64x32xf32> to vector<64xf32>
    %59 = vector.shape_cast %58 : vector<64xf32> to vector<64x1xf32>
    %60 = vector.extract_strided_slice %38 {offsets = [0, 96], sizes = [64, 32], strides = [1, 1]} : vector<64x256xf32> to vector<64x32xf32>
    %61 = vector.broadcast %59 : vector<64x1xf32> to vector<64x32xf32>
    %62 = arith.mulf %60, %61 : vector<64x32xf32>
    %63 = vector.extract_strided_slice %28 {offsets = [0, 128], sizes = [64, 32], strides = [1, 1]} : vector<64x256xf32> to vector<64x32xf32>
    %cst_32 = arith.constant dense<0.000000e+00> : vector<64xf32>
    %64 = vector.multi_reduction <add>, %63, %cst_32 [1] : vector<64x32xf32> to vector<64xf32>
    %65 = vector.shape_cast %64 : vector<64xf32> to vector<64x1xf32>
    %66 = vector.extract_strided_slice %38 {offsets = [0, 128], sizes = [64, 32], strides = [1, 1]} : vector<64x256xf32> to vector<64x32xf32>
    %67 = vector.broadcast %65 : vector<64x1xf32> to vector<64x32xf32>
    %68 = arith.mulf %66, %67 : vector<64x32xf32>
    %69 = vector.extract_strided_slice %28 {offsets = [0, 160], sizes = [64, 32], strides = [1, 1]} : vector<64x256xf32> to vector<64x32xf32>
    %cst_33 = arith.constant dense<0.000000e+00> : vector<64xf32>
    %70 = vector.multi_reduction <add>, %69, %cst_33 [1] : vector<64x32xf32> to vector<64xf32>
    %71 = vector.shape_cast %70 : vector<64xf32> to vector<64x1xf32>
    %72 = vector.extract_strided_slice %38 {offsets = [0, 160], sizes = [64, 32], strides = [1, 1]} : vector<64x256xf32> to vector<64x32xf32>
    %73 = vector.broadcast %71 : vector<64x1xf32> to vector<64x32xf32>
    %74 = arith.mulf %72, %73 : vector<64x32xf32>
    %75 = vector.extract_strided_slice %28 {offsets = [0, 192], sizes = [64, 32], strides = [1, 1]} : vector<64x256xf32> to vector<64x32xf32>
    %cst_34 = arith.constant dense<0.000000e+00> : vector<64xf32>
    %76 = vector.multi_reduction <add>, %75, %cst_34 [1] : vector<64x32xf32> to vector<64xf32>
    %77 = vector.shape_cast %76 : vector<64xf32> to vector<64x1xf32>
    %78 = vector.extract_strided_slice %38 {offsets = [0, 192], sizes = [64, 32], strides = [1, 1]} : vector<64x256xf32> to vector<64x32xf32>
    %79 = vector.broadcast %77 : vector<64x1xf32> to vector<64x32xf32>
    %80 = arith.mulf %78, %79 : vector<64x32xf32>
    %81 = vector.extract_strided_slice %28 {offsets = [0, 224], sizes = [64, 32], strides = [1, 1]} : vector<64x256xf32> to vector<64x32xf32>
    %cst_35 = arith.constant dense<0.000000e+00> : vector<64xf32>
    %82 = vector.multi_reduction <add>, %81, %cst_35 [1] : vector<64x32xf32> to vector<64xf32>
    %83 = vector.shape_cast %82 : vector<64xf32> to vector<64x1xf32>
    %84 = vector.extract_strided_slice %38 {offsets = [0, 224], sizes = [64, 32], strides = [1, 1]} : vector<64x256xf32> to vector<64x32xf32>
    %85 = vector.broadcast %83 : vector<64x1xf32> to vector<64x32xf32>
    %86 = arith.mulf %84, %85 : vector<64x32xf32>
    %87 = tpu.concatenate %44, %50, %56, %62, %68, %74, %80, %86 in 1 : vector<64x32xf32>, vector<64x32xf32>, vector<64x32xf32>, vector<64x32xf32>, vector<64x32xf32>, vector<64x32xf32>, vector<64x32xf32>, vector<64x32xf32> -> vector<64x256xf32>
    %c0_36 = arith.constant 0 : index
    %c0_37 = arith.constant 0 : index
    %88 = vector.load %arg12[%c0_36, %c0_37] : memref<64x256xf32, #tpu.memory_space<vmem>>, vector<64x256xf32>
    tpu.vector_store %arg12[%c0_36, %c0_37], %87 {strides = array<i32>} : memref<64x256xf32, #tpu.memory_space<vmem>>, vector<64x256xf32>,
    return
  }
  func.func @transform_0(%arg0: i32) -> (i32, i32) {
    %c0_i32 = arith.constant 0 : i32
    %c0_i32_0 = arith.constant 0 : i32
    return %arg0, %c0_i32 : i32, i32
  }
  func.func @transform_1(%arg0: i32) -> (i32, i32) {
    %c0_i32 = arith.constant 0 : i32
    %c0_i32_0 = arith.constant 0 : i32
    return %arg0, %c0_i32 : i32, i32
  }
  func.func @transform_2(%arg0: i32) -> (i32, i32) {
    %c0_i32 = arith.constant 0 : i32
    %c0_i32_0 = arith.constant 0 : i32
    return %arg0, %c0_i32 : i32, i32
  }
  func.func @transform_3(%arg0: i32) -> (i32, i32) {
    %c0_i32 = arith.constant 0 : i32
    %c0_i32_0 = arith.constant 0 : i32
    %c0_i32_1 = arith.constant 0 : i32
    return %c0_i32, %c0_i32_0 : i32, i32
  }
  func.func @transform_4(%arg0: i32) -> (i32, i32) {
    %c0_i32 = arith.constant 0 : i32
    %c0_i32_0 = arith.constant 0 : i32
    %c0_i32_1 = arith.constant 0 : i32
    return %c0_i32, %c0_i32_0 : i32, i32
  }
  func.func @transform_5(%arg0: i32) -> (i32, i32) {
    %c0_i32 = arith.constant 0 : i32
    %c0_i32_0 = arith.constant 0 : i32
    %c0_i32_1 = arith.constant 0 : i32
    return %c0_i32, %c0_i32_0 : i32, i32
  }
  func.func @transform_6(%arg0: i32) -> (i32, i32) {
    %c0_i32 = arith.constant 0 : i32
    %c0_i32_0 = arith.constant 0 : i32
    %c0_i32_1 = arith.constant 0 : i32
    return %c0_i32, %c0_i32_0 : i32, i32
  }
  func.func @transform_7(%arg0: i32) -> (i32, i32) {
    %c0_i32 = arith.constant 0 : i32
    %c0_i32_0 = arith.constant 0 : i32
    %c0_i32_1 = arith.constant 0 : i32
    return %c0_i32, %c0_i32_0 : i32, i32
  }
  func.func @transform_8(%arg0: i32) -> (i32, i32) {
    %c0_i32 = arith.constant 0 : i32
    %c0_i32_0 = arith.constant 0 : i32
    %c0_i32_1 = arith.constant 0 : i32
    return %c0_i32, %c0_i32_0 : i32, i32
  }
  func.func @transform_9(%arg0: i32) -> (i32, i32) {
    %c0_i32 = arith.constant 0 : i32
    %c0_i32_0 = arith.constant 0 : i32
    %c0_i32_1 = arith.constant 0 : i32
    return %c0_i32, %c0_i32_0 : i32, i32
  }
  func.func @transform_10(%arg0: i32) -> (i32, i32) {
    %c0_i32 = arith.constant 0 : i32
    %c0_i32_0 = arith.constant 0 : i32
    return %arg0, %c0_i32 : i32, i32
  }
  func.func @transform_11(%arg0: i32) -> (i32, i32) {
    %c0_i32 = arith.constant 0 : i32
    %c0_i32_0 = arith.constant 0 : i32
    return %arg0, %c0_i32 : i32, i32
  }
}

module attributes {stable_mosaic.version = 11 : i64} {
  func.func @_edge_kernel(%arg0: i32, %arg1: memref<1024xi32, #tpu.memory_space<smem>>, %arg2: memref<1024xi32, #tpu.memory_space<smem>>, %arg3: memref<64x256xf32, #tpu.memory_space<vmem>>, %arg4: memref<64x32xf32, #tpu.memory_space<vmem>>, %arg5: memref<32x256xf32, #tpu.memory_space<vmem>>, %arg6: memref<256x256xf32, #tpu.memory_space<vmem>>, %arg7: memref<256x32xf32, #tpu.memory_space<vmem>>) attributes {dimension_semantics = [#tpu.dimension_semantics<parallel>], iteration_bounds = array<i64: 4>, scalar_prefetch = 2 : i64, scratch_operands = 1 : i64, tpu.core_type = #tpu.core_type<tc>, window_params = [{pipeline_mode = #tpu.pipeline_mode<synchronous>, transform_indices = @transform_0, window_bounds = array<i64: 64, 256>}, {pipeline_mode = #tpu.pipeline_mode<synchronous>, transform_indices = @transform_1, window_bounds = array<i64: 64, 32>}, {pipeline_mode = #tpu.pipeline_mode<synchronous>, transform_indices = @transform_2, window_bounds = array<i64: 32, 256>}, {transform_indices = @transform_3, window_bounds = array<i64: 256, 256>}]} {
    %c256_i32 = arith.constant 256 : i32
    %0 = arith.muli %arg0, %c256_i32 : i32
    %c0_i32 = arith.constant 0 : i32
    %c256_i32_0 = arith.constant 256 : i32
    %1 = arith.addi %c0_i32, %c256_i32_0 : i32
    %c1_i32 = arith.constant 1 : i32
    scf.for %arg8 = %c0_i32 to %1 step %c1_i32  : i32 {
      %8 = arith.addi %0, %arg8 : i32
      %9 = arith.index_cast %8 : i32 to index
      %10 = memref.load %arg1[%9] : memref<1024xi32, #tpu.memory_space<smem>>
      %11 = arith.addi %0, %arg8 : i32
      %12 = arith.index_cast %11 : i32 to index
      %13 = memref.load %arg2[%12] : memref<1024xi32, #tpu.memory_space<smem>>
      %14 = arith.index_cast %13 : i32 to index
      %c0_9 = arith.constant 0 : index
      %15 = vector.load %arg3[%14, %c0_9] : memref<64x256xf32, #tpu.memory_space<vmem>>, vector<1x256xf32>
      %16 = arith.index_cast %arg8 : i32 to index
      %c0_10 = arith.constant 0 : index
      %17 = vector.load %arg6[%16, %c0_10] : memref<256x256xf32, #tpu.memory_space<vmem>>, vector<1x256xf32>
      tpu.vector_store %arg6[%16, %c0_10], %15 {strides = array<i32>} : memref<256x256xf32, #tpu.memory_space<vmem>>, vector<1x256xf32>,
      %18 = arith.index_cast %10 : i32 to index
      %c0_11 = arith.constant 0 : index
      %19 = vector.load %arg4[%18, %c0_11] : memref<64x32xf32, #tpu.memory_space<vmem>>, vector<1x32xf32>
      %20 = arith.index_cast %13 : i32 to index
      %c0_12 = arith.constant 0 : index
      %21 = vector.load %arg4[%20, %c0_12] : memref<64x32xf32, #tpu.memory_space<vmem>>, vector<1x32xf32>
      %22 = arith.addf %19, %21 : vector<1x32xf32>
      %23 = arith.index_cast %arg8 : i32 to index
      %c0_13 = arith.constant 0 : index
      %24 = vector.load %arg7[%23, %c0_13] : memref<256x32xf32, #tpu.memory_space<vmem>>, vector<1x32xf32>
      tpu.vector_store %arg7[%23, %c0_13], %22 {strides = array<i32>} : memref<256x32xf32, #tpu.memory_space<vmem>>, vector<1x32xf32>,
    }
    %c256_i32_1 = arith.constant 256 : i32
    %c0 = arith.constant 0 : index
    %c0_2 = arith.constant 0 : index
    %2 = vector.load %arg7[%c0, %c0_2] : memref<256x32xf32, #tpu.memory_space<vmem>>, vector<256x32xf32>
    %c0_3 = arith.constant 0 : index
    %c0_4 = arith.constant 0 : index
    %3 = vector.load %arg5[%c0_3, %c0_4] : memref<32x256xf32, #tpu.memory_space<vmem>>, vector<32x256xf32>
    %cst = arith.constant dense<0.000000e+00> : vector<256x256xf32>
    %4 = tpu.matmul %2, %3, %cst {dimension_numbers = #tpu.dot_dimension_numbers<[1], [0], [0], [1], [0, 0, 1, 1], [], []>} : vector<256x32xf32>, vector<32x256xf32>, vector<256x256xf32> -> vector<256x256xf32>
    %c0_5 = arith.constant 0 : index
    %c0_6 = arith.constant 0 : index
    %5 = vector.load %arg6[%c0_5, %c0_6] : memref<256x256xf32, #tpu.memory_space<vmem>>, vector<256x256xf32>
    %6 = arith.addf %5, %4 : vector<256x256xf32>
    %c0_7 = arith.constant 0 : index
    %c0_8 = arith.constant 0 : index
    %7 = vector.load %arg6[%c0_7, %c0_8] : memref<256x256xf32, #tpu.memory_space<vmem>>, vector<256x256xf32>
    tpu.vector_store %arg6[%c0_7, %c0_8], %6 {strides = array<i32>} : memref<256x256xf32, #tpu.memory_space<vmem>>, vector<256x256xf32>,
    return
  }
  func.func @transform_0(%arg0: i32, %arg1: memref<1024xi32, #tpu.memory_space<smem>>, %arg2: memref<1024xi32, #tpu.memory_space<smem>>) -> (i32, i32) {
    %c0_i32 = arith.constant 0 : i32
    %c0_i32_0 = arith.constant 0 : i32
    %c0_i32_1 = arith.constant 0 : i32
    return %c0_i32, %c0_i32_0 : i32, i32
  }
  func.func @transform_1(%arg0: i32, %arg1: memref<1024xi32, #tpu.memory_space<smem>>, %arg2: memref<1024xi32, #tpu.memory_space<smem>>) -> (i32, i32) {
    %c0_i32 = arith.constant 0 : i32
    %c0_i32_0 = arith.constant 0 : i32
    %c0_i32_1 = arith.constant 0 : i32
    return %c0_i32, %c0_i32_0 : i32, i32
  }
  func.func @transform_2(%arg0: i32, %arg1: memref<1024xi32, #tpu.memory_space<smem>>, %arg2: memref<1024xi32, #tpu.memory_space<smem>>) -> (i32, i32) {
    %c0_i32 = arith.constant 0 : i32
    %c0_i32_0 = arith.constant 0 : i32
    %c0_i32_1 = arith.constant 0 : i32
    return %c0_i32, %c0_i32_0 : i32, i32
  }
  func.func @transform_3(%arg0: i32, %arg1: memref<1024xi32, #tpu.memory_space<smem>>, %arg2: memref<1024xi32, #tpu.memory_space<smem>>) -> (i32, i32) {
    %c0_i32 = arith.constant 0 : i32
    %c0_i32_0 = arith.constant 0 : i32
    return %arg0, %c0_i32 : i32, i32
  }
}

</mosaic_0001>

<bundles_post_ra>
// kernel: tile.9
= control target key start
LH: loop header
LB: loop body
LE: loop exit
PB: predicated region body
PF: predicated region fallthrough
CT: control target
= control target key end

     0   :  { %vm92_vm0 = vcmask 1047556   ;;  %s459_s14 = smov 96   ;;  %s460_s26 = smov 64   ;;  %vm3_vm1 = vcmask 261120   ;;  %vm96_vm2 = vcmask 1048320   ;;  %vm183_vm3 = vcmask 785920   ;;  %s904_s0 = inlined_call_operand.vmem [shape: f32[32,8,32], index: 0, kind: input, shape index: {}]   ;;  %s905_s1 = inlined_call_operand.vmem [shape: f32[32,256], index: 1, kind: output, shape index: {}]  }
   0x1   :  { %v392_v0 = vld [vmem:[%s904_s0 + $0x7] ss:$8 sm:$0xf]   ;;  %v387_v3 = vld [vmem:[%s904_s0 + $0x3] ss:$8 sm:$0xf]  }
   0x2   :  { %v393_v1 = vld [vmem:[%s904_s0 + $0x7] ss:$8 sm:$0xf0]   ;;  %v388_v4 = vld [vmem:[%s904_s0 + $0x3] ss:$8 sm:$0xf0]  }
   0x3   :  { %v114_v2 = vsel %vm92_vm0, %v393_v1, %v392_v0  ;;  %v93_v5 = vsel %vm92_vm0, %v388_v4, %v387_v3  ;;  %v395_v6 = vld [vmem:[%s904_s0 + $0x87] ss:$8 sm:$0xf]   ;;  %v389_v9 = vld [vmem:[%s904_s0 + $0x83] ss:$8 sm:$0xf]  }
   0x4   :  { %115 = vrot.lane.b32.xlu1 %v114_v2, %s459_s14  ;;  %v396_v7 = vld [vmem:[%s904_s0 + $0x87] ss:$8 sm:$0xf0]   ;;  %94 = vrot.lane.b32.xlu0 %v93_v5, %s459_s14  ;;  %v390_v10 = vld [vmem:[%s904_s0 + $0x83] ss:$8 sm:$0xf0]  }
   0x5   :  { %v125_v8 = vsel %vm92_vm0, %v396_v7, %v395_v6  ;;  %v103_v11 = vsel %vm92_vm0, %v390_v10, %v389_v9  ;;  %v401_v12 = vld [vmem:[%s904_s0 + $0xc3] ss:$8 sm:$0xf]   ;;  %v407_v18 = vld [vmem:[%s904_s0 + $0xc7] ss:$8 sm:$0xf]  }
   0x6   :  { %v402_v13 = vld [vmem:[%s904_s0 + $0xc3] ss:$8 sm:$0xf0]   ;;  %v408_v19 = vld [vmem:[%s904_s0 + $0xc7] ss:$8 sm:$0xf0]  }
   0x7   :  { %v398_v14 = vld [vmem:[%s904_s0 + $0x43] ss:$8 sm:$0xf]   ;;  %v147_v16 = vsel %vm92_vm0, %v402_v13, %v401_v12  ;;  %v404_v20 = vld [vmem:[%s904_s0 + $0x47] ss:$8 sm:$0xf]   ;;  %v169_v22 = vsel %vm92_vm0, %v408_v19, %v407_v18 }
   0x8   :  { %v399_v15 = vld [vmem:[%s904_s0 + $0x43] ss:$8 sm:$0xf0]   ;;  %126 = vrot.lane.b32.xlu1 %v125_v8, %s459_s14  ;;  %104 = vrot.lane.b32.xlu0 %v103_v11, %s459_s14  ;;  %v405_v21 = vld [vmem:[%s904_s0 + $0x47] ss:$8 sm:$0xf0]  }
   0x9   :  { %v136_v17 = vsel %vm92_vm0, %v399_v15, %v398_v14  ;;  %v158_v23 = vsel %vm92_vm0, %v405_v21, %v404_v20  ;;  %v412_v24 = vld [vmem:[%s904_s0 + $0x82] ss:$8 sm:$0xf]   ;;  %v418_v30 = vld [vmem:[%s904_s0 + $0x86] ss:$8 sm:$0xf]  }
   0xa   :  { %v413_v25 = vld [vmem:[%s904_s0 + $0x82] ss:$8 sm:$0xf0]   ;;  %v419_v31 = vld [vmem:[%s904_s0 + $0x86] ss:$8 sm:$0xf0]  }
   0xb   :  { %v410_v26 = vld [vmem:[%s904_s0 + $0x2] ss:$8 sm:$0xf]   ;;  %v190_v28 = vsel %vm92_vm0, %v413_v25, %v412_v24  ;;  %v415_v32 = vld [vmem:[%s904_s0 + $0x6] ss:$8 sm:$0xf]   ;;  %v212_v34 = vsel %vm92_vm0, %v419_v31, %v418_v30 }
   0xc   :  { %148 = vrot.lane.b32.xlu1 %v147_v16, %s459_s14  ;;  %137 = vrot.lane.b32.xlu0 %v136_v17, %s459_s14  ;;  %v411_v27 = vld [vmem:[%s904_s0 + $0x2] ss:$8 sm:$0xf0]   ;;  %v416_v33 = vld [vmem:[%s904_s0 + $0x6] ss:$8 sm:$0xf0]  }
   0xd   :  { %v180_v29 = vsel %vm92_vm0, %v411_v27, %v410_v26  ;;  %v201_v35 = vsel %vm92_vm0, %v416_v33, %v415_v32  ;;  %v424_v36 = vld [vmem:[%s904_s0 + $0xc2] ss:$8 sm:$0xf]   ;;  %v430_v40 = vld [vmem:[%s904_s0 + $0xc6] ss:$8 sm:$0xf]  }
   0xe   :  { %v425_v37 = vld [vmem:[%s904_s0 + $0xc2] ss:$8 sm:$0xf0]   ;;  %v431_v42 = vld [vmem:[%s904_s0 + $0xc6] ss:$8 sm:$0xf0]  }
   0xf   :  { %v421_v38 = vld [vmem:[%s904_s0 + $0x42] ss:$8 sm:$0xf]   ;;  %v234_v41 = vsel %vm92_vm0, %v425_v37, %v424_v36  ;;  %v427_v43 = vld [vmem:[%s904_s0 + $0x46] ss:$8 sm:$0xf]   ;;  %v256_v53 = vsel %vm92_vm0, %v431_v42, %v430_v40 }
  0x10   :  { %170 = vrot.lane.b32.xlu1 %v169_v22, %s459_s14  ;;  %159 = vrot.lane.b32.xlu0 %v158_v23, %s459_s14  ;;  %v422_v39 = vld [vmem:[%s904_s0 + $0x42] ss:$8 sm:$0xf0]   ;;  %v428_v45 = vld [vmem:[%s904_s0 + $0x46] ss:$8 sm:$0xf0]  }
  0x11   :  { %v223_v44 = vsel %vm92_vm0, %v422_v39, %v421_v38  ;;  %v367_v46 = vld [vmem:[%s904_s0 + $0x80] ss:$4 sm:$0xff]   ;;  %v245_v55 = vsel %vm92_vm0, %v428_v45, %v427_v43  ;;  %v435_v56 = vld [vmem:[%s904_s0 + $0x81] ss:$8 sm:$0xf]   ;;  %s461_s25 = smov 32  }
  0x12   :  { %368 = vst.msk [vmem:[%s905_s1 + $0x20] ss:$8 sm:$0x3] %vm3_vm1, %v367_v46   ;;  %369 = vst.msk [vmem:[%s905_s1 + $0x11] ss:$8 sm:$0xc] %vm3_vm1, %v367_v46  }
  0x13   :  { %370 = vst.msk [vmem:[%s905_s1 + $0x2] ss:$8 sm:$0x30] %vm3_vm1, %v367_v46   ;;  %371 = vst.msk [vmem:[%s905_s1 - $0xd] ss:$8 sm:$0xc0] %vm3_vm1, %v367_v46  }
  0x14   :  { %191 = vrot.lane.b32.xlu1 %v190_v28, %s460_s26  ;;  %181 = vrot.lane.b32.xlu0 %v180_v29, %s460_s26  ;;  %v372_v47 = vld [vmem:[%s904_s0 + $0xa0] ss:$4 sm:$0xff]   ;;  %v436_v57 = vld [vmem:[%s904_s0 + $0x81] ss:$8 sm:$0xf0]   ;;  %vm270_vm4 = vcmask 523520  }
  0x15   :  { %v2_v48 = vld [vmem:[%s904_s0] ss:$4 sm:$0xff]   ;;  %373 = vst.msk [vmem:[%s905_s1 + $0x24] ss:$8 sm:$0x3] %vm3_vm1, %v372_v47   ;;  %v277_v60 = vsel %vm92_vm0, %v436_v57, %v435_v56 }
  0x16   :  { %v352_v49 = vld [vmem:[%s904_s0 + $0x20] ss:$4 sm:$0xff]   ;;  %374 = vst.msk [vmem:[%s905_s1 + $0x15] ss:$8 sm:$0xc] %vm3_vm1, %v372_v47  }
  0x17   :  { %375 = vst.msk [vmem:[%s905_s1 + $0x6] ss:$8 sm:$0x30] %vm3_vm1, %v372_v47   ;;  %376 = vst.msk [vmem:[%s905_s1 - $0x9] ss:$8 sm:$0xc0] %vm3_vm1, %v372_v47  }
  0x18   :  { %213 = vrot.lane.b32.xlu1 %v212_v34, %s460_s26  ;;  %202 = vrot.lane.b32.xlu0 %v201_v35, %s460_s26  ;;  %4 = vst.msk [vmem:[%s905_s1] ss:$8 sm:$0x3] %vm3_vm1, %v2_v48   ;;  %349 = vst.msk [vmem:[%s905_s1 - $0xf] ss:$8 sm:$0xc] %vm3_vm1, %v2_v48  }
  0x19   :  { %350 = vst.msk [vmem:[%s905_s1 - $0x1e] ss:$8 sm:$0x30] %vm3_vm1, %v2_v48   ;;  %351 = vst.msk [vmem:[%s905_s1 - $0x2d] ss:$8 sm:$0xc0] %vm3_vm1, %v2_v48  }
  0x1a   :  { %353 = vst.msk [vmem:[%s905_s1 + $0x4] ss:$8 sm:$0x3] %vm3_vm1, %v352_v49   ;;  %354 = vst.msk [vmem:[%s905_s1 - $0xb] ss:$8 sm:$0xc] %vm3_vm1, %v352_v49  }
  0x1b   :  { %355 = vst.msk [vmem:[%s905_s1 - $0x1a] ss:$8 sm:$0x30] %vm3_vm1, %v352_v49   ;;  %356 = vst.msk [vmem:[%s905_s1 - $0x29] ss:$8 sm:$0xc0] %vm3_vm1, %v352_v49  }
  0x1c   :  { %235 = vrot.lane.b32.xlu1 %v234_v41, %s460_s26  ;;  %v377_v50 = vld [vmem:[%s904_s0 + $0xc0] ss:$4 sm:$0xff]   ;;  %224 = vrot.lane.b32.xlu0 %v223_v44, %s460_s26  ;;  %v433_v58 = vld [vmem:[%s904_s0 + $0x1] ss:$8 sm:$0xf]  }
  0x1d   :  { %v382_v51 = vld [vmem:[%s904_s0 + $0xe0] ss:$4 sm:$0xff]   ;;  %378 = vst.msk [vmem:[%s905_s1 + $0x30] ss:$8 sm:$0x3] %vm3_vm1, %v377_v50  }
  0x1e   :  { %v357_v52 = vld [vmem:[%s904_s0 + $0x40] ss:$4 sm:$0xff]   ;;  %379 = vst.msk [vmem:[%s905_s1 + $0x21] ss:$8 sm:$0xc] %vm3_vm1, %v377_v50  }
  0x1f   :  { %380 = vst.msk [vmem:[%s905_s1 + $0x12] ss:$8 sm:$0x30] %vm3_vm1, %v377_v50   ;;  %381 = vst.msk [vmem:[%s905_s1 + $0x3] ss:$8 sm:$0xc0] %vm3_vm1, %v377_v50  }
  0x20   :  { %383 = vst.msk [vmem:[%s905_s1 + $0x34] ss:$8 sm:$0x3] %vm3_vm1, %v382_v51   ;;  %384 = vst.msk [vmem:[%s905_s1 + $0x25] ss:$8 sm:$0xc] %vm3_vm1, %v382_v51   ;;  %257 = vrot.lane.b32.xlu1 %v256_v53, %s460_s26  ;;  %246 = vrot.lane.b32.xlu0 %v245_v55, %s460_s26 }
  0x21   :  { %385 = vst.msk [vmem:[%s905_s1 + $0x16] ss:$8 sm:$0x30] %vm3_vm1, %v382_v51   ;;  %386 = vst.msk [vmem:[%s905_s1 + $0x7] ss:$8 sm:$0xc0] %vm3_vm1, %v382_v51  }
  0x22   :  { %358 = vst.msk [vmem:[%s905_s1 + $0x10] ss:$8 sm:$0x3] %vm3_vm1, %v357_v52   ;;  %359 = vst.msk [vmem:[%s905_s1 + $0x1] ss:$8 sm:$0xc] %vm3_vm1, %v357_v52  }
  0x23   :  { %360 = vst.msk [vmem:[%s905_s1 - $0xe] ss:$8 sm:$0x30] %vm3_vm1, %v357_v52   ;;  %361 = vst.msk [vmem:[%s905_s1 - $0x1d] ss:$8 sm:$0xc0] %vm3_vm1, %v357_v52  }
  0x24   :  { %v362_v54 = vld [vmem:[%s904_s0 + $0x60] ss:$4 sm:$0xff]   ;;  %v434_v59 = vld [vmem:[%s904_s0 + $0x1] ss:$8 sm:$0xf0]   ;;  %278 = vrot.lane.b32.xlu1 %v277_v60, %s461_s25 }
  0x25   :  { %363 = vst.msk [vmem:[%s905_s1 + $0x14] ss:$8 sm:$0x3] %vm3_vm1, %v362_v54   ;;  %364 = vst.msk [vmem:[%s905_s1 + $0x5] ss:$8 sm:$0xc] %vm3_vm1, %v362_v54   ;;  %v267_v61 = vsel %vm92_vm0, %v434_v59, %v433_v58 }
  0x26   :  { %365 = vst.msk [vmem:[%s905_s1 - $0xa] ss:$8 sm:$0x30] %vm3_vm1, %v362_v54   ;;  %366 = vst.msk [vmem:[%s905_s1 - $0x19] ss:$8 sm:$0xc0] %vm3_vm1, %v362_v54   ;;  %268 = vrot.lane.b32.xlu0 %v267_v61, %s461_s25 }
  0x27   :  { %v441_v62 = vld [vmem:[%s904_s0 + $0x85] ss:$8 sm:$0xf]   ;;  %v447_v4 = vld [vmem:[%s904_s0 + $0xc1] ss:$8 sm:$0xf]  }
  0x28   :  { %v442_v63 = vld [vmem:[%s904_s0 + $0x85] ss:$8 sm:$0xf0]   ;;  %v448_v5 = vld [vmem:[%s904_s0 + $0xc1] ss:$8 sm:$0xf0]  }
  0x29   :  { %v438_v0 = vld [vmem:[%s904_s0 + $0x5] ss:$8 sm:$0xf]   ;;  %v299_v2 = vsel %vm92_vm0, %v442_v63, %v441_v62  ;;  %v444_v6 = vld [vmem:[%s904_s0 + $0x41] ss:$8 sm:$0xf]   ;;  %v321_v8 = vsel %vm92_vm0, %v448_v5, %v447_v4 }
  0x2a   :  { %v439_v1 = vld [vmem:[%s904_s0 + $0x5] ss:$8 sm:$0xf0]   ;;  %v445_v7 = vld [vmem:[%s904_s0 + $0x41] ss:$8 sm:$0xf0]   ;;  %300 = vrot.lane.b32.xlu1 %v299_v2, %s461_s25 }
  0x2b   :  { %v288_v3 = vsel %vm92_vm0, %v439_v1, %v438_v0  ;;  %v310_v9 = vsel %vm92_vm0, %v445_v7, %v444_v6  ;;  %v453_v10 = vld [vmem:[%s904_s0 + $0xc5] ss:$8 sm:$0xf]  }
  0x2c   :  { %289 = vrot.lane.b32.xlu0 %v288_v3, %s461_s25  ;;  %v454_v11 = vld [vmem:[%s904_s0 + $0xc5] ss:$8 sm:$0xf0]  }
  0x2d   :  { %v450_v12 = vld [vmem:[%s904_s0 + $0x45] ss:$8 sm:$0xf]   ;;  %v343_v14 = vsel %vm92_vm0, %v454_v11, %v453_v10 }
  0x2e   :  { %v451_v13 = vld [vmem:[%s904_s0 + $0x45] ss:$8 sm:$0xf0]   ;;  %322 = vrot.lane.b32.xlu1 %v321_v8, %s461_s25 }
  0x2f   :  { %v332_v15 = vsel %vm92_vm0, %v451_v13, %v450_v12 }
  0x30   :  { %311 = vrot.lane.b32.xlu0 %v310_v9, %s461_s25 }
  0x32   :  { %344 = vrot.lane.b32.xlu1 %v343_v14, %s461_s25 }
  0x34   :  { %333 = vrot.lane.b32.xlu0 %v332_v15, %s461_s25 }
  0x76   :  { %v116_v16 = vpop.permute.xlu1 %115   ;;  %v95_v17 = vpop.permute.xlu0 %94  }
  0x77   :  { %394 = vst.msk [vmem:[%s905_s1 + $0x8] sm:$0xff] %vm96_vm2, %v116_v16   ;;  %97 = vst.msk [vmem:[%s905_s1] sm:$0xff] %vm96_vm2, %v95_v17  }
  0x7a   :  { %v127_v18 = vpop.permute.xlu1 %126   ;;  %v105_v19 = vpop.permute.xlu0 %104  }
  0x7b   :  { %397 = vst.msk [vmem:[%s905_s1 + $0x28] sm:$0xff] %vm96_vm2, %v127_v18   ;;  %391 = vst.msk [vmem:[%s905_s1 + $0x20] sm:$0xff] %vm96_vm2, %v105_v19  }
  0x7e   :  { %v149_v20 = vpop.permute.xlu1 %148   ;;  %v138_v21 = vpop.permute.xlu0 %137  }
  0x7f   :  { %403 = vst.msk [vmem:[%s905_s1 + $0x30] sm:$0xff] %vm96_vm2, %v149_v20   ;;  %400 = vst.msk [vmem:[%s905_s1 + $0x10] sm:$0xff] %vm96_vm2, %v138_v21  }
  0x82   :  { %v171_v22 = vpop.permute.xlu1 %170   ;;  %v160_v23 = vpop.permute.xlu0 %159  }
  0x83   :  { %409 = vst.msk [vmem:[%s905_s1 + $0x38] sm:$0xff] %vm96_vm2, %v171_v22   ;;  %406 = vst.msk [vmem:[%s905_s1 + $0x18] sm:$0xff] %vm96_vm2, %v160_v23  }
  0x86   :  { %v192_v24 = vpop.permute.xlu1 %191   ;;  %v182_v25 = vpop.permute.xlu0 %181  }
  0x87   :  { %414 = vst.msk [vmem:[%s905_s1 + $0x20] sm:$0xff] %vm183_vm3, %v192_v24   ;;  %184 = vst.msk [vmem:[%s905_s1] sm:$0xff] %vm183_vm3, %v182_v25  }
  0x8a   :  { %v214_v26 = vpop.permute.xlu1 %213   ;;  %v203_v27 = vpop.permute.xlu0 %202  }
  0x8b   :  { %420 = vst.msk [vmem:[%s905_s1 + $0x28] sm:$0xff] %vm183_vm3, %v214_v26   ;;  %417 = vst.msk [vmem:[%s905_s1 + $0x8] sm:$0xff] %vm183_vm3, %v203_v27  }
  0x8e   :  { %v236_v28 = vpop.permute.xlu1 %235   ;;  %v225_v29 = vpop.permute.xlu0 %224  }
  0x8f   :  { %426 = vst.msk [vmem:[%s905_s1 + $0x30] sm:$0xff] %vm183_vm3, %v236_v28   ;;  %423 = vst.msk [vmem:[%s905_s1 + $0x10] sm:$0xff] %vm183_vm3, %v225_v29  }
  0x92   :  { %v258_v30 = vpop.permute.xlu1 %257   ;;  %v247_v31 = vpop.permute.xlu0 %246  }
  0x93   :  { %432 = vst.msk [vmem:[%s905_s1 + $0x38] sm:$0xff] %vm183_vm3, %v258_v30   ;;  %429 = vst.msk [vmem:[%s905_s1 + $0x18] sm:$0xff] %vm183_vm3, %v247_v31  }
  0x96   :  { %v279_v32 = vpop.permute.xlu1 %278  }
  0x97   :  { %437 = vst.msk [vmem:[%s905_s1 + $0x20] sm:$0xff] %vm270_vm4, %v279_v32  }
  0x98   :  { %v269_v33 = vpop.permute.xlu0 %268  }
  0x99   :  { %271 = vst.msk [vmem:[%s905_s1] sm:$0xff] %vm270_vm4, %v269_v33  }
  0x9c   :  { %v301_v34 = vpop.permute.xlu1 %300  }
  0x9d   :  { %443 = vst.msk [vmem:[%s905_s1 + $0x28] sm:$0xff] %vm270_vm4, %v301_v34  }
  0x9e   :  { %v290_v35 = vpop.permute.xlu0 %289  }
  0x9f   :  { %440 = vst.msk [vmem:[%s905_s1 + $0x8] sm:$0xff] %vm270_vm4, %v290_v35  }
  0xa0   :  { %v323_v36 = vpop.permute.xlu1 %322  }
  0xa1   :  { %449 = vst.msk [vmem:[%s905_s1 + $0x30] sm:$0xff] %vm270_vm4, %v323_v36  }
  0xa2   :  { %v312_v37 = vpop.permute.xlu0 %311  }
  0xa3   :  { %446 = vst.msk [vmem:[%s905_s1 + $0x10] sm:$0xff] %vm270_vm4, %v312_v37  }
  0xa4   :  { %v345_v38 = vpop.permute.xlu1 %344  }
  0xa5   :  { %455 = vst.msk [vmem:[%s905_s1 + $0x38] sm:$0xff] %vm270_vm4, %v345_v38  }
  0xa6   :  { %v334_v39 = vpop.permute.xlu0 %333  }
  0xa7   :  { %452 = vst.msk [vmem:[%s905_s1 + $0x18] sm:$0xff] %vm270_vm4, %v334_v39  }

// kernel: _lambda_.3
= control target key start
LH: loop header
LB: loop body
LE: loop exit
PB: predicated region body
PF: predicated region fallthrough
CT: control target
= control target key end

     0   :  { %s1264_s0 = inlined_call_operand.vmem [shape: s32[1024], index: 0, kind: input, shape index: {}]   ;;  %s1265_s2 = inlined_call_operand.vmem [shape: f32[64,256], index: 2, kind: input, shape index: {}]   ;;  %s1266_s3 = inlined_call_operand.vmem [shape: f32[64,32], index: 3, kind: input, shape index: {}]   ;;  %s1267_s4 = inlined_call_operand.vmem [shape: f32[32,256], index: 4, kind: input, shape index: {}]   ;;  %s1268_s5 = inlined_call_operand.vmem [shape: f32[1024,256], index: 5, kind: output, shape index: {}]   ;;  %s1269_s1 = inlined_call_operand.vmem [shape: s32[1024], index: 1, kind: input, shape index: {}]  }
   0x1   :  { %s10_s20 = sshll.u32 %s1264_s0, 4  ;;  %s14_s23 = sshll.u32 %s1269_s1, 4  ;;  %s11_s20 = int_to_ptr.vmem [resolvable:$true] %s10_s20  ;;  %s15_s23 = int_to_ptr.vmem [resolvable:$true] %s14_s23 }
   0x2   :  { %s933_s24 = scalar_lea.vmem %s11_s20, 128  ;;  %p938_p1 = scmp.lt.s32.totalorder %s11_s20, %s11_s20 }
   0x3   :  { %p934_p0 = scmp.ne.s32.totalorder %s11_s20, %s933_s24  ;;  %p939_p2 = scmp.lt.s32.totalorder %s933_s24, %s933_s24 }
   0x5   :  { %p940_p3 = por %p939_p2, %p938_p1 }
   0x7   :  { %p941_p4 = pnand %p940_p3, %p934_p0 }
   0x9   :  { %944 = shalt.err (!%p941_p4)  }
   0xa   :  { %s975_s25 = smov [#allocation4]   ;;  %s945_s26 = scalar_lea.vmem %s15_s23, 128 }
   0xb   :  { %13 = dma.vmem_to_smem %s11_s20, 128, %s975_s25, [#allocation3] }
   0xc   :  { %p946_p5 = scmp.ne.s32.totalorder %s15_s23, %s945_s26  ;;  %p950_p6 = scmp.lt.s32.totalorder %s15_s23, %s15_s23 }
   0xd   :  { %p951_p7 = scmp.lt.s32.totalorder %s945_s26, %s945_s26 }
   0xf   :  { %p952_p8 = por %p951_p7, %p950_p6 }
  0x11   :  { %p953_p9 = pnand %p952_p8, %p946_p5 }
  0x13   :  { %956 = shalt.err (!%p953_p9)  }
  0x14   :  { %s976_s0 = smov [#allocation5]  }
  0x15   :  { %17 = dma.vmem_to_smem %s15_s23, 128, %s976_s0, [#allocation3] }
  0x16   :  { %965 = dma.done.wait [#allocation3], 256 }
  0x17   :  { %966 = vsyncadd [#allocation3], 4294967040 }
  0x18   :  { %19 = sfence }
  0x19   :  { %s1014_s1 = smov 0  }
  0x1a LB: > { %s853_s27 = sadd.s32 4294967295, %s969_s1   ;;  %p856_p10 = scmp.ge.s32.totalorder %s969_s1, 1  ;;  %s969_s1 = sphi %s1014_s1, %s25_s1  }
  0x1b   : > { %p139_p11 = scmp.lt.s32.totalorder %s969_s1, 5 }
  0x1d   : > { %p140_p12 = pnand %p856_p10, %p139_p11 }
  0x1e   : > { %s857_s28 = sshll.u32 (!%p140_p12), %s853_s27, 5  ;;  %s1022_s29 = sshll.u32 (!%p140_p12), %s853_s27, 8 }
  0x1f   : > { %143 = sbr.rel (%p140_p12) target bundleno = 339 (0x153), region = 32  ;;  %p160_p13 = scmp.lt.s32.totalorder (!%p140_p12), %s857_s28, 127 }
  0x20   : > { %s1029_s9 = smov (!%p140_p12), 0  }
  0x26   : > { %s1271_s28 = smov (!%p160_p13, %s857_s28), 127 }
  0x27   : > { %s899_s30 = sshll.u32 %s1271_s28, 4 }
  0x28   : > { %s1027_s8 = scalar_lea.vmem %s1268_s5, %s899_s30 }
  0x29 LB: >> { %s173_s10 = sadd.s32 %s973_s9, %s1022_s29  ;;  %s189_s11 = sshra.s32 %s973_s9, 3  ;;  %v185_v0 = vlaneseq  ;;  %vm205_vm1 = vcmask 253952   ;;  %s973_s9 = sphi %s1029_s9, %s172_s9  }
  0x2a   : >> { %s175_s12 = sld [smem:[#allocation5 + %s173_s10]]  ;;  %s192_s13 = sand.u32 7, %s973_s9 }
  0x2b   : >> { %s901_s14 = sshll.u32 %s189_s11, 4  ;;  %s174_s15 = sld [smem:[#allocation4 + %s173_s10]]  ;;  %vm187_vm0 = vcmp.lt.s32.totalorder %v185_v0, 256 }
  0x2c   : >> { %s195_s16 = sadd.s32 %s901_s14, %s192_s13  ;;  %s204_s6 = scalar_lea.vmem [#allocation2], %s973_s9 }
  0x2d   : >> { %s196_s17 = scalar_lea.vmem %s1027_s8, %s195_s16  ;;  %s172_s9 = sadd.s32 1, %s973_s9  }
  0x2e   : >> { %p169_p0 = scmp.ge.s32.totalorder %s172_s9, 256  }
  0x2f   : > { %v240_v5 = vld [vmem:[%s1267_s4 + $0x8] sm:$0xff] (%p169_p0)  ;;  %v242_v6 = vld [vmem:[%s1267_s4 + $0x18] sm:$0xff] (%p169_p0)  ;;  %v239_v7 = vld [vmem:[%s1267_s4] sm:$0xff] (%p169_p0)  ;;  %v977_v12 = vmov (%p169_p0), 0.0   ;;  %vm247_vm2 = vcmask (%p169_p0), 261120  }
  0x30   : >> { %s176_s18 = sshra.s32 %s175_s12, 3  ;;  %s179_s19 = sand.u32 7, %s175_s12  ;;  %v902_v8 = vpack.c.bf16 (%p169_p0), %v242_v6, %v240_v5  ;;  %v241_v9 = vld [vmem:[%s1267_s4 + $0x10] sm:$0xff] (%p169_p0)  ;;  %v244_v10 = vld [vmem:[%s1267_s4 + $0x28] sm:$0xff] (%p169_p0)  ;;  %v246_v11 = vld [vmem:[%s1267_s4 + $0x38] sm:$0xff] (%p169_p0)  ;;  %408 = vmatprep.mubr.f32.mxu0 (%p169_p0), %v977_v12  ;;  %504 = vmatprep.mubr.f32.mxu1 (%p169_p0), %v977_v12 }
  0x31   : >> { %s900_s20 = sshll.u32 %s176_s18, 4  ;;  %s199_s23 = scalar_lea.vmem %s1266_s3, %s174_s15  ;;  %v904_v13 = vpack.c.bf16 (%p169_p0), %v241_v9, %v239_v7  ;;  %v906_v14 = vpack.c.bf16 (%p169_p0), %v246_v11, %v244_v10  ;;  %v243_v15 = vld [vmem:[%s1267_s4 + $0x20] sm:$0xff] (%p169_p0)  ;;  %v245_v16 = vld [vmem:[%s1267_s4 + $0x30] sm:$0xff] (%p169_p0) }
  0x32   : >> { %s182_s24 = sadd.s32 %s900_s20, %s179_s19  ;;  %v200_v1 = vld [vmem:[%s199_s23] sm:$0x1]  ;;  %s201_s0 = scalar_lea.vmem %s1266_s3, %s175_s12  ;;  %903 = vmatprep.subr.bf16.mxu0 (%p169_p0), %v902_v8  ;;  %910 = vmatprep.subr.bf16.mxu1 (%p169_p0), %v902_v8  ;;  %v908_v17 = vpack.c.bf16 (%p169_p0), %v245_v16, %v243_v15 }
  0x33   : >> { %s183_s30 = scalar_lea.vmem %s1265_s2, %s182_s24  ;;  %v202_v2 = vld [vmem:[%s201_s0] sm:$0x1]  ;;  %171 = sbr.rel (!%p169_p0) target bundleno = 41 (0x29), region = 71  ;;  %905 = vmatpush1.bf16.msra.mxu0 (%p169_p0), %v904_v13  ;;  %912 = vmatpush1.bf16.msra.mxu1 (%p169_p0), %v904_v13 }
  0x34   : >> { %v184_v3 = vld [vmem:[%s183_s30] ss:$8 sm:$0x3]  ;;  %v203_v4 = vadd.f32 %v202_v2, %v200_v1  ;;  %907 = vmatprep.subr.bf16.mxu0 (%p169_p0), %v906_v14  ;;  %911 = vmatprep.subr.bf16.mxu1 (%p169_p0), %v906_v14 }
  0x35   : >> { %197 = vst.msk [vmem:[%s196_s17] ss:$8 sm:$0x3] %vm187_vm0, %v184_v3 }
  0x36   : >> { %206 = vst.msk [vmem:[%s204_s6] sm:$0x1] %vm205_vm1, %v203_v4 }
  0x37   : > { %909 = vmatpush1.bf16.msra.mxu0 (%p169_p0), %v908_v17  ;;  %913 = vmatpush1.bf16.msra.mxu1 (%p169_p0), %v908_v17 }
  0x3c   : > { %v601_v50 = vld [vmem:[%s1027_s8] sm:$0xff]  ;;  %v602_v52 = vld [vmem:[%s1027_s8 + $0x8] sm:$0xff]  ;;  %v603_v62 = vld [vmem:[%s1027_s8 + $0x10] sm:$0xff] }
  0x3d   : > { %v207_v18 = vld [vmem:[#allocation2] sm:$0xff]  ;;  %v208_v20 = vld [vmem:[#allocation2 + $0x8] sm:$0xff]  ;;  %v209_v22 = vld [vmem:[#allocation2 + $0x10] sm:$0xff] }
  0x3e   : > { %v223_v19 = vld [vmem:[#allocation2 + $0x80] sm:$0xff]  ;;  %865 = vmatmul.mubr.msk.f32.vlgmr.msra.gmra.mrb[0].mxu0 %vm247_vm2, %v207_v18  ;;  %v224_v21 = vld [vmem:[#allocation2 + $0x88] sm:$0xff]  ;;  %v225_v23 = vld [vmem:[#allocation2 + $0x90] sm:$0xff] }
  0x3f   : > { %881 = vmatmul.mubr.msk.f32.vlgmr.msra.gmra.mrb[0].mxu1 %vm247_vm2, %v223_v19  ;;  %414 = vmatprep.mubr.f32.mxu0 %v977_v12  ;;  %v210_v24 = vld [vmem:[#allocation2 + $0x18] sm:$0xff]  ;;  %v211_v26 = vld [vmem:[#allocation2 + $0x20] sm:$0xff]  ;;  %v212_v28 = vld [vmem:[#allocation2 + $0x28] sm:$0xff] }
  0x40   : > { %510 = vmatprep.mubr.f32.mxu1 %v977_v12  ;;  %v226_v25 = vld [vmem:[#allocation2 + $0x98] sm:$0xff]  ;;  %v227_v27 = vld [vmem:[#allocation2 + $0xa0] sm:$0xff]  ;;  %v228_v29 = vld [vmem:[#allocation2 + $0xa8] sm:$0xff] }
  0x41   : > { %v213_v30 = vld [vmem:[#allocation2 + $0x30] sm:$0xff]  ;;  %v214_v32 = vld [vmem:[#allocation2 + $0x38] sm:$0xff]  ;;  %v215_v34 = vld [vmem:[#allocation2 + $0x40] sm:$0xff] }
  0x42   : > { %866 = vmatmul.mubr.msk.f32.gmra.mrb[2].mxu0 %vm247_vm2, %v208_v20  ;;  %v229_v31 = vld [vmem:[#allocation2 + $0xb0] sm:$0xff]  ;;  %v230_v33 = vld [vmem:[#allocation2 + $0xb8] sm:$0xff]  ;;  %v231_v35 = vld [vmem:[#allocation2 + $0xc0] sm:$0xff] }
  0x43   : > { %882 = vmatmul.mubr.msk.f32.gmra.mrb[2].mxu1 %vm247_vm2, %v224_v21  ;;  %420 = vmatprep.mubr.f32.mxu0 %v977_v12  ;;  %v216_v36 = vld [vmem:[#allocation2 + $0x48] sm:$0xff]  ;;  %v217_v38 = vld [vmem:[#allocation2 + $0x50] sm:$0xff]  ;;  %v218_v40 = vld [vmem:[#allocation2 + $0x58] sm:$0xff] }
  0x44   : > { %516 = vmatprep.mubr.f32.mxu1 %v977_v12  ;;  %v232_v37 = vld [vmem:[#allocation2 + $0xc8] sm:$0xff]  ;;  %v233_v39 = vld [vmem:[#allocation2 + $0xd0] sm:$0xff]  ;;  %v234_v41 = vld [vmem:[#allocation2 + $0xd8] sm:$0xff] }
  0x45   : > { %v219_v42 = vld [vmem:[#allocation2 + $0x60] sm:$0xff]  ;;  %v220_v44 = vld [vmem:[#allocation2 + $0x68] sm:$0xff]  ;;  %v221_v46 = vld [vmem:[#allocation2 + $0x70] sm:$0xff] }
  0x46   : > { %867 = vmatmul.mubr.msk.f32.gmra.mrb[4].mxu0 %vm247_vm2, %v209_v22  ;;  %v235_v43 = vld [vmem:[#allocation2 + $0xe0] sm:$0xff]  ;;  %v236_v45 = vld [vmem:[#allocation2 + $0xe8] sm:$0xff]  ;;  %v237_v47 = vld [vmem:[#allocation2 + $0xf0] sm:$0xff] }
  0x47   : > { %883 = vmatmul.mubr.msk.f32.gmra.mrb[4].mxu1 %vm247_vm2, %v225_v23  ;;  %426 = vmatprep.mubr.f32.mxu0 %v977_v12  ;;  %v222_v48 = vld [vmem:[#allocation2 + $0x78] sm:$0xff]  ;;  %v633_v51 = vld [vmem:[%s1027_s8 + $0x100] sm:$0xff]  ;;  %v634_v53 = vld [vmem:[%s1027_s8 + $0x108] sm:$0xff] }
  0x48   : > { %522 = vmatprep.mubr.f32.mxu1 %v977_v12  ;;  %v238_v49 = vld [vmem:[#allocation2 + $0xf8] sm:$0xff]  ;;  %v635_v63 = vld [vmem:[%s1027_s8 + $0x110] sm:$0xff]  ;;  %v605_v10 = vld [vmem:[%s1027_s8 + $0x20] sm:$0xff] }
  0x49   : > { %v604_v0 = vld [vmem:[%s1027_s8 + $0x18] sm:$0xff]  ;;  %v637_v11 = vld [vmem:[%s1027_s8 + $0x120] sm:$0xff]  ;;  %v638_v13 = vld [vmem:[%s1027_s8 + $0x128] sm:$0xff] }
  0x4a   : > { %868 = vmatmul.mubr.msk.f32.gmra.mrb[6].mxu0 %vm247_vm2, %v210_v24  ;;  %v636_v1 = vld [vmem:[%s1027_s8 + $0x118] sm:$0xff]  ;;  %v607_v22 = vld [vmem:[%s1027_s8 + $0x30] sm:$0xff] }
  0x4b   : > { %884 = vmatmul.mubr.msk.f32.gmra.mrb[6].mxu1 %vm247_vm2, %v226_v25  ;;  %432 = vmatprep.mubr.f32.mxu0 %v977_v12  ;;  %v639_v23 = vld [vmem:[%s1027_s8 + $0x130] sm:$0xff]  ;;  %v608_v24 = vld [vmem:[%s1027_s8 + $0x38] sm:$0xff] }
  0x4c   : > { %528 = vmatprep.mubr.f32.mxu1 %v977_v12  ;;  %v640_v25 = vld [vmem:[%s1027_s8 + $0x138] sm:$0xff] }
  0x4e   : > { %869 = vmatmul.mubr.msk.f32.gmra.mrb[8].mxu0 %vm247_vm2, %v211_v26 }
  0x4f   : > { %885 = vmatmul.mubr.msk.f32.gmra.mrb[8].mxu1 %vm247_vm2, %v227_v27  ;;  %438 = vmatprep.mubr.f32.mxu0 %v977_v12 }
  0x50   : > { %534 = vmatprep.mubr.f32.mxu1 %v977_v12 }
  0x52   : > { %870 = vmatmul.mubr.msk.f32.gmra.mrb[10].mxu0 %vm247_vm2, %v212_v28 }
  0x53   : > { %886 = vmatmul.mubr.msk.f32.gmra.mrb[10].mxu1 %vm247_vm2, %v228_v29  ;;  %444 = vmatprep.mubr.f32.mxu0 %v977_v12 }
  0x54   : > { %540 = vmatprep.mubr.f32.mxu1 %v977_v12 }
  0x56   : > { %871 = vmatmul.mubr.msk.f32.gmra.mrb[12].mxu0 %vm247_vm2, %v213_v30 }
  0x57   : > { %887 = vmatmul.mubr.msk.f32.gmra.mrb[12].mxu1 %vm247_vm2, %v229_v31  ;;  %450 = vmatprep.mubr.f32.mxu0 %v977_v12 }
  0x58   : > { %546 = vmatprep.mubr.f32.mxu1 %v977_v12 }
  0x5a   : > { %872 = vmatmul.mubr.msk.f32.gmra.mrb[14].mxu0 %vm247_vm2, %v214_v32 }
  0x5b   : > { %888 = vmatmul.mubr.msk.f32.gmra.mrb[14].mxu1 %vm247_vm2, %v230_v33  ;;  %456 = vmatprep.mubr.f32.mxu0 %v977_v12 }
  0x5c   : > { %552 = vmatprep.mubr.f32.mxu1 %v977_v12 }
  0x5e   : > { %873 = vmatmul.mubr.msk.f32.gmra.mrb[16].mxu0 %vm247_vm2, %v215_v34  ;;  %v609_v34 = vld [vmem:[%s1027_s8 + $0x40] sm:$0xff] }
  0x5f   : > { %889 = vmatmul.mubr.msk.f32.gmra.mrb[16].mxu1 %vm247_vm2, %v231_v35  ;;  %462 = vmatprep.mubr.f32.mxu0 %v977_v12  ;;  %v641_v35 = vld [vmem:[%s1027_s8 + $0x140] sm:$0xff] }
  0x60   : > { %558 = vmatprep.mubr.f32.mxu1 %v977_v12 }
  0x62   : > { %874 = vmatmul.mubr.msk.f32.gmra.mrb[18].mxu0 %vm247_vm2, %v216_v36  ;;  %v610_v36 = vld [vmem:[%s1027_s8 + $0x48] sm:$0xff] }
  0x63   : > { %890 = vmatmul.mubr.msk.f32.gmra.mrb[18].mxu1 %vm247_vm2, %v232_v37  ;;  %468 = vmatprep.mubr.f32.mxu0 %v977_v12  ;;  %v642_v37 = vld [vmem:[%s1027_s8 + $0x148] sm:$0xff] }
  0x64   : > { %564 = vmatprep.mubr.f32.mxu1 %v977_v12 }
  0x66   : > { %875 = vmatmul.mubr.msk.f32.gmra.mrb[20].mxu0 %vm247_vm2, %v217_v38 }
  0x67   : > { %891 = vmatmul.mubr.msk.f32.gmra.mrb[20].mxu1 %vm247_vm2, %v233_v39  ;;  %474 = vmatprep.mubr.f32.mxu0 %v977_v12 }
  0x68   : > { %570 = vmatprep.mubr.f32.mxu1 %v977_v12 }
  0x6a   : > { %876 = vmatmul.mubr.msk.f32.gmra.mrb[22].mxu0 %vm247_vm2, %v218_v40 }
  0x6b   : > { %892 = vmatmul.mubr.msk.f32.gmra.mrb[22].mxu1 %vm247_vm2, %v234_v41  ;;  %480 = vmatprep.mubr.f32.mxu0 %v977_v12 }
  0x6c   : > { %576 = vmatprep.mubr.f32.mxu1 %v977_v12 }
  0x6e   : > { %877 = vmatmul.mubr.msk.f32.gmra.mrb[24].mxu0 %vm247_vm2, %v219_v42 }
  0x6f   : > { %893 = vmatmul.mubr.msk.f32.gmra.mrb[24].mxu1 %vm247_vm2, %v235_v43  ;;  %486 = vmatprep.mubr.f32.mxu0 %v977_v12 }
  0x70   : > { %582 = vmatprep.mubr.f32.mxu1 %v977_v12 }
  0x72   : > { %878 = vmatmul.mubr.msk.f32.gmra.mrb[26].mxu0 %vm247_vm2, %v220_v44 }
  0x73   : > { %894 = vmatmul.mubr.msk.f32.gmra.mrb[26].mxu1 %vm247_vm2, %v236_v45  ;;  %492 = vmatprep.mubr.f32.mxu0 %v977_v12 }
  0x74   : > { %588 = vmatprep.mubr.f32.mxu1 %v977_v12 }
  0x76   : > { %879 = vmatmul.mubr.msk.f32.gmra.mrb[28].mxu0 %vm247_vm2, %v221_v46  ;;  %v611_v46 = vld [vmem:[%s1027_s8 + $0x50] sm:$0xff] }
  0x77   : > { %895 = vmatmul.mubr.msk.f32.gmra.mrb[28].mxu1 %vm247_vm2, %v237_v47  ;;  %498 = vmatprep.mubr.f32.mxu0 %v977_v12  ;;  %v643_v47 = vld [vmem:[%s1027_s8 + $0x150] sm:$0xff] }
  0x78   : > { %594 = vmatprep.mubr.f32.mxu1 %v977_v12  ;;  %v606_v12 = vld [vmem:[%s1027_s8 + $0x28] sm:$0xff] }
  0x7a   : > { %880 = vmatmul.mubr.msk.f32.gmra.mrb[30].mxu0 %vm247_vm2, %v222_v48  ;;  %v612_v48 = vld [vmem:[%s1027_s8 + $0x58] sm:$0xff] }
  0x7b   : > { %896 = vmatmul.mubr.msk.f32.gmra.mrb[30].mxu1 %vm247_vm2, %v238_v49  ;;  %v644_v49 = vld [vmem:[%s1027_s8 + $0x158] sm:$0xff] }
 0x111   : > { %v410_v54 = vpop.f32.mrb[0].mxu0 }
 0x112   : > { %v506_v55 = vpop.f32.mrb[0].mxu1  ;;  %v665_v56 = vadd.f32 %v601_v50, %v410_v54  ;;  %v412_v58 = vpop.f32.mrb[1].mxu0 }
 0x113   : > { %v697_v57 = vadd.f32 %v633_v51, %v506_v55  ;;  %v508_v59 = vpop.f32.mrb[1].mxu1  ;;  %v666_v60 = vadd.f32 %v602_v52, %v412_v58  ;;  %v613_v58 = vld [vmem:[%s1027_s8 + $0x60] sm:$0xff] }
 0x114   : > { %v698_v61 = vadd.f32 %v634_v53, %v508_v59  ;;  %729 = vst [vmem:[%s1027_s8] sm:$0xff] %v665_v56  ;;  %v645_v59 = vld [vmem:[%s1027_s8 + $0x160] sm:$0xff] }
 0x115   : > { %761 = vst [vmem:[%s1027_s8 + $0x100] sm:$0xff] %v697_v57  ;;  %730 = vst [vmem:[%s1027_s8 + $0x8] sm:$0xff] %v666_v60  ;;  %v416_v2 = vpop.f32.mrb[2].mxu0  ;;  %v614_v60 = vld [vmem:[%s1027_s8 + $0x68] sm:$0xff] }
 0x116   : > { %762 = vst [vmem:[%s1027_s8 + $0x108] sm:$0xff] %v698_v61  ;;  %v512_v3 = vpop.f32.mrb[2].mxu1  ;;  %v667_v4 = vadd.f32 %v603_v62, %v416_v2  ;;  %v418_v6 = vpop.f32.mrb[3].mxu0  ;;  %v646_v61 = vld [vmem:[%s1027_s8 + $0x168] sm:$0xff] }
 0x117   : > { %v699_v5 = vadd.f32 %v635_v63, %v512_v3  ;;  %v514_v7 = vpop.f32.mrb[3].mxu1  ;;  %v668_v8 = vadd.f32 %v604_v0, %v418_v6  ;;  %v615_v6 = vld [vmem:[%s1027_s8 + $0x70] sm:$0xff] }
 0x118   : > { %v700_v9 = vadd.f32 %v636_v1, %v514_v7  ;;  %731 = vst [vmem:[%s1027_s8 + $0x10] sm:$0xff] %v667_v4  ;;  %v647_v7 = vld [vmem:[%s1027_s8 + $0x170] sm:$0xff] }
 0x119   : > { %763 = vst [vmem:[%s1027_s8 + $0x110] sm:$0xff] %v699_v5  ;;  %732 = vst [vmem:[%s1027_s8 + $0x18] sm:$0xff] %v668_v8  ;;  %v422_v14 = vpop.f32.mrb[4].mxu0  ;;  %v616_v8 = vld [vmem:[%s1027_s8 + $0x78] sm:$0xff] }
 0x11a   : > { %764 = vst [vmem:[%s1027_s8 + $0x118] sm:$0xff] %v700_v9  ;;  %v518_v15 = vpop.f32.mrb[4].mxu1  ;;  %v669_v16 = vadd.f32 %v605_v10, %v422_v14  ;;  %v424_v18 = vpop.f32.mrb[5].mxu0  ;;  %v648_v9 = vld [vmem:[%s1027_s8 + $0x178] sm:$0xff] }
 0x11b   : > { %v701_v17 = vadd.f32 %v637_v11, %v518_v15  ;;  %v520_v19 = vpop.f32.mrb[5].mxu1  ;;  %v670_v20 = vadd.f32 %v606_v12, %v424_v18  ;;  %v617_v18 = vld [vmem:[%s1027_s8 + $0x80] sm:$0xff] }
 0x11c   : > { %v702_v21 = vadd.f32 %v638_v13, %v520_v19  ;;  %733 = vst [vmem:[%s1027_s8 + $0x20] sm:$0xff] %v669_v16  ;;  %v649_v19 = vld [vmem:[%s1027_s8 + $0x180] sm:$0xff] }
 0x11d   : > { %765 = vst [vmem:[%s1027_s8 + $0x120] sm:$0xff] %v701_v17  ;;  %734 = vst [vmem:[%s1027_s8 + $0x28] sm:$0xff] %v670_v20  ;;  %v428_v26 = vpop.f32.mrb[6].mxu0  ;;  %v618_v20 = vld [vmem:[%s1027_s8 + $0x88] sm:$0xff] }
 0x11e   : > { %766 = vst [vmem:[%s1027_s8 + $0x128] sm:$0xff] %v702_v21  ;;  %v524_v27 = vpop.f32.mrb[6].mxu1  ;;  %v671_v28 = vadd.f32 %v607_v22, %v428_v26  ;;  %v430_v30 = vpop.f32.mrb[7].mxu0  ;;  %v650_v21 = vld [vmem:[%s1027_s8 + $0x188] sm:$0xff] }
 0x11f   : > { %v703_v29 = vadd.f32 %v639_v23, %v524_v27  ;;  %v526_v31 = vpop.f32.mrb[7].mxu1  ;;  %v672_v32 = vadd.f32 %v608_v24, %v430_v30  ;;  %v619_v30 = vld [vmem:[%s1027_s8 + $0x90] sm:$0xff] }
 0x120   : > { %v704_v33 = vadd.f32 %v640_v25, %v526_v31  ;;  %735 = vst [vmem:[%s1027_s8 + $0x30] sm:$0xff] %v671_v28  ;;  %v651_v31 = vld [vmem:[%s1027_s8 + $0x190] sm:$0xff] }
 0x121   : > { %767 = vst [vmem:[%s1027_s8 + $0x130] sm:$0xff] %v703_v29  ;;  %736 = vst [vmem:[%s1027_s8 + $0x38] sm:$0xff] %v672_v32  ;;  %v434_v38 = vpop.f32.mrb[8].mxu0  ;;  %v620_v32 = vld [vmem:[%s1027_s8 + $0x98] sm:$0xff] }
 0x122   : > { %768 = vst [vmem:[%s1027_s8 + $0x138] sm:$0xff] %v704_v33  ;;  %v530_v39 = vpop.f32.mrb[8].mxu1  ;;  %v673_v40 = vadd.f32 %v609_v34, %v434_v38  ;;  %v436_v42 = vpop.f32.mrb[9].mxu0  ;;  %v652_v33 = vld [vmem:[%s1027_s8 + $0x198] sm:$0xff] }
 0x123   : > { %v705_v41 = vadd.f32 %v641_v35, %v530_v39  ;;  %v532_v43 = vpop.f32.mrb[9].mxu1  ;;  %v674_v44 = vadd.f32 %v610_v36, %v436_v42  ;;  %v621_v42 = vld [vmem:[%s1027_s8 + $0xa0] sm:$0xff] }
 0x124   : > { %v706_v45 = vadd.f32 %v642_v37, %v532_v43  ;;  %737 = vst [vmem:[%s1027_s8 + $0x40] sm:$0xff] %v673_v40  ;;  %v653_v43 = vld [vmem:[%s1027_s8 + $0x1a0] sm:$0xff] }
 0x125   : > { %769 = vst [vmem:[%s1027_s8 + $0x140] sm:$0xff] %v705_v41  ;;  %738 = vst [vmem:[%s1027_s8 + $0x48] sm:$0xff] %v674_v44  ;;  %v440_v50 = vpop.f32.mrb[10].mxu0  ;;  %v622_v44 = vld [vmem:[%s1027_s8 + $0xa8] sm:$0xff] }
 0x126   : > { %770 = vst [vmem:[%s1027_s8 + $0x148] sm:$0xff] %v706_v45  ;;  %v536_v51 = vpop.f32.mrb[10].mxu1  ;;  %v675_v52 = vadd.f32 %v611_v46, %v440_v50  ;;  %v442_v54 = vpop.f32.mrb[11].mxu0  ;;  %v654_v45 = vld [vmem:[%s1027_s8 + $0x1a8] sm:$0xff] }
 0x127   : > { %v707_v53 = vadd.f32 %v643_v47, %v536_v51  ;;  %v538_v55 = vpop.f32.mrb[11].mxu1  ;;  %v676_v56 = vadd.f32 %v612_v48, %v442_v54  ;;  %v623_v54 = vld [vmem:[%s1027_s8 + $0xb0] sm:$0xff] }
 0x128   : > { %v708_v57 = vadd.f32 %v644_v49, %v538_v55  ;;  %739 = vst [vmem:[%s1027_s8 + $0x50] sm:$0xff] %v675_v52  ;;  %v655_v55 = vld [vmem:[%s1027_s8 + $0x1b0] sm:$0xff] }
 0x129   : > { %771 = vst [vmem:[%s1027_s8 + $0x150] sm:$0xff] %v707_v53  ;;  %740 = vst [vmem:[%s1027_s8 + $0x58] sm:$0xff] %v676_v56  ;;  %v446_v62 = vpop.f32.mrb[12].mxu0  ;;  %v624_v56 = vld [vmem:[%s1027_s8 + $0xb8] sm:$0xff] }
 0x12a   : > { %772 = vst [vmem:[%s1027_s8 + $0x158] sm:$0xff] %v708_v57  ;;  %v542_v63 = vpop.f32.mrb[12].mxu1  ;;  %v677_v0 = vadd.f32 %v613_v58, %v446_v62  ;;  %v448_v2 = vpop.f32.mrb[13].mxu0  ;;  %v656_v57 = vld [vmem:[%s1027_s8 + $0x1b8] sm:$0xff] }
 0x12b   : > { %v709_v1 = vadd.f32 %v645_v59, %v542_v63  ;;  %v544_v3 = vpop.f32.mrb[13].mxu1  ;;  %v678_v4 = vadd.f32 %v614_v60, %v448_v2  ;;  %v625_v2 = vld [vmem:[%s1027_s8 + $0xc0] sm:$0xff] }
 0x12c   : > { %v710_v5 = vadd.f32 %v646_v61, %v544_v3  ;;  %741 = vst [vmem:[%s1027_s8 + $0x60] sm:$0xff] %v677_v0  ;;  %v657_v3 = vld [vmem:[%s1027_s8 + $0x1c0] sm:$0xff] }
 0x12d   : > { %773 = vst [vmem:[%s1027_s8 + $0x160] sm:$0xff] %v709_v1  ;;  %742 = vst [vmem:[%s1027_s8 + $0x68] sm:$0xff] %v678_v4  ;;  %v452_v10 = vpop.f32.mrb[14].mxu0  ;;  %v626_v4 = vld [vmem:[%s1027_s8 + $0xc8] sm:$0xff] }
 0x12e   : > { %774 = vst [vmem:[%s1027_s8 + $0x168] sm:$0xff] %v710_v5  ;;  %v548_v11 = vpop.f32.mrb[14].mxu1  ;;  %v679_v12 = vadd.f32 %v615_v6, %v452_v10  ;;  %v454_v14 = vpop.f32.mrb[15].mxu0  ;;  %v658_v5 = vld [vmem:[%s1027_s8 + $0x1c8] sm:$0xff] }
 0x12f   : > { %v711_v13 = vadd.f32 %v647_v7, %v548_v11  ;;  %v550_v15 = vpop.f32.mrb[15].mxu1  ;;  %v680_v16 = vadd.f32 %v616_v8, %v454_v14  ;;  %v627_v14 = vld [vmem:[%s1027_s8 + $0xd0] sm:$0xff] }
 0x130   : > { %v712_v17 = vadd.f32 %v648_v9, %v550_v15  ;;  %743 = vst [vmem:[%s1027_s8 + $0x70] sm:$0xff] %v679_v12  ;;  %v659_v15 = vld [vmem:[%s1027_s8 + $0x1d0] sm:$0xff] }
 0x131   : > { %775 = vst [vmem:[%s1027_s8 + $0x170] sm:$0xff] %v711_v13  ;;  %744 = vst [vmem:[%s1027_s8 + $0x78] sm:$0xff] %v680_v16  ;;  %v458_v22 = vpop.f32.mrb[16].mxu0  ;;  %v628_v16 = vld [vmem:[%s1027_s8 + $0xd8] sm:$0xff] }
 0x132   : > { %776 = vst [vmem:[%s1027_s8 + $0x178] sm:$0xff] %v712_v17  ;;  %v554_v23 = vpop.f32.mrb[16].mxu1  ;;  %v681_v24 = vadd.f32 %v617_v18, %v458_v22  ;;  %v460_v26 = vpop.f32.mrb[17].mxu0  ;;  %v660_v17 = vld [vmem:[%s1027_s8 + $0x1d8] sm:$0xff] }
 0x133   : > { %v713_v25 = vadd.f32 %v649_v19, %v554_v23  ;;  %v556_v27 = vpop.f32.mrb[17].mxu1  ;;  %v682_v28 = vadd.f32 %v618_v20, %v460_v26  ;;  %v629_v26 = vld [vmem:[%s1027_s8 + $0xe0] sm:$0xff] }
 0x134   : > { %v714_v29 = vadd.f32 %v650_v21, %v556_v27  ;;  %745 = vst [vmem:[%s1027_s8 + $0x80] sm:$0xff] %v681_v24  ;;  %v661_v27 = vld [vmem:[%s1027_s8 + $0x1e0] sm:$0xff] }
 0x135   : > { %777 = vst [vmem:[%s1027_s8 + $0x180] sm:$0xff] %v713_v25  ;;  %746 = vst [vmem:[%s1027_s8 + $0x88] sm:$0xff] %v682_v28  ;;  %v464_v34 = vpop.f32.mrb[18].mxu0  ;;  %v630_v28 = vld [vmem:[%s1027_s8 + $0xe8] sm:$0xff] }
 0x136   : > { %778 = vst [vmem:[%s1027_s8 + $0x188] sm:$0xff] %v714_v29  ;;  %v560_v35 = vpop.f32.mrb[18].mxu1  ;;  %v683_v36 = vadd.f32 %v619_v30, %v464_v34  ;;  %v466_v38 = vpop.f32.mrb[19].mxu0  ;;  %v662_v29 = vld [vmem:[%s1027_s8 + $0x1e8] sm:$0xff] }
 0x137   : > { %v715_v37 = vadd.f32 %v651_v31, %v560_v35  ;;  %v562_v39 = vpop.f32.mrb[19].mxu1  ;;  %v684_v40 = vadd.f32 %v620_v32, %v466_v38  ;;  %v631_v38 = vld [vmem:[%s1027_s8 + $0xf0] sm:$0xff] }
 0x138   : > { %v716_v41 = vadd.f32 %v652_v33, %v562_v39  ;;  %747 = vst [vmem:[%s1027_s8 + $0x90] sm:$0xff] %v683_v36  ;;  %v663_v39 = vld [vmem:[%s1027_s8 + $0x1f0] sm:$0xff] }
 0x139   : > { %779 = vst [vmem:[%s1027_s8 + $0x190] sm:$0xff] %v715_v37  ;;  %748 = vst [vmem:[%s1027_s8 + $0x98] sm:$0xff] %v684_v40  ;;  %v470_v46 = vpop.f32.mrb[20].mxu0  ;;  %v632_v40 = vld [vmem:[%s1027_s8 + $0xf8] sm:$0xff] }
 0x13a   : > { %780 = vst [vmem:[%s1027_s8 + $0x198] sm:$0xff] %v716_v41  ;;  %v566_v47 = vpop.f32.mrb[20].mxu1  ;;  %v685_v48 = vadd.f32 %v621_v42, %v470_v46  ;;  %v472_v50 = vpop.f32.mrb[21].mxu0  ;;  %v664_v41 = vld [vmem:[%s1027_s8 + $0x1f8] sm:$0xff] }
 0x13b   : > { %v717_v49 = vadd.f32 %v653_v43, %v566_v47  ;;  %v568_v51 = vpop.f32.mrb[21].mxu1  ;;  %v686_v52 = vadd.f32 %v622_v44, %v472_v50 }
 0x13c   : > { %v718_v53 = vadd.f32 %v654_v45, %v568_v51  ;;  %749 = vst [vmem:[%s1027_s8 + $0xa0] sm:$0xff] %v685_v48 }
 0x13d   : > { %781 = vst [vmem:[%s1027_s8 + $0x1a0] sm:$0xff] %v717_v49  ;;  %750 = vst [vmem:[%s1027_s8 + $0xa8] sm:$0xff] %v686_v52  ;;  %v476_v58 = vpop.f32.mrb[22].mxu0 }
 0x13e   : > { %782 = vst [vmem:[%s1027_s8 + $0x1a8] sm:$0xff] %v718_v53  ;;  %v572_v59 = vpop.f32.mrb[22].mxu1  ;;  %v687_v60 = vadd.f32 %v623_v54, %v476_v58  ;;  %v478_v62 = vpop.f32.mrb[23].mxu0 }
 0x13f   : > { %v719_v61 = vadd.f32 %v655_v55, %v572_v59  ;;  %v574_v63 = vpop.f32.mrb[23].mxu1  ;;  %v688_v0 = vadd.f32 %v624_v56, %v478_v62 }
 0x140   : > { %v720_v1 = vadd.f32 %v656_v57, %v574_v63  ;;  %751 = vst [vmem:[%s1027_s8 + $0xb0] sm:$0xff] %v687_v60 }
 0x141   : > { %783 = vst [vmem:[%s1027_s8 + $0x1b0] sm:$0xff] %v719_v61  ;;  %752 = vst [vmem:[%s1027_s8 + $0xb8] sm:$0xff] %v688_v0  ;;  %v482_v6 = vpop.f32.mrb[24].mxu0 }
 0x142   : > { %784 = vst [vmem:[%s1027_s8 + $0x1b8] sm:$0xff] %v720_v1  ;;  %v578_v7 = vpop.f32.mrb[24].mxu1  ;;  %v689_v8 = vadd.f32 %v625_v2, %v482_v6  ;;  %v484_v10 = vpop.f32.mrb[25].mxu0 }
 0x143   : > { %v721_v9 = vadd.f32 %v657_v3, %v578_v7  ;;  %v580_v11 = vpop.f32.mrb[25].mxu1  ;;  %v690_v12 = vadd.f32 %v626_v4, %v484_v10 }
 0x144   : > { %v722_v13 = vadd.f32 %v658_v5, %v580_v11  ;;  %753 = vst [vmem:[%s1027_s8 + $0xc0] sm:$0xff] %v689_v8 }
 0x145   : > { %785 = vst [vmem:[%s1027_s8 + $0x1c0] sm:$0xff] %v721_v9  ;;  %754 = vst [vmem:[%s1027_s8 + $0xc8] sm:$0xff] %v690_v12  ;;  %v488_v18 = vpop.f32.mrb[26].mxu0 }
 0x146   : > { %786 = vst [vmem:[%s1027_s8 + $0x1c8] sm:$0xff] %v722_v13  ;;  %v584_v19 = vpop.f32.mrb[26].mxu1  ;;  %v691_v20 = vadd.f32 %v627_v14, %v488_v18  ;;  %v490_v22 = vpop.f32.mrb[27].mxu0 }
 0x147   : > { %v723_v21 = vadd.f32 %v659_v15, %v584_v19  ;;  %v586_v23 = vpop.f32.mrb[27].mxu1  ;;  %v692_v24 = vadd.f32 %v628_v16, %v490_v22 }
 0x148   : > { %v724_v25 = vadd.f32 %v660_v17, %v586_v23  ;;  %755 = vst [vmem:[%s1027_s8 + $0xd0] sm:$0xff] %v691_v20 }
 0x149   : > { %787 = vst [vmem:[%s1027_s8 + $0x1d0] sm:$0xff] %v723_v21  ;;  %756 = vst [vmem:[%s1027_s8 + $0xd8] sm:$0xff] %v692_v24  ;;  %v494_v30 = vpop.f32.mrb[28].mxu0 }
 0x14a   : > { %788 = vst [vmem:[%s1027_s8 + $0x1d8] sm:$0xff] %v724_v25  ;;  %v590_v31 = vpop.f32.mrb[28].mxu1  ;;  %v693_v32 = vadd.f32 %v629_v26, %v494_v30  ;;  %v496_v34 = vpop.f32.mrb[29].mxu0 }
 0x14b   : > { %v725_v33 = vadd.f32 %v661_v27, %v590_v31  ;;  %v592_v35 = vpop.f32.mrb[29].mxu1  ;;  %v694_v36 = vadd.f32 %v630_v28, %v496_v34 }
 0x14c   : > { %v726_v37 = vadd.f32 %v662_v29, %v592_v35  ;;  %757 = vst [vmem:[%s1027_s8 + $0xe0] sm:$0xff] %v693_v32 }
 0x14d   : > { %789 = vst [vmem:[%s1027_s8 + $0x1e0] sm:$0xff] %v725_v33  ;;  %758 = vst [vmem:[%s1027_s8 + $0xe8] sm:$0xff] %v694_v36  ;;  %v500_v42 = vpop.f32.mrb[30].mxu0 }
 0x14e   : > { %790 = vst [vmem:[%s1027_s8 + $0x1e8] sm:$0xff] %v726_v37  ;;  %v596_v43 = vpop.f32.mrb[30].mxu1  ;;  %v695_v44 = vadd.f32 %v631_v38, %v500_v42  ;;  %v502_v46 = vpop.f32.mrb[31].mxu0 }
 0x14f   : > { %v727_v45 = vadd.f32 %v663_v39, %v596_v43  ;;  %v598_v47 = vpop.f32.mrb[31].mxu1  ;;  %v696_v48 = vadd.f32 %v632_v40, %v502_v46 }
 0x150   : > { %v728_v49 = vadd.f32 %v664_v41, %v598_v47  ;;  %759 = vst [vmem:[%s1027_s8 + $0xf0] sm:$0xff] %v695_v44 }
 0x151   : > { %791 = vst [vmem:[%s1027_s8 + $0x1f0] sm:$0xff] %v727_v45  ;;  %760 = vst [vmem:[%s1027_s8 + $0xf8] sm:$0xff] %v696_v48 }
 0x152   : > { %792 = vst [vmem:[%s1027_s8 + $0x1f8] sm:$0xff] %v728_v49 }
 0x153 PF: > { %s25_s1 = sadd.s32 1, %s969_s1  }
 0x154   : > { %p22_p1 = scmp.ge.s32.totalorder %s25_s1, 6  }
 0x156   :  { %24 = sbr.rel (!%p22_p1) target bundleno = 26 (0x1a), region = 82 }

// kernel: _lambda_.2
= control target key start
LH: loop header
LB: loop body
LE: loop exit
PB: predicated region body
PF: predicated region fallthrough
CT: control target
= control target key end

     0   :  { %vm61_vm0 = vcmask 261120   ;;  %s2016_s19 = smov 96   ;;  %s2018_s28 = smov 32   ;;  %vm1501_vm1 = vcmask 523264   ;;  %vm1510_vm2 = vcmask 785408   ;;  %s3277_s2 = inlined_call_operand.vmem [shape: f32[64,256], index: 2, kind: input, shape index: {}]   ;;  %s3278_s4 = inlined_call_operand.vmem [shape: f32[32,32], index: 4, kind: input, shape index: {}]   ;;  %s3279_s1 = inlined_call_operand.vmem [shape: f32[64,32], index: 1, kind: input, shape index: {}]   ;;  %s3280_s3 = inlined_call_operand.vmem [shape: f32[32,32], index: 3, kind: input, shape index: {}]   ;;  %s3281_s0 = inlined_call_operand.vmem [shape: f32[64,32], index: 0, kind: input, shape index: {}]   ;;  %s3282_s6 = inlined_call_operand.vmem [shape: f32[32,32], index: 6, kind: input, shape index: {}]   ;;  %s3283_s8 = inlined_call_operand.vmem [shape: f32[256,256], index: 8, kind: input, shape index: {}]   ;;  %s3284_s5 = inlined_call_operand.vmem [shape: f32[1,32], index: 5, kind: input, shape index: {}]   ;;  %s3285_s9 = inlined_call_operand.vmem [shape: f32[256,256], index: 9, kind: input, shape index: {}]   ;;  %s3286_s7 = inlined_call_operand.vmem [shape: f32[1,32], index: 7, kind: input, shape index: {}]   ;;  %s3287_s10 = inlined_call_operand.vmem [shape: f32[64,32], index: 10, kind: output, shape index: {0}]   ;;  %s3288_s11 = inlined_call_operand.vmem [shape: f32[64,256], index: 11, kind: output, shape index: {1}]  }
   0x1   :  { %v2082_v0 = vld [vmem:[%s3277_s2 + $0x20] sm:$0xff]  ;;  %v58_v5 = vld [vmem:[%s3278_s4 + $0x8] sm:$0xff]  ;;  %v2102_v6 = vld [vmem:[%s3277_s2 + $0x30] sm:$0xff] }
   0x2   :  { %v2087_v1 = vld [vmem:[%s3277_s2] sm:$0xff]  ;;  %v1083_v3 = vsel %vm61_vm0, %v2082_v0, 0.0  ;;  %v2107_v7 = vld [vmem:[%s3277_s2 + $0x10] sm:$0xff]  ;;  %v60_v10 = vld [vmem:[%s3278_s4 + $0x18] sm:$0xff]  ;;  %v1086_v11 = vsel %vm61_vm0, %v2102_v6, 0.0 }
   0x3   :  { %v57_v2 = vld [vmem:[%s3278_s4] sm:$0xff]  ;;  %v1077_v4 = vsel %vm61_vm0, %v2087_v1, 0.0  ;;  %1084 = vadd.xlane.f32.xlu1 %v1083_v3  ;;  %v59_v9 = vld [vmem:[%s3278_s4 + $0x10] sm:$0xff]  ;;  %v1080_v12 = vsel %vm61_vm0, %v2107_v7, 0.0  ;;  %v46_v18 = vld [vmem:[%s3280_s3 + $0x8] sm:$0xff] }
   0x4   :  { %1078 = vadd.xlane.f32.xlu0 %v1077_v4  ;;  %v1721_v8 = vpack.c.bf16 %v58_v5, %v57_v2  ;;  %v1725_v13 = vpack.c.bf16 %v60_v10, %v59_v9  ;;  %v2122_v14 = vld [vmem:[%s3277_s2 + $0x50] sm:$0xff]  ;;  %v49_v15 = vld [vmem:[%s3279_s1] sm:$0xff]  ;;  %v48_v25 = vld [vmem:[%s3280_s3 + $0x18] sm:$0xff] }
   0x5   :  { %v2130_v16 = vld [vmem:[%s3277_s2 + $0x40] sm:$0xff]  ;;  %1669 = vmatprep.mubr.msk.f32.mxu0 %vm61_vm0, %v49_v15  ;;  %v1092_v19 = vsel %vm61_vm0, %v2122_v14, 0.0  ;;  %v2146_v22 = vld [vmem:[%s3277_s2 + $0x70] sm:$0xff]  ;;  %v50_v27 = vld [vmem:[%s3279_s1 + $0x8] sm:$0xff] }
   0x6   :  { %1722 = vmatprep.subr.bf16.mxu0 %v1721_v8  ;;  %v45_v17 = vld [vmem:[%s3280_s3] sm:$0xff]  ;;  %1873 = vmatprep.subr.bf16.mxu1 %v1721_v8  ;;  %v1089_v20 = vsel %vm61_vm0, %v2130_v16, 0.0  ;;  %v47_v24 = vld [vmem:[%s3280_s3 + $0x10] sm:$0xff]  ;;  %v1098_v29 = vsel %vm61_vm0, %v2146_v22, 0.0  ;;  %v54_v32 = vld [vmem:[%s3279_s1 + $0x28] sm:$0xff] }
   0x7   :  { %1724 = vmatpush3.bf16.msra.mxu0 %v1721_v8  ;;  %1087 = vadd.xlane.f32.xlu1 %v1086_v11  ;;  %v1729_v21 = vpack.c.bf16 %v46_v18, %v45_v17  ;;  %v2151_v23 = vld [vmem:[%s3277_s2 + $0x60] sm:$0xff]  ;;  %v51_v28 = vld [vmem:[%s3279_s1 + $0x10] sm:$0xff]  ;;  %v1733_v31 = vpack.c.bf16 %v48_v25, %v47_v24  ;;  %v52_v33 = vld [vmem:[%s3279_s1 + $0x18] sm:$0xff] }
   0x8   :  { %1081 = vadd.xlane.f32.xlu0 %v1080_v12  ;;  %1726 = vmatprep.subr.bf16.mxu0 %v1725_v13  ;;  %v53_v26 = vld [vmem:[%s3279_s1 + $0x20] sm:$0xff]  ;;  %v1095_v30 = vsel %vm61_vm0, %v2151_v23, 0.0  ;;  %v55_v34 = vld [vmem:[%s3279_s1 + $0x30] sm:$0xff]  ;;  %v56_v36 = vld [vmem:[%s3279_s1 + $0x38] sm:$0xff] }
   0x9   :  { %1875 = vmatpush3.bf16.msra.mxu1 %v1721_v8  ;;  %1675 = vmatprep.mubr.msk.f32.mxu1 %vm61_vm0, %v53_v26  ;;  %v37_v35 = vld [vmem:[%s3281_s0] sm:$0xff]  ;;  %v38_v37 = vld [vmem:[%s3281_s0 + $0x8] sm:$0xff]  ;;  %v39_v38 = vld [vmem:[%s3281_s0 + $0x10] sm:$0xff] }
   0xa   :  { %1874 = vmatprep.subr.bf16.mxu1 %v1725_v13  ;;  %v40_v39 = vld [vmem:[%s3281_s0 + $0x18] sm:$0xff]  ;;  %v41_v40 = vld [vmem:[%s3281_s0 + $0x20] sm:$0xff]  ;;  %v42_v41 = vld [vmem:[%s3281_s0 + $0x28] sm:$0xff] }
   0xb   :  { %1728 = vmatpush3.bf16.msra.mxu0 %v1725_v13  ;;  %1093 = vadd.xlane.f32.xlu1 %v1092_v19  ;;  %v43_v42 = vld [vmem:[%s3281_s0 + $0x30] sm:$0xff]  ;;  %v44_v43 = vld [vmem:[%s3281_s0 + $0x38] sm:$0xff]  ;;  %s2017_s0 = smov 64   ;;  %v391_v44 = vld [vmem:[%s3282_s6] sm:$0xff] }
   0xc   :  { %1090 = vadd.xlane.f32.xlu0 %v1089_v20  ;;  %1730 = vmatprep.subr.bf16.mxu0 %v1729_v21  ;;  %v392_v45 = vld [vmem:[%s3282_s6 + $0x8] sm:$0xff]  ;;  %v393_v47 = vld [vmem:[%s3282_s6 + $0x10] sm:$0xff]  ;;  %v394_v48 = vld [vmem:[%s3282_s6 + $0x18] sm:$0xff] }
   0xd   :  { %1876 = vmatpush3.bf16.msra.mxu1 %v1725_v13  ;;  %v1737_v46 = vpack.c.bf16 %v392_v45, %v391_v44  ;;  %v1741_v49 = vpack.c.bf16 %v394_v48, %v393_v47  ;;  %v612_v50 = vld [vmem:[%s3283_s8 + $0x8] sm:$0xff]  ;;  %v614_v51 = vld [vmem:[%s3283_s8 + $0x18] sm:$0xff] }
   0xe   :  { %1670 = vmatmul.mubr.msk.f32.vlgmr.msra.gmra.mrb[0].mxu0 %vm61_vm0, %v50_v27  ;;  %v1745_v52 = vpack.c.bf16 %v614_v51, %v612_v50 }
   0xf   :  { %1732 = vmatpush3.bf16.msra.mxu0 %v1729_v21  ;;  %1672 = vmatprep.mubr.msk.f32.mxu0 %vm61_vm0, %v51_v28 }
  0x10   :  { %1099 = vadd.xlane.f32.xlu1 %v1098_v29  ;;  %1096 = vadd.xlane.f32.xlu0 %v1095_v30  ;;  %v1583_v30 = vld [vmem:[%s3284_s5] ss:$0 sm:$0xff] }
  0x11   :  { %1734 = vmatprep.subr.bf16.mxu0 %v1733_v31  ;;  %1676 = vmatmul.mubr.msk.f32.vlgmr.msra.gmra.mrb[0].mxu1 %vm61_vm0, %v54_v32 }
  0x12   :  { %1673 = vmatmul.mubr.msk.f32.gmra.mrb[2].mxu0 %vm61_vm0, %v52_v33  ;;  %1678 = vmatprep.mubr.msk.f32.mxu1 %vm61_vm0, %v55_v34 }
  0x13   :  { %1736 = vmatpush3.bf16.msra.mxu0 %v1733_v31  ;;  %1689 = vmatprep.mubr.msk.f32.mxu0 %vm61_vm0, %v37_v35 }
  0x14   :  { %1738 = vmatprep.subr.bf16.mxu1 %v1737_v46 }
  0x15   :  { %1679 = vmatmul.mubr.msk.f32.gmra.mrb[2].mxu1 %vm61_vm0, %v56_v36 }
  0x16   :  { %1690 = vmatmul.mubr.msk.f32.vlgmr.msra.gmra.mrb[0].mxu0 %vm61_vm0, %v38_v37  ;;  %1740 = vmatpush3.bf16.msra.mxu1 %v1737_v46 }
  0x17   :  { %1692 = vmatprep.mubr.msk.f32.mxu0 %vm61_vm0, %v39_v38  ;;  %1742 = vmatprep.subr.bf16.mxu1 %v1741_v49 }
  0x1a   :  { %1693 = vmatmul.mubr.msk.f32.gmra.mrb[2].mxu0 %vm61_vm0, %v40_v39  ;;  %1744 = vmatpush3.bf16.msra.mxu1 %v1741_v49 }
  0x1b   :  { %1695 = vmatprep.mubr.msk.f32.mxu0 %vm61_vm0, %v41_v40  ;;  %1746 = vmatprep.subr.bf16.mxu1 %v1745_v52 }
  0x1e   :  { %1696 = vmatmul.mubr.msk.f32.gmra.mrb[4].mxu0 %vm61_vm0, %v42_v41 }
  0x1f   :  { %1698 = vmatprep.mubr.msk.f32.mxu0 %vm61_vm0, %v43_v42 }
  0x21   :  { %1119 = vrot.lane.b32.xlu1 %v2107_v7, %s2016_s19 }
  0x22   :  { %1699 = vmatmul.mubr.msk.f32.gmra.mrb[6].mxu0 %vm61_vm0, %v44_v43 }
  0x25   :  { %1121 = vrot.lane.b32.xlu1 %v2082_v0, %s2016_s19 }
  0x26   :  { %1117 = vrot.lane.b32.xlu0 %v2087_v1, %s2016_s19 }
  0x29   :  { %1123 = vrot.lane.b32.xlu1 %v2102_v6, %s2016_s19 }
  0x2a   :  { %1125 = vrot.lane.b32.xlu0 %v2130_v16, %s2016_s19 }
  0x2d   :  { %1127 = vrot.lane.b32.xlu1 %v2122_v14, %s2016_s19 }
  0x2e   :  { %1129 = vrot.lane.b32.xlu0 %v2151_v23, %s2016_s19 }
  0x31   :  { %1131 = vrot.lane.b32.xlu1 %v2146_v22, %s2016_s19 }
  0x32   :  { %1173 = vrot.lane.b32.xlu0 %v2087_v1, %s2017_s0 }
  0x35   :  { %1175 = vrot.lane.b32.xlu1 %v2107_v7, %s2017_s0 }
  0x36   :  { %1181 = vrot.lane.b32.xlu0 %v2130_v16, %s2017_s0 }
  0x39   :  { %1177 = vrot.lane.b32.xlu1 %v2082_v0, %s2017_s0 }
  0x3d   :  { %1179 = vrot.lane.b32.xlu1 %v2102_v6, %s2017_s0 }
  0x41   :  { %1183 = vrot.lane.b32.xlu1 %v2122_v14, %s2017_s0 }
  0x90   :  { %v2269_v53 = vpop.xlane.xlu1 %1084 }
  0x91   :  { %v2271_v54 = vpop.xlane.xlu0 %1078 }
  0x94   :  { %v2273_v55 = vpop.xlane.xlu1 %1087 }
  0x95   :  { %v2275_v56 = vpop.xlane.xlu0 %1081 }
  0x98   :  { %v2277_v57 = vpop.xlane.xlu1 %1093 }
  0x99   :  { %v2279_v58 = vpop.xlane.xlu0 %1090 }
  0x9d   :  { %v2281_v59 = vpop.xlane.xlu1 %1099  ;;  %v2283_v60 = vpop.xlane.xlu0 %1096 }
  0xa1   :  { %v1120_v61 = vpop.permute.xlu1 %1119  ;;  %v1118_v62 = vpop.permute.xlu0 %1117 }
  0xa2   :  { %v1144_v63 = vsel %vm61_vm0, %v1120_v61, 0.0  ;;  %v1141_v2 = vsel %vm61_vm0, %v1118_v62, 0.0 }
  0xa3   :  { %1145 = vadd.xlane.f32.xlu1 %v1144_v63  ;;  %1142 = vadd.xlane.f32.xlu0 %v1141_v2 }
  0xa5   :  { %v1122_v3 = vpop.permute.xlu1 %1121  ;;  %v1126_v5 = vpop.permute.xlu0 %1125 }
  0xa6   :  { %v1147_v4 = vsel %vm61_vm0, %v1122_v3, 0.0  ;;  %v1153_v10 = vsel %vm61_vm0, %v1126_v5, 0.0 }
  0xa7   :  { %1148 = vadd.xlane.f32.xlu0 %v1147_v4 }
  0xa9   :  { %v1124_v8 = vpop.permute.xlu1 %1123  ;;  %v1130_v12 = vpop.permute.xlu0 %1129 }
  0xaa   :  { %v1150_v9 = vsel %vm61_vm0, %v1124_v8, 0.0  ;;  %v1159_v15 = vsel %vm61_vm0, %v1130_v12, 0.0 }
  0xab   :  { %1151 = vadd.xlane.f32.xlu0 %v1150_v9 }
  0xad   :  { %v1128_v11 = vpop.permute.xlu1 %1127  ;;  %v1174_v21 = vpop.permute.xlu0 %1173 }
  0xae   :  { %v1156_v13 = vsel %vm61_vm0, %v1128_v11, 0.0  ;;  %v1197_v26 = vsel %vm61_vm0, %v1174_v21, 0.0 }
  0xaf   :  { %1157 = vadd.xlane.f32.xlu1 %v1156_v13  ;;  %1154 = vadd.xlane.f32.xlu0 %v1153_v10 }
  0xb1   :  { %v1132_v17 = vpop.permute.xlu1 %1131  ;;  %v1182_v43 = vpop.permute.xlu0 %1181 }
  0xb2   :  { %v1162_v18 = vsel %vm61_vm0, %v1132_v17, 0.0  ;;  %v1209_v48 = vsel %vm61_vm0, %v1182_v43, 0.0 }
  0xb3   :  { %1163 = vadd.xlane.f32.xlu1 %v1162_v18  ;;  %1160 = vadd.xlane.f32.xlu0 %v1159_v15 }
  0xb5   :  { %v1176_v19 = vpop.permute.xlu1 %1175 }
  0xb6   :  { %v1200_v27 = vsel %vm61_vm0, %v1176_v19, 0.0 }
  0xb9   :  { %v1178_v20 = vpop.permute.xlu1 %1177 }
  0xba   :  { %v1203_v33 = vsel %vm61_vm0, %v1178_v20, 0.0 }
  0xbd   :  { %v1180_v24 = vpop.permute.xlu1 %1179 }
  0xbe   :  { %v1206_v41 = vsel %vm61_vm0, %v1180_v24, 0.0 }
  0xc1   :  { %v1184_v29 = vpop.permute.xlu1 %1183 }
  0xc2   :  { %v1212_v34 = vsel %vm61_vm0, %v1184_v29, 0.0  ;;  %v611_v29 = vld [vmem:[%s3283_s8] sm:$0xff] }
  0xc4   :  { %1187 = vrot.lane.b32.xlu1 %v2146_v22, %s2017_s0 }
  0xc9   :  { %1185 = vrot.lane.b32.xlu0 %v2151_v23, %s2017_s0 }
  0xe4   :  { %v1677_v25 = vpop.f32.mrb[0].mxu1 }
  0xe5   :  { %v172_v28 = vpop.f32.mrb[1].mxu1 }
  0xe8   :  { %1198 = vadd.xlane.f32.xlu0 %v1197_v26  ;;  %1201 = vadd.xlane.f32.xlu1 %v1200_v27  ;;  %v1680_v31 = vpop.f32.mrb[2].mxu1 }
  0xe9   :  { %v1691_v32 = vpop.f32.mrb[0].mxu0  ;;  %v182_v35 = vpop.f32.mrb[3].mxu1 }
  0xea   :  { %v2304_v36 = vadd.f32 %v1691_v32, %v1583_v30  ;;  %v281_v37 = vpop.f32.mrb[1].mxu0 }
  0xeb   :  { %v2306_v38 = vadd.f32 %v1583_v30, %v281_v37 }
  0xec   :  { %v1585_v39 = vmul.f32 -1.442695, %v2304_v36  ;;  %1204 = vadd.xlane.f32.xlu0 %v1203_v33  ;;  %1213 = vadd.xlane.f32.xlu1 %v1212_v34  ;;  %v616_v33 = vld [vmem:[%s3283_s8 + $0x28] sm:$0xff]  ;;  %v618_v34 = vld [vmem:[%s3283_s8 + $0x38] sm:$0xff] }
  0xed   :  { %v1584_v40 = vmul.f32 -1.442695, %v2306_v38  ;;  %v1694_v42 = vpop.f32.mrb[2].mxu0  ;;  %v1749_v43 = vpack.c.bf16 %v618_v34, %v616_v33  ;;  %v2407_v33 = vld [vmem:[%s3277_s2 + $0x8] sm:$0xff] }
  0xee   :  { %1888 = vpow2.f32 %v1585_v39  ;;  %v2311_v44 = vadd.f32 %v1694_v42, %v1583_v30  ;;  %v291_v45 = vpop.f32.mrb[3].mxu0 }
  0xef   :  { %1890 = vpow2.f32 %v1584_v40  ;;  %v2313_v46 = vadd.f32 %v1583_v30, %v291_v45  ;;  %v615_v45 = vld [vmem:[%s3283_s8 + $0x20] sm:$0xff] }
  0xf0   :  { %1207 = vadd.xlane.f32.xlu0 %v1206_v41  ;;  %v1587_v47 = vmul.f32 -1.442695, %v2311_v44 }
  0xf1   :  { %v1586_v49 = vmul.f32 -1.442695, %v2313_v46  ;;  %v1697_v50 = vpop.f32.mrb[4].mxu0 }
  0xf2   :  { %1892 = vpow2.f32 %v1587_v47  ;;  %v307_v51 = vadd.f32 %v1697_v50, %v1677_v25  ;;  %v301_v52 = vpop.f32.mrb[5].mxu0  ;;  %v617_v47 = vld [vmem:[%s3283_s8 + $0x30] sm:$0xff] }
  0xf3   :  { %1894 = vpow2.f32 %v1586_v49  ;;  %v302_v61 = vadd.f32 %v301_v52, %v172_v28 }
  0xf4   :  { %1210 = vadd.xlane.f32.xlu0 %v1209_v48  ;;  %v2318_v62 = vadd.f32 %v1583_v30, %v307_v51 }
  0xf5   :  { %v2320_v63 = vadd.f32 %v1583_v30, %v302_v61  ;;  %v1700_v2 = vpop.f32.mrb[6].mxu0  ;;  %v1751_v61 = vpack.c.bf16 %v617_v47, %v615_v45  ;;  %v642_v45 = vld [vmem:[%s3283_s8 + $0xf8] sm:$0xff] }
  0xf6   :  { %v1589_v3 = vmul.f32 -1.442695, %v2318_v62  ;;  %v317_v4 = vadd.f32 %v1700_v2, %v1680_v31  ;;  %v311_v5 = vpop.f32.mrb[7].mxu0 }
  0xf7   :  { %v1588_v8 = vmul.f32 -1.442695, %v2320_v63  ;;  %v312_v9 = vadd.f32 %v311_v5, %v182_v35  ;;  %v621_v5 = vld [vmem:[%s3283_s8 + $0x50] sm:$0xff] }
  0xf8   :  { %v1889_v10 = vpop.eup %1888  ;;  %1896 = vpow2.f32 %v1589_v3  ;;  %v2324_v11 = vadd.f32 %v1583_v30, %v317_v4  ;;  %v619_v4 = vld [vmem:[%s3283_s8 + $0x40] sm:$0xff] }
  0xf9   :  { %v1891_v12 = vpop.eup %1890  ;;  %v360_v13 = vadd.f32 1.0, %v1889_v10  ;;  %1898 = vpow2.f32 %v1588_v8  ;;  %v2326_v15 = vadd.f32 %v1583_v30, %v312_v9  ;;  %v613_v30 = vld [vmem:[%s3283_s8 + $0x10] sm:$0xff]  ;;  %v626_v8 = vld [vmem:[%s3283_s8 + $0x78] sm:$0xff]  ;;  %v1755_v9 = vpack.c.bf16 %v621_v5, %v619_v4 }
  0xfa   :  { %v359_v17 = vadd.f32 1.0, %v1891_v12  ;;  %v1591_v18 = vmul.f32 -1.442695, %v2324_v11  ;;  %v1747_v41 = vpack.c.bf16 %v613_v30, %v611_v29  ;;  %v634_v29 = vld [vmem:[%s3283_s8 + $0xb8] sm:$0xff] }
  0xfb   :  { %1900 = vrcp.f32 %v360_v13  ;;  %v1590_v19 = vmul.f32 -1.442695, %v2326_v15  ;;  %v623_v13 = vld [vmem:[%s3283_s8 + $0x60] sm:$0xff]  ;;  %v650_v4 = vld [vmem:[%s3283_s8 + $0x138] sm:$0xff] }
  0xfc   :  { %v1893_v20 = vpop.eup %1892  ;;  %1902 = vrcp.f32 %v359_v17  ;;  %v625_v17 = vld [vmem:[%s3283_s8 + $0x70] sm:$0xff] }
  0xfd   :  { %v1895_v21 = vpop.eup %1894  ;;  %v362_v24 = vadd.f32 1.0, %v1893_v20  ;;  %1904 = vpow2.f32 %v1591_v18  ;;  %v630_v20 = vld [vmem:[%s3283_s8 + $0x98] sm:$0xff] }
  0xfe   :  { %v361_v25 = vadd.f32 1.0, %v1895_v21  ;;  %1906 = vpow2.f32 %v1590_v19  ;;  %v628_v19 = vld [vmem:[%s3283_s8 + $0x88] sm:$0xff] }
  0xff   :  { %1908 = vrcp.f32 %v362_v24  ;;  %v1759_v24 = vpack.c.bf16 %v625_v17, %v623_v13  ;;  %v651_v17 = vld [vmem:[%s3283_s8 + $0x140] sm:$0xff] }
 0x100   :  { %1910 = vrcp.f32 %v361_v25 }
 0x102   :  { %v1897_v26 = vpop.eup %1896 }
 0x103   :  { %v1899_v27 = vpop.eup %1898  ;;  %v364_v28 = vadd.f32 1.0, %v1897_v26  ;;  %v1761_v26 = vpack.c.bf16 %v630_v20, %v628_v19  ;;  %v656_v19 = vld [vmem:[%s3283_s8 + $0x168] sm:$0xff]  ;;  %v658_v20 = vld [vmem:[%s3283_s8 + $0x178] sm:$0xff] }
 0x104   :  { %v363_v31 = vadd.f32 1.0, %v1899_v27  ;;  %v629_v27 = vld [vmem:[%s3283_s8 + $0x90] sm:$0xff] }
 0x105   :  { %v1901_v32 = vpop.eup %1900  ;;  %1912 = vrcp.f32 %v364_v28 }
 0x106   :  { %v1903_v35 = vpop.eup %1902  ;;  %v384_v37 = vmul.f32 %v1901_v32, %v2304_v36  ;;  %1914 = vrcp.f32 %v363_v31  ;;  %v620_v36 = vld [vmem:[%s3283_s8 + $0x48] sm:$0xff] }
 0x107   :  { %v1905_v39 = vpop.eup %1904  ;;  %v383_v40 = vmul.f32 %v1903_v35, %v2306_v38  ;;  %v622_v38 = vld [vmem:[%s3283_s8 + $0x58] sm:$0xff]  ;;  %v631_v35 = vld [vmem:[%s3283_s8 + $0xa0] sm:$0xff] }
 0x108   :  { %v1907_v42 = vpop.eup %1906  ;;  %v366_v48 = vadd.f32 1.0, %v1905_v39  ;;  %v1753_v3 = vpack.c.bf16 %v622_v38, %v620_v36  ;;  %v641_v36 = vld [vmem:[%s3283_s8 + $0xf0] sm:$0xff]  ;;  %v644_v38 = vld [vmem:[%s3283_s8 + $0x108] sm:$0xff] }
 0x109   :  { %v1909_v49 = vpop.eup %1908  ;;  %1709 = vmatprep.mubr.msk.f32.mxu1 %vm61_vm0, %v383_v40  ;;  %v365_v50 = vadd.f32 1.0, %v1907_v42  ;;  %v637_v42 = vld [vmem:[%s3283_s8 + $0xd0] sm:$0xff] }
 0x10a   :  { %v1911_v51 = vpop.eup %1910  ;;  %1710 = vmatmul.mubr.msk.f32.vlgmr.msra.gmra.mrb[4].mxu1 %vm61_vm0, %v384_v37  ;;  %v386_v52 = vmul.f32 %v1909_v49, %v2311_v44  ;;  %1916 = vrcp.f32 %v366_v48  ;;  %v624_v44 = vld [vmem:[%s3283_s8 + $0x68] sm:$0xff]  ;;  %v633_v37 = vld [vmem:[%s3283_s8 + $0xb0] sm:$0xff]  ;;  %v639_v49 = vld [vmem:[%s3283_s8 + $0xe0] sm:$0xff] }
 0x10b   :  { %1748 = vmatpush1.bf16.msra.mxu1 %v1747_v41  ;;  %v385_v2 = vmul.f32 %v1911_v51, %v2313_v46  ;;  %1918 = vrcp.f32 %v365_v50  ;;  %v1757_v12 = vpack.c.bf16 %v626_v8, %v624_v44  ;;  %v1767_v39 = vpack.c.bf16 %v633_v37, %v631_v35  ;;  %v635_v41 = vld [vmem:[%s3283_s8 + $0xc0] sm:$0xff]  ;;  %v646_v50 = vld [vmem:[%s3283_s8 + $0x118] sm:$0xff] }
 0x10c   :  { %1750 = vmatprep.subr.bf16.mxu1 %v1749_v43  ;;  %v640_v43 = vld [vmem:[%s3283_s8 + $0xe8] sm:$0xff]  ;;  %v1771_v47 = vpack.c.bf16 %v637_v42, %v635_v41  ;;  %v1775_v51 = vpack.c.bf16 %v641_v36, %v639_v49  ;;  %v647_v8 = vld [vmem:[%s3283_s8 + $0x120] sm:$0xff]  ;;  %v666_v35 = vld [vmem:[%s3283_s8 + $0x1b8] sm:$0xff] }
 0x10d   :  { %1712 = vmatprep.mubr.msk.f32.mxu1 %vm61_vm0, %v385_v2  ;;  %v1773_v48 = vpack.c.bf16 %v642_v45, %v640_v43  ;;  %v645_v2 = vld [vmem:[%s3283_s8 + $0x110] sm:$0xff]  ;;  %v668_v42 = vld [vmem:[%s3283_s8 + $0x1c8] sm:$0xff]  ;;  %v670_v43 = vld [vmem:[%s3283_s8 + $0x1d8] sm:$0xff] }
 0x10e   :  { %1713 = vmatmul.mubr.msk.f32.gmra.mrb[6].mxu1 %vm61_vm0, %v386_v52  ;;  %v1777_v52 = vpack.c.bf16 %v646_v50, %v644_v38  ;;  %v665_v41 = vld [vmem:[%s3283_s8 + $0x1b0] sm:$0xff]  ;;  %v1801_v49 = vpack.c.bf16 %v670_v43, %v668_v42  ;;  %v667_v36 = vld [vmem:[%s3283_s8 + $0x1c0] sm:$0xff]  ;;  %v672_v50 = vld [vmem:[%s3283_s8 + $0x1e8] sm:$0xff] }
 0x10f   :  { %v1913_v46 = vpop.eup %1912  ;;  %1752 = vmatpush1.bf16.msra.mxu1 %v1751_v61  ;;  %v643_v61 = vld [vmem:[%s3283_s8 + $0x100] sm:$0xff]  ;;  %v669_v38 = vld [vmem:[%s3283_s8 + $0x1d0] sm:$0xff]  ;;  %v917_v42 = vld [vmem:[%s3285_s9 + $0x88] sm:$0xff] }
 0x110   :  { %v1915_v10 = vpop.eup %1914  ;;  %1754 = vmatprep.subr.bf16.mxu1 %v1753_v3  ;;  %v388_v18 = vmul.f32 %v1913_v46, %v2318_v62  ;;  %v627_v62 = vld [vmem:[%s3283_s8 + $0x80] sm:$0xff]  ;;  %v648_v3 = vld [vmem:[%s3283_s8 + $0x128] sm:$0xff]  ;;  %v1779_v5 = vpack.c.bf16 %v645_v2, %v643_v61  ;;  %v649_v46 = vld [vmem:[%s3283_s8 + $0x130] sm:$0xff] }
 0x111   :  { %v387_v21 = vmul.f32 %v1915_v10, %v2320_v63  ;;  %v632_v63 = vld [vmem:[%s3283_s8 + $0xa8] sm:$0xff]  ;;  %v1763_v32 = vpack.c.bf16 %v629_v27, %v627_v62  ;;  %v1781_v44 = vpack.c.bf16 %v650_v4, %v648_v3  ;;  %v654_v10 = vld [vmem:[%s3283_s8 + $0x158] sm:$0xff]  ;;  %v657_v62 = vld [vmem:[%s3283_s8 + $0x170] sm:$0xff] }
 0x112   :  { %v1765_v34 = vpack.c.bf16 %v634_v29, %v632_v63  ;;  %v660_v27 = vld [vmem:[%s3283_s8 + $0x188] sm:$0xff]  ;;  %v671_v4 = vld [vmem:[%s3283_s8 + $0x1e0] sm:$0xff]  ;;  %v919_v43 = vld [vmem:[%s3285_s9 + $0x98] sm:$0xff] }
 0x113   :  { %1756 = vmatpush1.bf16.msra.mxu1 %v1755_v9  ;;  %1715 = vmatprep.mubr.msk.f32.mxu1 %vm61_vm0, %v387_v21  ;;  %v652_v9 = vld [vmem:[%s3283_s8 + $0x148] sm:$0xff] }
 0x114   :  { %v1917_v25 = vpop.eup %1916  ;;  %1758 = vmatprep.subr.bf16.mxu1 %v1757_v12  ;;  %1716 = vmatmul.mubr.msk.f32.gmra.mrb[8].mxu1 %vm61_vm0, %v388_v18  ;;  %v1783_v12 = vpack.c.bf16 %v649_v46, %v647_v8  ;;  %v1785_v13 = vpack.c.bf16 %v654_v10, %v652_v9  ;;  %v653_v18 = vld [vmem:[%s3283_s8 + $0x150] sm:$0xff] }
 0x115   :  { %v1919_v28 = vpop.eup %1918  ;;  %v390_v30 = vmul.f32 %v1917_v25, %v2324_v11  ;;  %v636_v11 = vld [vmem:[%s3283_s8 + $0xc8] sm:$0xff]  ;;  %v1787_v21 = vpack.c.bf16 %v653_v18, %v651_v17  ;;  %v1789_v25 = vpack.c.bf16 %v658_v20, %v656_v19  ;;  %v2573_v17 = vld [vmem:[%s3277_s2 + $0x38] sm:$0xff] }
 0x116   :  { %v389_v31 = vmul.f32 %v1919_v28, %v2326_v15  ;;  %v638_v15 = vld [vmem:[%s3283_s8 + $0xd8] sm:$0xff]  ;;  %v2580_v18 = vld [vmem:[%s3277_s2 + $0x48] sm:$0xff] }
 0x117   :  { %1760 = vmatpush1.bf16.msra.mxu1 %v1759_v24  ;;  %v1769_v40 = vpack.c.bf16 %v638_v15, %v636_v11  ;;  %v662_v28 = vld [vmem:[%s3283_s8 + $0x198] sm:$0xff]  ;;  %v2598_v20 = vld [vmem:[%s3277_s2 + $0x68] sm:$0xff] }
 0x118   :  { %1762 = vmatprep.subr.bf16.mxu1 %v1761_v26  ;;  %1718 = vmatprep.mubr.msk.f32.mxu1 %vm61_vm0, %v389_v31  ;;  %v655_v26 = vld [vmem:[%s3283_s8 + $0x160] sm:$0xff]  ;;  %v2589_v19 = vld [vmem:[%s3277_s2 + $0x58] sm:$0xff] }
 0x119   :  { %1719 = vmatmul.mubr.msk.f32.gmra.mrb[10].mxu1 %vm61_vm0, %v390_v30  ;;  %v1791_v63 = vpack.c.bf16 %v657_v62, %v655_v26  ;;  %v1793_v30 = vpack.c.bf16 %v662_v28, %v660_v27  ;;  %v659_v31 = vld [vmem:[%s3283_s8 + $0x180] sm:$0xff]  ;;  %v906_v62 = vld [vmem:[%s3285_s9 + $0x30] sm:$0xff]  ;;  %v909_v27 = vld [vmem:[%s3285_s9 + $0x48] sm:$0xff] }
 0x11a   :  { %739 = vmatprep.mubr.f32.mxu1 %v2407_v33  ;;  %v904_v26 = vld [vmem:[%s3285_s9 + $0x20] sm:$0xff]  ;;  %v911_v28 = vld [vmem:[%s3285_s9 + $0x58] sm:$0xff] }
 0x11b   :  { %1764 = vmatpush1.bf16.msra.mxu1 %v1763_v32  ;;  %v661_v32 = vld [vmem:[%s3283_s8 + $0x190] sm:$0xff] }
 0x11c   :  { %1766 = vmatprep.subr.bf16.mxu1 %v1765_v34  ;;  %v664_v34 = vld [vmem:[%s3283_s8 + $0x1a8] sm:$0xff]  ;;  %v1795_v37 = vpack.c.bf16 %v661_v32, %v659_v31  ;;  %v908_v31 = vld [vmem:[%s3285_s9 + $0x40] sm:$0xff]  ;;  %v910_v32 = vld [vmem:[%s3285_s9 + $0x50] sm:$0xff] }
 0x11f   :  { %1768 = vmatpush1.bf16.msra.mxu1 %v1767_v39  ;;  %v1797_v39 = vpack.c.bf16 %v666_v35, %v664_v34  ;;  %v913_v34 = vld [vmem:[%s3285_s9 + $0x68] sm:$0xff]  ;;  %v915_v35 = vld [vmem:[%s3285_s9 + $0x78] sm:$0xff] }
 0x120   :  { %1770 = vmatprep.subr.bf16.mxu1 %v1769_v40  ;;  %v663_v40 = vld [vmem:[%s3283_s8 + $0x1a0] sm:$0xff] }
 0x121   :  { %v1799_v45 = vpack.c.bf16 %v665_v41, %v663_v40  ;;  %v912_v40 = vld [vmem:[%s3285_s9 + $0x60] sm:$0xff]  ;;  %v914_v41 = vld [vmem:[%s3285_s9 + $0x70] sm:$0xff] }
 0x123   :  { %1772 = vmatpush1.bf16.msra.mxu1 %v1771_v47 }
 0x124   :  { %1774 = vmatprep.subr.bf16.mxu1 %v1773_v48 }
 0x127   :  { %1776 = vmatpush1.bf16.msra.mxu1 %v1775_v51  ;;  %v674_v51 = vld [vmem:[%s3283_s8 + $0x1f8] sm:$0xff] }
 0x128   :  { %1778 = vmatprep.subr.bf16.mxu1 %v1777_v52  ;;  %v1803_v52 = vpack.c.bf16 %v669_v38, %v667_v36  ;;  %v1805_v3 = vpack.c.bf16 %v674_v51, %v672_v50  ;;  %v916_v36 = vld [vmem:[%s3285_s9 + $0x80] sm:$0xff]  ;;  %v918_v38 = vld [vmem:[%s3285_s9 + $0x90] sm:$0xff]  ;;  %v921_v50 = vld [vmem:[%s3285_s9 + $0xa8] sm:$0xff] }
 0x129   :  { %v923_v51 = vld [vmem:[%s3285_s9 + $0xb8] sm:$0xff] }
 0x12b   :  { %1780 = vmatpush1.bf16.msra.mxu1 %v1779_v5  ;;  %v673_v5 = vld [vmem:[%s3283_s8 + $0x1f0] sm:$0xff] }
 0x12c   :  { %1782 = vmatprep.subr.bf16.mxu1 %v1781_v44  ;;  %v1807_v44 = vpack.c.bf16 %v673_v5, %v671_v4  ;;  %v920_v4 = vld [vmem:[%s3285_s9 + $0xa0] sm:$0xff]  ;;  %v922_v5 = vld [vmem:[%s3285_s9 + $0xb0] sm:$0xff] }
 0x12f   :  { %1784 = vmatpush1.bf16.msra.mxu1 %v1783_v12  ;;  %v2559_v12 = vld [vmem:[%s3277_s2 + $0x18] sm:$0xff] }
 0x130   :  { %v2484_v24 = vpop.xlane.xlu0 %1142  ;;  %1786 = vmatprep.subr.bf16.mxu1 %v1785_v13  ;;  %v2512_v11 = vpop.xlane.xlu1 %1145  ;;  %v2566_v13 = vld [vmem:[%s3277_s2 + $0x28] sm:$0xff] }
 0x133   :  { %1788 = vmatpush1.bf16.msra.mxu1 %v1787_v21 }
 0x134   :  { %v2498_v29 = vpop.xlane.xlu0 %1148  ;;  %1790 = vmatprep.subr.bf16.mxu1 %v1789_v25 }
 0x137   :  { %1792 = vmatpush1.bf16.msra.mxu1 %v1791_v63  ;;  %v1815_v63 = vpack.c.bf16 %v906_v62, %v904_v26 }
 0x138   :  { %v2514_v15 = vpop.xlane.xlu0 %1151  ;;  %1794 = vmatprep.subr.bf16.mxu1 %v1793_v30  ;;  %v1817_v30 = vpack.c.bf16 %v911_v28, %v909_v27  ;;  %v932_v27 = vld [vmem:[%s3285_s9 + $0x100] sm:$0xff]  ;;  %v934_v28 = vld [vmem:[%s3285_s9 + $0x110] sm:$0xff] }
 0x13b   :  { %1796 = vmatpush1.bf16.msra.mxu1 %v1795_v37  ;;  %v1819_v37 = vpack.c.bf16 %v910_v32, %v908_v31  ;;  %v939_v31 = vld [vmem:[%s3285_s9 + $0x138] sm:$0xff] }
 0x13c   :  { %v2528_v47 = vpop.xlane.xlu1 %1157  ;;  %v2530_v48 = vpop.xlane.xlu0 %1154  ;;  %1798 = vmatprep.subr.bf16.mxu1 %v1797_v39  ;;  %v1821_v39 = vpack.c.bf16 %v915_v35, %v913_v34  ;;  %v936_v34 = vld [vmem:[%s3285_s9 + $0x120] sm:$0xff]  ;;  %v938_v35 = vld [vmem:[%s3285_s9 + $0x130] sm:$0xff] }
 0x13f   :  { %1800 = vmatpush1.bf16.msra.mxu1 %v1799_v45  ;;  %v1823_v45 = vpack.c.bf16 %v914_v41, %v912_v40  ;;  %v943_v40 = vld [vmem:[%s3285_s9 + $0x158] sm:$0xff] }
 0x140   :  { %v2544_v61 = vpop.xlane.xlu1 %1163  ;;  %v2546_v2 = vpop.xlane.xlu0 %1160  ;;  %1802 = vmatprep.subr.bf16.mxu1 %v1801_v49  ;;  %v1825_v49 = vpack.c.bf16 %v919_v43, %v917_v42  ;;  %v940_v42 = vld [vmem:[%s3285_s9 + $0x140] sm:$0xff]  ;;  %v942_v43 = vld [vmem:[%s3285_s9 + $0x150] sm:$0xff] }
 0x143   :  { %1804 = vmatpush1.bf16.msra.mxu1 %v1803_v52  ;;  %v1827_v52 = vpack.c.bf16 %v918_v38, %v916_v36  ;;  %v947_v36 = vld [vmem:[%s3285_s9 + $0x178] sm:$0xff] }
 0x144   :  { %v1188_v8 = vpop.permute.xlu1 %1187  ;;  %v1186_v46 = vpop.permute.xlu0 %1185  ;;  %1806 = vmatprep.subr.bf16.mxu1 %v1805_v3  ;;  %v1829_v3 = vpack.c.bf16 %v923_v51, %v921_v50  ;;  %v944_v50 = vld [vmem:[%s3285_s9 + $0x160] sm:$0xff]  ;;  %v946_v51 = vld [vmem:[%s3285_s9 + $0x170] sm:$0xff] }
 0x145   :  { %v1218_v9 = vsel %vm61_vm0, %v1188_v8, 0.0  ;;  %v1215_v10 = vsel %vm61_vm0, %v1186_v46, 0.0  ;;  %v927_v8 = vld [vmem:[%s3285_s9 + $0xd8] sm:$0xff]  ;;  %v1831_v46 = vpack.c.bf16 %v922_v5, %v920_v4 }
 0x146   :  { %1219 = vadd.xlane.f32.xlu1 %v1218_v9  ;;  %1216 = vadd.xlane.f32.xlu0 %v1215_v10  ;;  %v924_v10 = vld [vmem:[%s3285_s9 + $0xc0] sm:$0xff]  ;;  %v951_v4 = vld [vmem:[%s3285_s9 + $0x198] sm:$0xff] }
 0x147   :  { %1808 = vmatpush1.bf16.msra.mxu1 %v1807_v44  ;;  %v925_v44 = vld [vmem:[%s3285_s9 + $0xc8] sm:$0xff] }
 0x148   :  { %v1833_v9 = vpack.c.bf16 %v927_v8, %v925_v44  ;;  %v948_v44 = vld [vmem:[%s3285_s9 + $0x180] sm:$0xff]  ;;  %v950_v8 = vld [vmem:[%s3285_s9 + $0x190] sm:$0xff] }
 0x14a   :  { %740 = vmatmul.mubr.f32.vlgmr.msra.gmra.mrb[12].mxu1 %v2087_v1 }
 0x14b   :  { %745 = vmatprep.mubr.f32.mxu1 %v2559_v12 }
 0x14e   :  { %746 = vmatmul.mubr.f32.gmra.mrb[14].mxu1 %v2107_v7 }
 0x14f   :  { %751 = vmatprep.mubr.f32.mxu1 %v2566_v13 }
 0x152   :  { %752 = vmatmul.mubr.f32.gmra.mrb[16].mxu1 %v2082_v0 }
 0x153   :  { %757 = vmatprep.mubr.f32.mxu1 %v2573_v17 }
 0x156   :  { %758 = vmatmul.mubr.f32.gmra.mrb[18].mxu1 %v2102_v6 }
 0x157   :  { %763 = vmatprep.mubr.f32.mxu1 %v2580_v18  ;;  %1231 = vrot.lane.b32.xlu1 %v2107_v7, %s2018_s28  ;;  %v2609_v7 = vld [vmem:[%s3277_s2 + $0x78] sm:$0xff] }
 0x15a   :  { %764 = vmatmul.mubr.f32.gmra.mrb[20].mxu1 %v2130_v16 }
 0x15b   :  { %769 = vmatprep.mubr.f32.mxu1 %v2589_v19  ;;  %1233 = vrot.lane.b32.xlu1 %v2082_v0, %s2018_s28  ;;  %v901_v0 = vld [vmem:[%s3285_s9 + $0x8] sm:$0xff] }
 0x15c   :  { %1229 = vrot.lane.b32.xlu0 %v2087_v1, %s2018_s28  ;;  %v903_v1 = vld [vmem:[%s3285_s9 + $0x18] sm:$0xff] }
 0x15e   :  { %770 = vmatmul.mubr.f32.gmra.mrb[22].mxu1 %v2122_v14 }
 0x15f   :  { %775 = vmatprep.mubr.f32.mxu1 %v2598_v20  ;;  %1235 = vrot.lane.b32.xlu1 %v2102_v6, %s2018_s28  ;;  %v900_v6 = vld [vmem:[%s3285_s9] sm:$0xff] }
 0x160   :  { %1237 = vrot.lane.b32.xlu0 %v2130_v16, %s2018_s28  ;;  %v902_v16 = vld [vmem:[%s3285_s9 + $0x10] sm:$0xff] }
 0x161   :  { %v1811_v21 = vpack.c.bf16 %v902_v16, %v900_v6  ;;  %v931_v6 = vld [vmem:[%s3285_s9 + $0xf8] sm:$0xff] }
 0x162   :  { %776 = vmatmul.mubr.f32.gmra.mrb[24].mxu1 %v2151_v23 }
 0x163   :  { %781 = vmatprep.mubr.f32.mxu1 %v2609_v7  ;;  %1239 = vrot.lane.b32.xlu1 %v2122_v14, %s2018_s28  ;;  %v1809_v14 = vpack.c.bf16 %v903_v1, %v901_v0  ;;  %v926_v0 = vld [vmem:[%s3285_s9 + $0xd0] sm:$0xff]  ;;  %v929_v1 = vld [vmem:[%s3285_s9 + $0xe8] sm:$0xff] }
 0x164   :  { %1241 = vrot.lane.b32.xlu0 %v2151_v23, %s2018_s28  ;;  %v907_v23 = vld [vmem:[%s3285_s9 + $0x38] sm:$0xff]  ;;  %v1837_v16 = vpack.c.bf16 %v931_v6, %v929_v1  ;;  %v952_v1 = vld [vmem:[%s3285_s9 + $0x1a0] sm:$0xff]  ;;  %v954_v6 = vld [vmem:[%s3285_s9 + $0x1b0] sm:$0xff] }
 0x165   :  { %1810 = vmatprep.subr.bf16.mxu0 %v1809_v14  ;;  %v1835_v14 = vpack.c.bf16 %v926_v0, %v924_v10  ;;  %v955_v10 = vld [vmem:[%s3285_s9 + $0x1b8] sm:$0xff] }
 0x166   :  { %782 = vmatmul.mubr.f32.gmra.mrb[26].mxu1 %v2146_v22  ;;  %1812 = vmatpush1.bf16.msra.mxu0 %v1811_v21  ;;  %v933_v21 = vld [vmem:[%s3285_s9 + $0x108] sm:$0xff] }
 0x167   :  { %1243 = vrot.lane.b32.xlu1 %v2146_v22, %s2018_s28  ;;  %v905_v22 = vld [vmem:[%s3285_s9 + $0x28] sm:$0xff] }
 0x168   :  { %v1813_v25 = vpack.c.bf16 %v907_v23, %v905_v22  ;;  %v928_v22 = vld [vmem:[%s3285_s9 + $0xe0] sm:$0xff]  ;;  %v930_v23 = vld [vmem:[%s3285_s9 + $0xf0] sm:$0xff] }
 0x169   :  { %v1839_v26 = vpack.c.bf16 %v930_v23, %v928_v22  ;;  %v959_v22 = vld [vmem:[%s3285_s9 + $0x1d8] sm:$0xff] }
 0x16a   :  { %1814 = vmatprep.subr.bf16.mxu0 %v1813_v25  ;;  %v935_v25 = vld [vmem:[%s3285_s9 + $0x118] sm:$0xff] }
 0x16b   :  { %1816 = vmatpush1.bf16.msra.mxu0 %v1815_v63  ;;  %v1841_v62 = vpack.c.bf16 %v935_v25, %v933_v21  ;;  %v1843_v63 = vpack.c.bf16 %v934_v28, %v932_v27  ;;  %v956_v21 = vld [vmem:[%s3285_s9 + $0x1c0] sm:$0xff]  ;;  %v958_v25 = vld [vmem:[%s3285_s9 + $0x1d0] sm:$0xff]  ;;  %v963_v27 = vld [vmem:[%s3285_s9 + $0x1f8] sm:$0xff] }
 0x16c   :  { %1818 = vmatprep.subr.bf16.mxu0 %v1817_v30  ;;  %v937_v30 = vld [vmem:[%s3285_s9 + $0x128] sm:$0xff] }
 0x16d   :  { %v1845_v32 = vpack.c.bf16 %v939_v31, %v937_v30  ;;  %v962_v30 = vld [vmem:[%s3285_s9 + $0x1f0] sm:$0xff] }
 0x16f   :  { %1820 = vmatpush1.bf16.msra.mxu0 %v1819_v37  ;;  %v1847_v37 = vpack.c.bf16 %v938_v35, %v936_v34 }
 0x170   :  { %1822 = vmatprep.subr.bf16.mxu0 %v1821_v39  ;;  %v941_v39 = vld [vmem:[%s3285_s9 + $0x148] sm:$0xff] }
 0x171   :  { %v1849_v41 = vpack.c.bf16 %v943_v40, %v941_v39 }
 0x173   :  { %1824 = vmatpush1.bf16.msra.mxu0 %v1823_v45  ;;  %v1851_v45 = vpack.c.bf16 %v942_v43, %v940_v42 }
 0x174   :  { %1826 = vmatprep.subr.bf16.mxu0 %v1825_v49  ;;  %v945_v49 = vld [vmem:[%s3285_s9 + $0x168] sm:$0xff] }
 0x175   :  { %v1853_v38 = vpack.c.bf16 %v947_v36, %v945_v49 }
 0x177   :  { %1828 = vmatpush1.bf16.msra.mxu0 %v1827_v52  ;;  %v1855_v52 = vpack.c.bf16 %v946_v51, %v944_v50  ;;  %v1592_v50 = vld [vmem:[%s3286_s7] ss:$0 sm:$0xff] }
 0x178   :  { %1830 = vmatprep.subr.bf16.mxu0 %v1829_v3  ;;  %v949_v3 = vld [vmem:[%s3285_s9 + $0x188] sm:$0xff] }
 0x179   :  { %v1857_v5 = vpack.c.bf16 %v951_v4, %v949_v3 }
 0x17b   :  { %1832 = vmatpush1.bf16.msra.mxu0 %v1831_v46  ;;  %v1859_v46 = vpack.c.bf16 %v950_v8, %v948_v44 }
 0x17c   :  { %1834 = vmatprep.subr.bf16.mxu0 %v1833_v9  ;;  %v953_v9 = vld [vmem:[%s3285_s9 + $0x1a8] sm:$0xff] }
 0x17d   :  { %v1861_v0 = vpack.c.bf16 %v955_v10, %v953_v9 }
 0x17f   :  { %1836 = vmatpush1.bf16.msra.mxu0 %v1835_v14  ;;  %v1863_v14 = vpack.c.bf16 %v954_v6, %v952_v1 }
 0x180   :  { %1838 = vmatprep.subr.bf16.mxu0 %v1837_v16  ;;  %v957_v16 = vld [vmem:[%s3285_s9 + $0x1c8] sm:$0xff] }
 0x181   :  { %v1865_v23 = vpack.c.bf16 %v959_v22, %v957_v16 }
 0x183   :  { %1840 = vmatpush1.bf16.msra.mxu0 %v1839_v26  ;;  %v1867_v26 = vpack.c.bf16 %v958_v25, %v956_v21 }
 0x184   :  { %1842 = vmatprep.subr.bf16.mxu0 %v1841_v62  ;;  %v961_v62 = vld [vmem:[%s3285_s9 + $0x1e8] sm:$0xff] }
 0x185   :  { %v1869_v28 = vpack.c.bf16 %v963_v27, %v961_v62 }
 0x187   :  { %1844 = vmatpush1.bf16.msra.mxu0 %v1843_v63  ;;  %v960_v63 = vld [vmem:[%s3285_s9 + $0x1e0] sm:$0xff] }
 0x188   :  { %1846 = vmatprep.subr.bf16.mxu0 %v1845_v32  ;;  %v1871_v31 = vpack.c.bf16 %v962_v30, %v960_v63  ;;  %v2814_v32 = vpop.xlane.xlu0 %1198 }
 0x18b   :  { %1848 = vmatpush1.bf16.msra.mxu0 %v1847_v37  ;;  %v2820_v37 = vpop.xlane.xlu1 %1201 }
 0x18c   :  { %1850 = vmatprep.subr.bf16.mxu0 %v1849_v41  ;;  %v2816_v34 = vpop.xlane.xlu0 %1204 }
 0x18f   :  { %1852 = vmatpush1.bf16.msra.mxu0 %v1851_v45  ;;  %v2824_v40 = vpop.xlane.xlu1 %1213 }
 0x190   :  { %1854 = vmatprep.subr.bf16.mxu0 %v1853_v38  ;;  %v2818_v35 = vpop.xlane.xlu0 %1207 }
 0x193   :  { %1856 = vmatpush1.bf16.msra.mxu0 %v1855_v52 }
 0x194   :  { %1858 = vmatprep.subr.bf16.mxu0 %v1857_v5  ;;  %v2822_v39 = vpop.xlane.xlu0 %1210 }
 0x197   :  { %1860 = vmatpush1.bf16.msra.mxu0 %v1859_v46 }
 0x198   :  { %1862 = vmatprep.subr.bf16.mxu0 %v1861_v0 }
 0x19b   :  { %1864 = vmatpush1.bf16.msra.mxu0 %v1863_v14 }
 0x19c   :  { %1866 = vmatprep.subr.bf16.mxu0 %v1865_v23 }
 0x19f   :  { %1868 = vmatpush1.bf16.msra.mxu0 %v1867_v26 }
 0x1a0   :  { %1870 = vmatprep.subr.bf16.mxu0 %v1869_v28 }
 0x1a3   :  { %1872 = vmatpush1.bf16.msra.mxu0 %v1871_v31 }
 0x1d3   :  { %v2826_v41 = vpop.xlane.xlu1 %1219  ;;  %v2828_v42 = vpop.xlane.xlu0 %1216 }
 0x1d7   :  { %v1232_v43 = vpop.permute.xlu1 %1231  ;;  %v1230_v45 = vpop.permute.xlu0 %1229 }
 0x1d8   :  { %v1256_v49 = vsel %vm61_vm0, %v1232_v43, 0.0  ;;  %v1253_v36 = vsel %vm61_vm0, %v1230_v45, 0.0  ;;  %v1288_v45 = vsel %vm61_vm0, %v2559_v12, 0.0 }
 0x1d9   :  { %1257 = vadd.xlane.f32.xlu1 %v1256_v49  ;;  %1254 = vadd.xlane.f32.xlu0 %v1253_v36  ;;  %v1285_v49 = vsel %vm61_vm0, %v2407_v33, 0.0 }
 0x1db   :  { %v1234_v38 = vpop.permute.xlu1 %1233  ;;  %v1238_v52 = vpop.permute.xlu0 %1237 }
 0x1dc   :  { %v1259_v51 = vsel %vm61_vm0, %v1234_v38, 0.0  ;;  %v1265_v1 = vsel %vm61_vm0, %v1238_v52, 0.0 }
 0x1dd   :  { %1260 = vadd.xlane.f32.xlu0 %v1259_v51  ;;  %v1711_v3 = vpop.f32.mrb[4].mxu1 }
 0x1de   :  { %v2836_v4 = vadd.f32 %v1711_v3, %v1592_v50  ;;  %v492_v5 = vpop.f32.mrb[5].mxu1 }
 0x1df   :  { %v1236_v44 = vpop.permute.xlu1 %1235  ;;  %v2838_v8 = vadd.f32 %v1592_v50, %v492_v5  ;;  %v1242_v22 = vpop.permute.xlu0 %1241 }
 0x1e0   :  { %v1262_v46 = vsel %vm61_vm0, %v1236_v44, 0.0  ;;  %v1602_v9 = vmul.f32 -1.442695, %v2836_v4  ;;  %v1271_v62 = vsel %vm61_vm0, %v1242_v22, 0.0 }
 0x1e1   :  { %1263 = vadd.xlane.f32.xlu0 %v1262_v46  ;;  %v1601_v10 = vmul.f32 -1.442695, %v2838_v8  ;;  %v1714_v0 = vpop.f32.mrb[6].mxu1 }
 0x1e2   :  { %1920 = vpow2.f32 %v1602_v9  ;;  %v2844_v6 = vadd.f32 %v1714_v0, %v1592_v50  ;;  %v502_v14 = vpop.f32.mrb[7].mxu1  ;;  %v1294_v9 = vsel %vm61_vm0, %v2573_v17, 0.0 }
 0x1e3   :  { %v1240_v16 = vpop.permute.xlu1 %1239  ;;  %1922 = vpow2.f32 %v1601_v10  ;;  %v2846_v23 = vadd.f32 %v1592_v50, %v502_v14  ;;  %v1291_v10 = vsel %vm61_vm0, %v2566_v13, 0.0 }
 0x1e4   :  { %v1268_v21 = vsel %vm61_vm0, %v1240_v16, 0.0  ;;  %v1604_v25 = vmul.f32 -1.442695, %v2844_v6 }
 0x1e5   :  { %1269 = vadd.xlane.f32.xlu1 %v1268_v21  ;;  %1266 = vadd.xlane.f32.xlu0 %v1265_v1  ;;  %v1603_v26 = vmul.f32 -1.442695, %v2846_v23 }
 0x1e6   :  { %1924 = vpow2.f32 %v1604_v25 }
 0x1e7   :  { %v1244_v27 = vpop.permute.xlu1 %1243  ;;  %1926 = vpow2.f32 %v1603_v26  ;;  %v1717_v28 = vpop.f32.mrb[8].mxu1  ;;  %v1300_v26 = vsel %vm61_vm0, %v2589_v19, 0.0 }
 0x1e8   :  { %v1274_v63 = vsel %vm61_vm0, %v1244_v27, 0.0  ;;  %v2853_v30 = vadd.f32 %v1717_v28, %v1592_v50  ;;  %v512_v31 = vpop.f32.mrb[9].mxu1  ;;  %v1306_v28 = vsel %vm61_vm0, %v2609_v7, 0.0 }
 0x1e9   :  { %1275 = vadd.xlane.f32.xlu1 %v1274_v63  ;;  %1272 = vadd.xlane.f32.xlu0 %v1271_v62  ;;  %v2855_v43 = vadd.f32 %v1592_v50, %v512_v31  ;;  %v1297_v62 = vsel %vm61_vm0, %v2580_v18, 0.0  ;;  %v1303_v63 = vsel %vm61_vm0, %v2598_v20, 0.0 }
 0x1ea   :  { %v1606_v36 = vmul.f32 -1.442695, %v2853_v30 }
 0x1eb   :  { %v1605_v38 = vmul.f32 -1.442695, %v2855_v43 }
 0x1ec   :  { %v1921_v51 = vpop.eup %1920  ;;  %1928 = vpow2.f32 %v1606_v36  ;;  %v1720_v52 = vpop.f32.mrb[10].mxu1 }
 0x1ed   :  { %v1923_v3 = vpop.eup %1922  ;;  %1289 = vadd.xlane.f32.xlu1 %v1288_v45  ;;  %1286 = vadd.xlane.f32.xlu0 %v1285_v49  ;;  %v556_v5 = vadd.f32 1.0, %v1921_v51  ;;  %1930 = vpow2.f32 %v1605_v38  ;;  %v528_v44 = vadd.f32 %v1720_v52, %v1592_v50  ;;  %v522_v46 = vpop.f32.mrb[11].mxu1 }
 0x1ee   :  { %v555_v0 = vadd.f32 1.0, %v1923_v3  ;;  %v523_v1 = vadd.f32 %v1592_v50, %v522_v46 }
 0x1ef   :  { %1932 = vrcp.f32 %v556_v5  ;;  %v1608_v14 = vmul.f32 -1.442695, %v528_v44 }
 0x1f0   :  { %v1925_v16 = vpop.eup %1924  ;;  %1934 = vrcp.f32 %v555_v0  ;;  %v1607_v22 = vmul.f32 -1.442695, %v523_v1 }
 0x1f1   :  { %v1927_v21 = vpop.eup %1926  ;;  %1295 = vadd.xlane.f32.xlu1 %v1294_v9  ;;  %1292 = vadd.xlane.f32.xlu0 %v1291_v10  ;;  %v558_v25 = vadd.f32 1.0, %v1925_v16  ;;  %1936 = vpow2.f32 %v1608_v14 }
 0x1f2   :  { %v557_v27 = vadd.f32 1.0, %v1927_v21  ;;  %1938 = vpow2.f32 %v1607_v22 }
 0x1f3   :  { %1940 = vrcp.f32 %v558_v25 }
 0x1f4   :  { %1942 = vrcp.f32 %v557_v27 }
 0x1f5   :  { %1301 = vadd.xlane.f32.xlu1 %v1300_v26  ;;  %1298 = vadd.xlane.f32.xlu0 %v1297_v62 }
 0x1f6   :  { %v1929_v50 = vpop.eup %1928 }
 0x1f7   :  { %v1931_v31 = vpop.eup %1930  ;;  %v560_v45 = vadd.f32 1.0, %v1929_v50 }
 0x1f8   :  { %v559_v49 = vadd.f32 1.0, %v1931_v31 }
 0x1f9   :  { %v1933_v36 = vpop.eup %1932  ;;  %1307 = vadd.xlane.f32.xlu1 %v1306_v28  ;;  %1304 = vadd.xlane.f32.xlu0 %v1303_v63  ;;  %1944 = vrcp.f32 %v560_v45 }
 0x1fa   :  { %v1935_v38 = vpop.eup %1934  ;;  %v580_v51 = vmul.f32 %v1933_v36, %v2836_v4  ;;  %1946 = vrcp.f32 %v559_v49 }
 0x1fb   :  { %v1937_v52 = vpop.eup %1936  ;;  %v579_v3 = vmul.f32 %v1935_v38, %v2838_v8 }
 0x1fc   :  { %v1939_v5 = vpop.eup %1938  ;;  %588 = vst.msk [vmem:[%s3287_s10 + $0x8] sm:$0xff] %vm61_vm0, %v580_v51  ;;  %v562_v46 = vadd.f32 1.0, %v1937_v52 }
 0x1fd   :  { %v1941_v9 = vpop.eup %1940  ;;  %587 = vst.msk [vmem:[%s3287_s10] sm:$0xff] %vm61_vm0, %v579_v3  ;;  %v561_v10 = vadd.f32 1.0, %v1939_v5 }
 0x1fe   :  { %v1943_v0 = vpop.eup %1942  ;;  %v582_v4 = vmul.f32 %v1941_v9, %v2844_v6  ;;  %1948 = vrcp.f32 %v562_v46 }
 0x1ff   :  { %v581_v8 = vmul.f32 %v1943_v0, %v2846_v23  ;;  %1950 = vrcp.f32 %v561_v10 }
 0x200   :  { %590 = vst.msk [vmem:[%s3287_s10 + $0x18] sm:$0xff] %vm61_vm0, %v582_v4 }
 0x201   :  { %589 = vst.msk [vmem:[%s3287_s10 + $0x10] sm:$0xff] %vm61_vm0, %v581_v8 }
 0x203   :  { %v1945_v14 = vpop.eup %1944 }
 0x204   :  { %v1947_v16 = vpop.eup %1946  ;;  %v584_v22 = vmul.f32 %v1945_v14, %v2853_v30 }
 0x205   :  { %v583_v6 = vmul.f32 %v1947_v16, %v2855_v43 }
 0x206   :  { %592 = vst.msk [vmem:[%s3287_s10 + $0x28] sm:$0xff] %vm61_vm0, %v584_v22 }
 0x207   :  { %591 = vst.msk [vmem:[%s3287_s10 + $0x20] sm:$0xff] %vm61_vm0, %v583_v6 }
 0x208   :  { %v1949_v23 = vpop.eup %1948 }
 0x209   :  { %v1951_v21 = vpop.eup %1950  ;;  %v586_v25 = vmul.f32 %v1949_v23, %v528_v44 }
 0x20a   :  { %1327 = vrot.lane.b32.xlu1 %v2559_v12, %s2016_s19  ;;  %v585_v26 = vmul.f32 %v1951_v21, %v523_v1 }
 0x20b   :  { %594 = vst.msk [vmem:[%s3287_s10 + $0x38] sm:$0xff] %vm61_vm0, %v586_v25 }
 0x20c   :  { %593 = vst.msk [vmem:[%s3287_s10 + $0x30] sm:$0xff] %vm61_vm0, %v585_v26 }
 0x20e   :  { %1329 = vrot.lane.b32.xlu1 %v2566_v13, %s2016_s19 }
 0x20f   :  { %1325 = vrot.lane.b32.xlu0 %v2407_v33, %s2016_s19 }
 0x212   :  { %1331 = vrot.lane.b32.xlu1 %v2573_v17, %s2016_s19 }
 0x213   :  { %1333 = vrot.lane.b32.xlu0 %v2580_v18, %s2016_s19 }
 0x216   :  { %1335 = vrot.lane.b32.xlu1 %v2589_v19, %s2016_s19 }
 0x217   :  { %1337 = vrot.lane.b32.xlu0 %v2598_v20, %s2016_s19 }
 0x21a   :  { %1339 = vrot.lane.b32.xlu1 %v2609_v7, %s2016_s19 }
 0x21d   :  { %v2929_v30 = vpop.f32.mrb[12].mxu1 }
 0x21e   :  { %v1609_v43 = vmul.f32 -1.442695, %v2929_v30  ;;  %v2932_v44 = vpop.f32.mrb[13].mxu1  ;;  %1381 = vrot.lane.b32.xlu1 %v2407_v33, %s2017_s0 }
 0x21f   :  { %v1610_v1 = vmul.f32 -1.442695, %v2932_v44 }
 0x220   :  { %1952 = vpow2.f32 %v1609_v43 }
 0x221   :  { %1954 = vpow2.f32 %v1610_v1  ;;  %v2937_v62 = vpop.f32.mrb[14].mxu1 }
 0x222   :  { %v1611_v27 = vmul.f32 -1.442695, %v2937_v62  ;;  %v2940_v50 = vpop.f32.mrb[15].mxu1  ;;  %1383 = vrot.lane.b32.xlu1 %v2559_v12, %s2017_s0 }
 0x223   :  { %v1612_v28 = vmul.f32 -1.442695, %v2940_v50 }
 0x224   :  { %1956 = vpow2.f32 %v1611_v27 }
 0x225   :  { %1958 = vpow2.f32 %v1612_v28  ;;  %v2945_v63 = vpop.f32.mrb[16].mxu1 }
 0x226   :  { %v1613_v31 = vmul.f32 -1.442695, %v2945_v63  ;;  %v2948_v45 = vpop.f32.mrb[17].mxu1  ;;  %1385 = vrot.lane.b32.xlu1 %v2566_v13, %s2017_s0 }
 0x227   :  { %v1614_v49 = vmul.f32 -1.442695, %v2948_v45 }
 0x228   :  { %1960 = vpow2.f32 %v1613_v31 }
 0x229   :  { %1962 = vpow2.f32 %v1614_v49  ;;  %v2953_v36 = vpop.f32.mrb[18].mxu1 }
 0x22a   :  { %v1953_v38 = vpop.eup %1952  ;;  %v1615_v51 = vmul.f32 -1.442695, %v2953_v36  ;;  %v2956_v52 = vpop.f32.mrb[19].mxu1  ;;  %1387 = vrot.lane.b32.xlu1 %v2573_v17, %s2017_s0 }
 0x22b   :  { %v1955_v3 = vpop.eup %1954  ;;  %v836_v5 = vadd.f32 1.0, %v1953_v38  ;;  %v1616_v46 = vmul.f32 -1.442695, %v2956_v52 }
 0x22c   :  { %v837_v9 = vadd.f32 1.0, %v1955_v3  ;;  %1964 = vpow2.f32 %v1615_v51 }
 0x22d   :  { %1966 = vrcp.f32 %v836_v5  ;;  %v2961_v10 = vpop.f32.mrb[20].mxu1 }
 0x22e   :  { %v1957_v0 = vpop.eup %1956  ;;  %1968 = vrcp.f32 %v837_v9  ;;  %v1617_v4 = vmul.f32 -1.442695, %v2961_v10  ;;  %v2964_v8 = vpop.f32.mrb[21].mxu1  ;;  %1389 = vrot.lane.b32.xlu1 %v2580_v18, %s2017_s0 }
 0x22f   :  { %v1959_v14 = vpop.eup %1958  ;;  %v838_v16 = vadd.f32 1.0, %v1957_v0  ;;  %1970 = vpow2.f32 %v1616_v46  ;;  %v1618_v22 = vmul.f32 -1.442695, %v2964_v8 }
 0x230   :  { %v839_v6 = vadd.f32 1.0, %v1959_v14  ;;  %1972 = vpow2.f32 %v1617_v4 }
 0x231   :  { %1974 = vrcp.f32 %v838_v16  ;;  %v2969_v23 = vpop.f32.mrb[22].mxu1 }
 0x232   :  { %v1961_v21 = vpop.eup %1960  ;;  %1976 = vrcp.f32 %v839_v6  ;;  %v1619_v25 = vmul.f32 -1.442695, %v2969_v23  ;;  %v2972_v26 = vpop.f32.mrb[23].mxu1  ;;  %1391 = vrot.lane.b32.xlu1 %v2589_v19, %s2017_s0 }
 0x233   :  { %v1963_v43 = vpop.eup %1962  ;;  %v840_v1 = vadd.f32 1.0, %v1961_v21  ;;  %1978 = vpow2.f32 %v1618_v22  ;;  %v1620_v27 = vmul.f32 -1.442695, %v2972_v26 }
 0x234   :  { %v841_v28 = vadd.f32 1.0, %v1963_v43  ;;  %1980 = vpow2.f32 %v1619_v25 }
 0x235   :  { %1982 = vrcp.f32 %v840_v1  ;;  %v2977_v31 = vpop.f32.mrb[24].mxu1 }
 0x236   :  { %v1965_v49 = vpop.eup %1964  ;;  %1984 = vrcp.f32 %v841_v28  ;;  %v1621_v38 = vmul.f32 -1.442695, %v2977_v31  ;;  %v2980_v51 = vpop.f32.mrb[25].mxu1  ;;  %1393 = vrot.lane.b32.xlu1 %v2598_v20, %s2017_s0 }
 0x237   :  { %v1967_v3 = vpop.eup %1966  ;;  %v842_v5 = vadd.f32 1.0, %v1965_v49  ;;  %1986 = vpow2.f32 %v1620_v27  ;;  %v1622_v46 = vmul.f32 -1.442695, %v2980_v51 }
 0x238   :  { %v1969_v9 = vpop.eup %1968  ;;  %v884_v0 = vmul.f32 %v1967_v3, %v2929_v30  ;;  %1988 = vpow2.f32 %v1621_v38 }
 0x239   :  { %v1971_v4 = vpop.eup %1970  ;;  %v885_v14 = vmul.f32 %v1969_v9, %v2932_v44  ;;  %1990 = vrcp.f32 %v842_v5  ;;  %v2987_v16 = vpop.f32.mrb[26].mxu1 }
 0x23a   :  { %v1973_v22 = vpop.eup %1972  ;;  %v843_v6 = vadd.f32 1.0, %v1971_v4  ;;  %1992 = vpow2.f32 %v1622_v46  ;;  %v1623_v21 = vmul.f32 -1.442695, %v2987_v16  ;;  %v2990_v25 = vpop.f32.mrb[27].mxu1  ;;  %1437 = vrot.lane.b32.xlu1 %v2407_v33, %s2018_s28 }
 0x23b   :  { %v1975_v43 = vpop.eup %1974  ;;  %v844_v1 = vadd.f32 1.0, %v1973_v22  ;;  %v1624_v30 = vmul.f32 -1.442695, %v2990_v25  ;;  %1028 = vmatprep.mubr.f32.mxu0 %v885_v14 }
 0x23c   :  { %v1977_v27 = vpop.eup %1976  ;;  %v886_v44 = vmul.f32 %v1975_v43, %v2937_v62  ;;  %1994 = vrcp.f32 %v843_v6  ;;  %1029 = vmatmul.mubr.f32.vlgmr.msra.gmra.mrb[8].mxu0 %v884_v0 }
 0x23d   :  { %v1979_v28 = vpop.eup %1978  ;;  %v887_v49 = vmul.f32 %v1977_v27, %v2940_v50  ;;  %1996 = vrcp.f32 %v844_v1 }
 0x23e   :  { %v1981_v38 = vpop.eup %1980  ;;  %v845_v3 = vadd.f32 1.0, %v1979_v28  ;;  %1998 = vpow2.f32 %v1623_v21  ;;  %1439 = vrot.lane.b32.xlu1 %v2559_v12, %s2018_s28 }
 0x23f   :  { %v1983_v33 = vpop.eup %1982  ;;  %v846_v5 = vadd.f32 1.0, %v1981_v38  ;;  %2000 = vpow2.f32 %v1624_v30  ;;  %1034 = vmatprep.mubr.f32.mxu0 %v887_v49 }
 0x240   :  { %v1985_v46 = vpop.eup %1984  ;;  %v888_v9 = vmul.f32 %v1983_v33, %v2945_v63  ;;  %2002 = vrcp.f32 %v845_v3  ;;  %1035 = vmatmul.mubr.f32.gmra.mrb[10].mxu0 %v886_v44 }
 0x241   :  { %v1987_v62 = vpop.eup %1986  ;;  %v889_v0 = vmul.f32 %v1985_v46, %v2948_v45  ;;  %2004 = vrcp.f32 %v846_v5 }
 0x242   :  { %v1989_v50 = vpop.eup %1988  ;;  %v847_v4 = vadd.f32 1.0, %v1987_v62  ;;  %1441 = vrot.lane.b32.xlu1 %v2566_v13, %s2018_s28 }
 0x243   :  { %v1991_v14 = vpop.eup %1990  ;;  %v848_v12 = vadd.f32 1.0, %v1989_v50  ;;  %1040 = vmatprep.mubr.f32.mxu0 %v889_v0 }
 0x244   :  { %v1993_v22 = vpop.eup %1992  ;;  %2006 = vrcp.f32 %v847_v4  ;;  %1041 = vmatmul.mubr.f32.gmra.mrb[12].mxu0 %v888_v9  ;;  %v890_v21 = vmul.f32 %v1991_v14, %v2953_v36 }
 0x245   :  { %2008 = vrcp.f32 %v848_v12  ;;  %v849_v6 = vadd.f32 1.0, %v1993_v22 }
 0x246   :  { %v1995_v63 = vpop.eup %1994  ;;  %1443 = vrot.lane.b32.xlu1 %v2573_v17, %s2018_s28 }
 0x247   :  { %v1997_v45 = vpop.eup %1996  ;;  %v891_v43 = vmul.f32 %v1995_v63, %v2956_v52  ;;  %2010 = vrcp.f32 %v849_v6 }
 0x248   :  { %v1999_v1 = vpop.eup %1998  ;;  %v892_v44 = vmul.f32 %v1997_v45, %v2961_v10 }
 0x249   :  { %v2001_v13 = vpop.eup %2000  ;;  %v850_v30 = vadd.f32 1.0, %v1999_v1  ;;  %1046 = vmatprep.mubr.f32.mxu0 %v891_v43 }
 0x24a   :  { %v2003_v27 = vpop.eup %2002  ;;  %v851_v28 = vadd.f32 1.0, %v2001_v13  ;;  %1047 = vmatmul.mubr.f32.gmra.mrb[14].mxu0 %v890_v21  ;;  %1445 = vrot.lane.b32.xlu1 %v2580_v18, %s2018_s28 }
 0x24b   :  { %v2005_v36 = vpop.eup %2004  ;;  %v893_v49 = vmul.f32 %v2003_v27, %v2964_v8  ;;  %2012 = vrcp.f32 %v850_v30 }
 0x24c   :  { %2014 = vrcp.f32 %v851_v28  ;;  %v894_v52 = vmul.f32 %v2005_v36, %v2969_v23 }
 0x24d   :  { %1052 = vmatprep.mubr.f32.mxu0 %v893_v49 }
 0x24e   :  { %v2007_v17 = vpop.eup %2006  ;;  %1053 = vmatmul.mubr.f32.gmra.mrb[16].mxu0 %v892_v44  ;;  %1447 = vrot.lane.b32.xlu1 %v2589_v19, %s2018_s28 }
 0x24f   :  { %v2009_v38 = vpop.eup %2008  ;;  %v895_v10 = vmul.f32 %v2007_v17, %v2972_v26 }
 0x250   :  { %v896_v18 = vmul.f32 %v2009_v38, %v2977_v31 }
 0x251   :  { %v2011_v3 = vpop.eup %2010  ;;  %1058 = vmatprep.mubr.f32.mxu0 %v895_v10 }
 0x252   :  { %v897_v33 = vmul.f32 %v2011_v3, %v2980_v51  ;;  %1059 = vmatmul.mubr.f32.gmra.mrb[18].mxu0 %v894_v52  ;;  %1451 = vrot.lane.b32.xlu1 %v2609_v7, %s2018_s28 }
 0x254   :  { %1064 = vmatprep.mubr.f32.mxu0 %v897_v33 }
 0x255   :  { %v2013_v8 = vpop.eup %2012 }
 0x256   :  { %v2015_v23 = vpop.eup %2014  ;;  %v898_v5 = vmul.f32 %v2013_v8, %v2987_v16  ;;  %1065 = vmatmul.mubr.f32.gmra.mrb[20].mxu0 %v896_v18 }
 0x257   :  { %v899_v19 = vmul.f32 %v2015_v23, %v2990_v25 }
 0x259   :  { %1070 = vmatprep.mubr.f32.mxu0 %v899_v19 }
 0x25a   :  { %1071 = vmatmul.mubr.f32.gmra.mrb[22].mxu0 %v898_v5 }
 0x266   :  { %v3021_v26 = vpop.xlane.xlu0 %1254  ;;  %v3025_v31 = vpop.xlane.xlu1 %1257 }
 0x26a   :  { %v3023_v46 = vpop.xlane.xlu0 %1260 }
 0x26e   :  { %v3027_v51 = vpop.xlane.xlu0 %1263 }
 0x272   :  { %v3029_v9 = vpop.xlane.xlu1 %1269  ;;  %v3031_v62 = vpop.xlane.xlu0 %1266 }
 0x276   :  { %v3033_v0 = vpop.xlane.xlu1 %1275  ;;  %v3035_v16 = vpop.xlane.xlu0 %1272 }
 0x27a   :  { %v3037_v50 = vpop.xlane.xlu1 %1289  ;;  %v3039_v25 = vpop.xlane.xlu0 %1286 }
 0x27e   :  { %v3041_v4 = vpop.xlane.xlu1 %1295  ;;  %v3043_v14 = vpop.xlane.xlu0 %1292 }
 0x282   :  { %v3045_v12 = vpop.xlane.xlu1 %1301  ;;  %v3047_v22 = vpop.xlane.xlu0 %1298 }
 0x286   :  { %v3049_v6 = vpop.xlane.xlu1 %1307  ;;  %v3051_v63 = vpop.xlane.xlu0 %1304 }
 0x28a   :  { %v1328_v21 = vpop.permute.xlu1 %1327  ;;  %v1326_v45 = vpop.permute.xlu0 %1325 }
 0x28b   :  { %v1349_v43 = vsel %vm61_vm0, %v1326_v45, 0.0  ;;  %v1352_v23 = vsel %vm61_vm0, %v1328_v21, 0.0 }
 0x28c   :  { %1350 = vadd.xlane.f32.xlu0 %v1349_v43 }
 0x28e   :  { %v1330_v1 = vpop.permute.xlu1 %1329 }
 0x28f   :  { %v1355_v13 = vsel %vm61_vm0, %v1330_v1, 0.0 }
 0x290   :  { %1356 = vadd.xlane.f32.xlu1 %v1355_v13 }
 0x292   :  { %v1332_v30 = vpop.permute.xlu1 %1331 }
 0x293   :  { %v1358_v5 = vsel %vm61_vm0, %v1332_v30, 0.0 }
 0x296   :  { %v1336_v27 = vpop.permute.xlu1 %1335 }
 0x297   :  { %v1364_v44 = vsel %vm61_vm0, %v1336_v27, 0.0 }
 0x298   :  { %1365 = vadd.xlane.f32.xlu1 %v1364_v44 }
 0x29a   :  { %v1340_v28 = vpop.permute.xlu1 %1339 }
 0x29b   :  { %v1370_v36 = vsel %vm61_vm0, %v1340_v28, 0.0 }
 0x29c   :  { %1371 = vadd.xlane.f32.xlu1 %v1370_v36 }
 0x29e   :  { %v1382_v49 = vpop.permute.xlu1 %1381 }
 0x29f   :  { %v1405_v13 = vsel %vm61_vm0, %v1382_v49, 0.0 }
 0x2a2   :  { %v1384_v17 = vpop.permute.xlu1 %1383  ;;  %1395 = vrot.lane.b32.xlu0 %v2609_v7, %s2017_s0  ;;  %v1334_v7 = vpop.permute.xlu0 %1333 }
 0x2a3   :  { %v1408_v52 = vsel %vm61_vm0, %v1384_v17, 0.0  ;;  %v1361_v45 = vsel %vm61_vm0, %v1334_v7, 0.0 }
 0x2a4   :  { %1409 = vadd.xlane.f32.xlu1 %v1408_v52 }
 0x2a6   :  { %v1386_v38 = vpop.permute.xlu1 %1385  ;;  %1449 = vrot.lane.b32.xlu0 %v2598_v20, %s2018_s28  ;;  %v1338_v20 = vpop.permute.xlu0 %1337 }
 0x2a7   :  { %v1367_v43 = vsel %vm61_vm0, %v1338_v20, 0.0  ;;  %v1411_v21 = vsel %vm61_vm0, %v1386_v38, 0.0 }
 0x2aa   :  { %v1388_v10 = vpop.permute.xlu1 %1387 }
 0x2ab   :  { %v1414_v3 = vsel %vm61_vm0, %v1388_v10, 0.0 }
 0x2ac   :  { %1415 = vadd.xlane.f32.xlu1 %v1414_v3 }
 0x2ae   :  { %v1390_v18 = vpop.permute.xlu1 %1389 }
 0x2af   :  { %v1417_v30 = vsel %vm61_vm0, %v1390_v18, 0.0 }
 0x2b2   :  { %v1392_v33 = vpop.permute.xlu1 %1391 }
 0x2b3   :  { %v1420_v8 = vsel %vm61_vm0, %v1392_v33, 0.0 }
 0x2b4   :  { %1421 = vadd.xlane.f32.xlu1 %v1420_v8 }
 0x2b6   :  { %v1394_v19 = vpop.permute.xlu1 %1393 }
 0x2b7   :  { %v1423_v28 = vsel %vm61_vm0, %v1394_v19, 0.0 }
 0x2ba   :  { %v1438_v1 = vpop.permute.xlu1 %1437 }
 0x2bb   :  { %v1461_v17 = vsel %vm61_vm0, %v1438_v1, 0.0 }
 0x2be   :  { %v3069_v27 = vpop.permute.xlu1 %1439 }
 0x2c2   :  { %v1442_v44 = vpop.permute.xlu1 %1441 }
 0x2c3   :  { %v1467_v49 = vsel %vm61_vm0, %v1442_v44, 0.0 }
 0x2c5   :  { %1353 = vadd.xlane.f32.xlu0 %v1352_v23 }
 0x2c6   :  { %v3074_v36 = vpop.permute.xlu1 %1443 }
 0x2c9   :  { %1359 = vadd.xlane.f32.xlu0 %v1358_v5 }
 0x2ca   :  { %v1446_v52 = vpop.permute.xlu1 %1445 }
 0x2cb   :  { %v1473_v10 = vsel %vm61_vm0, %v1446_v52, 0.0 }
 0x2cd   :  { %1362 = vadd.xlane.f32.xlu0 %v1361_v45 }
 0x2d1   :  { %1368 = vadd.xlane.f32.xlu0 %v1367_v43 }
 0x2d5   :  { %1406 = vadd.xlane.f32.xlu0 %v1405_v13 }
 0x2d9   :  { %1412 = vadd.xlane.f32.xlu0 %v1411_v21 }
 0x2dd   :  { %1418 = vadd.xlane.f32.xlu0 %v1417_v30 }
 0x2e1   :  { %1424 = vadd.xlane.f32.xlu0 %v1423_v28 }
 0x2e5   :  { %1462 = vadd.xlane.f32.xlu0 %v1461_v17 }
 0x2e9   :  { %1468 = vadd.xlane.f32.xlu0 %v1467_v49 }
 0x2ed   :  { %1474 = vadd.xlane.f32.xlu0 %v1473_v10 }
 0x30f   :  { %v1030_v38 = vpop.f32.mrb[8].mxu0 }
 0x310   :  { %v1101_v3 = vmul.f32 %v2271_v54, %v1030_v38  ;;  %v1165_v18 = vmul.f32 %v2484_v24, %v1030_v38  ;;  %v1221_v33 = vmul.f32 %v2814_v32, %v1030_v38  ;;  %v3082_v8 = vpop.f32.mrb[9].mxu0  ;;  %v1277_v23 = vmul.f32 %v3021_v26, %v1030_v38 }
 0x311   :  { %v1309_v44 = vmul.f32 %v3039_v25, %v3082_v8 }
 0x312   :  { %v1493_v7 = vsel %vm61_vm0, %v1101_v3, %v1165_v18 }
 0x313   :  { %v1502_v5 = vsel %vm1501_vm1, %v1493_v7, %v1221_v33  ;;  %v1036_v19 = vpop.f32.mrb[10].mxu0 }
 0x314   :  { %v1511_v45 = vsel %vm1510_vm2, %v1502_v5, %v1277_v23  ;;  %v1102_v20 = vmul.f32 %v2275_v56, %v1036_v19  ;;  %v1166_v54 = vmul.f32 %v2512_v11, %v1036_v19  ;;  %v1222_v24 = vmul.f32 %v2820_v37, %v1036_v19  ;;  %v3091_v32 = vpop.f32.mrb[11].mxu0 }
 0x315   :  { %1543 = vst [vmem:[%s3288_s11] sm:$0xff] %v1511_v45  ;;  %v1278_v26 = vmul.f32 %v3025_v31, %v1036_v19 }
 0x316   :  { %v1494_v43 = vsel %vm61_vm0, %v1102_v20, %v1166_v54 }
 0x317   :  { %v1503_v1 = vsel %vm1501_vm1, %v1494_v43, %v1222_v24  ;;  %v1042_v13 = vpop.f32.mrb[12].mxu0 }
 0x318   :  { %v1512_v21 = vsel %vm1510_vm2, %v1503_v1, %v1278_v26  ;;  %v1103_v56 = vmul.f32 %v2269_v53, %v1042_v13  ;;  %v1167_v11 = vmul.f32 %v2498_v29, %v1042_v13  ;;  %v1223_v37 = vmul.f32 %v2816_v34, %v1042_v13  ;;  %v3103_v30 = vpop.f32.mrb[13].mxu0  ;;  %v1448_v26 = vpop.permute.xlu1 %1447 }
 0x319   :  { %1545 = vst [vmem:[%s3288_s11 + $0x10] sm:$0xff] %v1512_v21  ;;  %v1351_v31 = vpop.xlane.xlu0 %1350  ;;  %v1279_v28 = vmul.f32 %v3023_v46, %v1042_v13 }
 0x31a   :  { %v1495_v17 = vsel %vm61_vm0, %v1103_v56, %v1167_v11  ;;  %v1373_v53 = vmul.f32 %v1351_v31, %v3082_v8 }
 0x31b   :  { %v1504_v29 = vsel %vm1501_vm1, %v1495_v17, %v1223_v37 }
 0x31c   :  { %v1513_v34 = vsel %vm1510_vm2, %v1504_v29, %v1279_v28  ;;  %v3116_v49 = vsel %vm61_vm0, %v1309_v44, %v1373_v53 }
 0x31d   :  { %1547 = vst [vmem:[%s3288_s11 + $0x20] sm:$0xff] %v1513_v34  ;;  %v1048_v52 = vpop.f32.mrb[14].mxu0  ;;  %v1396_v3 = vpop.permute.xlu0 %1395 }
 0x31e   :  { %v1104_v25 = vmul.f32 %v2273_v55, %v1048_v52  ;;  %v1168_v46 = vmul.f32 %v2514_v15, %v1048_v52  ;;  %v1224_v10 = vmul.f32 %v2818_v35, %v1048_v52  ;;  %v3124_v38 = vpop.f32.mrb[15].mxu0  ;;  %v1426_v18 = vsel %vm61_vm0, %v1396_v3, 0.0 }
 0x31f   :  { %v1280_v33 = vmul.f32 %v3027_v51, %v1048_v52  ;;  %1427 = vadd.xlane.f32.xlu1 %v1426_v18  ;;  %v1464_v51 = vsel %vm61_vm0, %v3069_v27, 0.0 }
 0x320   :  { %v1496_v23 = vsel %vm61_vm0, %v1104_v25, %v1168_v46 }
 0x321   :  { %v1505_v7 = vsel %vm1501_vm1, %v1496_v23, %v1224_v10  ;;  %v1054_v5 = vpop.f32.mrb[16].mxu0  ;;  %v1450_v20 = vpop.permute.xlu0 %1449 }
 0x322   :  { %v1514_v19 = vsel %vm1510_vm2, %v1505_v7, %v1280_v33  ;;  %v1105_v55 = vmul.f32 %v2279_v58, %v1054_v5  ;;  %v1169_v15 = vmul.f32 %v2530_v48, %v1054_v5  ;;  %v1225_v35 = vmul.f32 %v2822_v39, %v1054_v5  ;;  %v3134_v45 = vpop.f32.mrb[17].mxu0 }
 0x323   :  { %1549 = vst [vmem:[%s3288_s11 + $0x30] sm:$0xff] %v1514_v19  ;;  %v1479_v54 = vsel %vm61_vm0, %v1450_v20, 0.0  ;;  %v1281_v24 = vmul.f32 %v3031_v62, %v1054_v5  ;;  %1465 = vadd.xlane.f32.xlu1 %v1464_v51  ;;  %v1470_v62 = vsel %vm61_vm0, %v3074_v36, 0.0  ;;  %v1312_v51 = vmul.f32 %v3041_v4, %v3124_v38 }
 0x324   :  { %v1497_v58 = vsel %vm61_vm0, %v1105_v55, %v1169_v15  ;;  %1480 = vadd.xlane.f32.xlu0 %v1479_v54 }
 0x325   :  { %v1506_v48 = vsel %vm1501_vm1, %v1497_v58, %v1225_v35  ;;  %v1060_v39 = vpop.f32.mrb[18].mxu0 }
 0x326   :  { %v1515_v43 = vsel %vm1510_vm2, %v1506_v48, %v1281_v24  ;;  %v1106_v27 = vmul.f32 %v2277_v57, %v1060_v39  ;;  %v1170_v1 = vmul.f32 %v2528_v47, %v1060_v39  ;;  %v1226_v13 = vmul.f32 %v2824_v40, %v1060_v39  ;;  %v3149_v21 = vpop.f32.mrb[19].mxu0 }
 0x327   :  { %1551 = vst [vmem:[%s3288_s11 + $0x40] sm:$0xff] %v1515_v43  ;;  %v1282_v56 = vmul.f32 %v3029_v9, %v1060_v39  ;;  %1471 = vadd.xlane.f32.xlu1 %v1470_v62  ;;  %v1476_v57 = vsel %vm61_vm0, %v1448_v26, 0.0  ;;  %v1452_v9 = vpop.permute.xlu1 %1451 }
 0x328   :  { %v1498_v11 = vsel %vm61_vm0, %v1106_v27, %v1170_v1  ;;  %v1482_v29 = vsel %vm61_vm0, %v1452_v9, 0.0 }
 0x329   :  { %v1507_v47 = vsel %vm1501_vm1, %v1498_v11, %v1226_v13  ;;  %v1066_v37 = vpop.f32.mrb[20].mxu0 }
 0x32a   :  { %v1516_v40 = vsel %vm1510_vm2, %v1507_v47, %v1282_v56  ;;  %v1107_v31 = vmul.f32 %v2283_v60, %v1066_v37  ;;  %v1171_v36 = vmul.f32 %v2546_v2, %v1066_v37  ;;  %v1227_v44 = vmul.f32 %v2828_v42, %v1066_v37  ;;  %v3164_v28 = vpop.f32.mrb[21].mxu0 }
 0x32b   :  { %1553 = vst [vmem:[%s3288_s11 + $0x50] sm:$0xff] %v1516_v40  ;;  %v1283_v17 = vmul.f32 %v3035_v16, %v1066_v37  ;;  %1477 = vadd.xlane.f32.xlu1 %v1476_v57  ;;  %v1315_v39 = vmul.f32 %v3051_v63, %v3164_v28 }
 0x32c   :  { %v1499_v53 = vsel %vm61_vm0, %v1107_v31, %v1171_v36  ;;  %v1311_v31 = vmul.f32 %v3043_v14, %v3103_v30  ;;  %v1313_v14 = vmul.f32 %v3047_v22, %v3134_v45 }
 0x32d   :  { %v1508_v60 = vsel %vm1501_vm1, %v1499_v53, %v1227_v44  ;;  %v1072_v34 = vpop.f32.mrb[22].mxu0 }
 0x32e   :  { %v1517_v2 = vsel %vm1510_vm2, %v1508_v60, %v1283_v17  ;;  %v1108_v42 = vmul.f32 %v2281_v59, %v1072_v34  ;;  %v1172_v52 = vmul.f32 %v2544_v61, %v1072_v34  ;;  %v1228_v25 = vmul.f32 %v2826_v41, %v1072_v34  ;;  %v3177_v46 = vpop.f32.mrb[23].mxu0  ;;  %v1357_v59 = vpop.xlane.xlu1 %1356 }
 0x32f   :  { %1555 = vst [vmem:[%s3288_s11 + $0x60] sm:$0xff] %v1517_v2  ;;  %v1284_v16 = vmul.f32 %v3033_v0, %v1072_v34  ;;  %1483 = vadd.xlane.f32.xlu1 %v1482_v29  ;;  %v1310_v0 = vmul.f32 %v3037_v50, %v3091_v32  ;;  %v1375_v63 = vmul.f32 %v1357_v59, %v3103_v30 }
 0x330   :  { %v1500_v10 = vsel %vm61_vm0, %v1108_v42, %v1172_v52 }
 0x331   :  { %v1509_v3 = vsel %vm1501_vm1, %v1500_v10, %v1228_v25  ;;  %v1521_v44 = vsel %vm61_vm0, %v1311_v31, %v1375_v63 }
 0x332   :  { %v1518_v18 = vsel %vm1510_vm2, %v1509_v3, %v1284_v16  ;;  %v1366_v61 = vpop.xlane.xlu1 %1365 }
 0x333   :  { %1557 = vst [vmem:[%s3288_s11 + $0x70] sm:$0xff] %v1518_v18 }
 0x336   :  { %v3189_v41 = vpop.xlane.xlu1 %1371 }
 0x33a   :  { %v1410_v33 = vpop.xlane.xlu1 %1409 }
 0x33b   :  { %v1430_v23 = vmul.f32 %v1410_v33, %v3091_v32  ;;  %v1378_v33 = vmul.f32 %v1366_v61, %v3149_v21 }
 0x33e   :  { %v1416_v19 = vpop.xlane.xlu1 %1415 }
 0x33f   :  { %v1432_v15 = vmul.f32 %v1416_v19, %v3124_v38  ;;  %v1316_v19 = vmul.f32 %v3049_v6, %v3177_v46 }
 0x342   :  { %v1422_v22 = vpop.xlane.xlu1 %1421 }
 0x352   :  { %v1354_v7 = vpop.xlane.xlu0 %1353 }
 0x353   :  { %v1374_v5 = vmul.f32 %v1354_v7, %v3091_v32 }
 0x355   :  { %v1520_v55 = vsel %vm61_vm0, %v1310_v0, %v1374_v5 }
 0x356   :  { %v1360_v35 = vpop.xlane.xlu0 %1359  ;;  %v1528_v20 = vsel %vm1501_vm1, %v1520_v55, %v1430_v23 }
 0x357   :  { %v1376_v54 = vmul.f32 %v1360_v35, %v3124_v38 }
 0x359   :  { %v1522_v24 = vsel %vm61_vm0, %v1312_v51, %v1376_v54 }
 0x35a   :  { %v1363_v58 = vpop.xlane.xlu0 %1362  ;;  %v1530_v50 = vsel %vm1501_vm1, %v1522_v24, %v1432_v15 }
 0x35b   :  { %v1377_v9 = vmul.f32 %v1363_v58, %v3134_v45 }
 0x35d   :  { %v1523_v34 = vsel %vm61_vm0, %v1313_v14, %v1377_v9 }
 0x35e   :  { %v1369_v48 = vpop.xlane.xlu0 %1368 }
 0x35f   :  { %v1379_v26 = vmul.f32 %v1369_v48, %v3164_v28 }
 0x361   :  { %v1525_v43 = vsel %vm61_vm0, %v1315_v39, %v1379_v26 }
 0x362   :  { %v1407_v27 = vpop.xlane.xlu0 %1406 }
 0x363   :  { %v1429_v1 = vmul.f32 %v1407_v27, %v3082_v8 }
 0x365   :  { %v1527_v4 = vsel %vm1501_vm1, %v3116_v49, %v1429_v1 }
 0x366   :  { %v1413_v13 = vpop.xlane.xlu0 %1412 }
 0x367   :  { %v1431_v40 = vmul.f32 %v1413_v13, %v3103_v30 }
 0x36a   :  { %v1419_v62 = vpop.xlane.xlu0 %1418 }
 0x36b   :  { %v1433_v53 = vmul.f32 %v1419_v62, %v3134_v45 }
 0x36e   :  { %v1425_v56 = vpop.xlane.xlu0 %1424 }
 0x36f   :  { %v1435_v11 = vmul.f32 %v1425_v56, %v3164_v28 }
 0x371   :  { %v1533_v57 = vsel %vm1501_vm1, %v1525_v43, %v1435_v11 }
 0x372   :  { %v1463_v47 = vpop.xlane.xlu0 %1462 }
 0x373   :  { %v1485_v37 = vmul.f32 %v1463_v47, %v3082_v8  ;;  %v1529_v8 = vsel %vm1501_vm1, %v1521_v44, %v1431_v40 }
 0x375   :  { %v1535_v36 = vsel %vm1510_vm2, %v1527_v4, %v1485_v37 }
 0x376   :  { %1544 = vst [vmem:[%s3288_s11 + $0x8] sm:$0xff] %v1535_v36  ;;  %v1469_v49 = vpop.xlane.xlu0 %1468 }
 0x377   :  { %v1487_v17 = vmul.f32 %v1469_v49, %v3103_v30  ;;  %v1531_v30 = vsel %vm1501_vm1, %v1523_v34, %v1433_v53 }
 0x379   :  { %v1537_v29 = vsel %vm1510_vm2, %v1529_v8, %v1487_v17 }
 0x37a   :  { %1548 = vst [vmem:[%s3288_s11 + $0x28] sm:$0xff] %v1537_v29  ;;  %v1475_v60 = vpop.xlane.xlu0 %1474 }
 0x37b   :  { %v1489_v2 = vmul.f32 %v1475_v60, %v3134_v45 }
 0x37d   :  { %v1539_v42 = vsel %vm1510_vm2, %v1531_v30, %v1489_v2 }
 0x37e   :  { %1552 = vst [vmem:[%s3288_s11 + $0x48] sm:$0xff] %v1539_v42 }
 0x3ac   :  { %v1428_v52 = vpop.xlane.xlu1 %1427 }
 0x3b0   :  { %v1466_v25 = vpop.xlane.xlu1 %1465 }
 0x3b1   :  { %v1481_v16 = vpop.xlane.xlu0 %1480  ;;  %v1486_v10 = vmul.f32 %v1466_v25, %v3091_v32  ;;  %v1434_v32 = vmul.f32 %v1422_v22, %v3149_v21 }
 0x3b2   :  { %v1491_v3 = vmul.f32 %v1481_v16, %v3164_v28  ;;  %v1314_v28 = vmul.f32 %v3045_v12, %v3149_v21  ;;  %v1436_v12 = vmul.f32 %v1428_v52, %v3177_v46 }
 0x3b3   :  { %v1536_v18 = vsel %vm1510_vm2, %v1528_v20, %v1486_v10 }
 0x3b4   :  { %v1541_v45 = vsel %vm1510_vm2, %v1533_v57, %v1491_v3  ;;  %1546 = vst [vmem:[%s3288_s11 + $0x18] sm:$0xff] %v1536_v18  ;;  %v1472_v59 = vpop.xlane.xlu1 %1471  ;;  %v1524_v5 = vsel %vm61_vm0, %v1314_v28, %v1378_v33 }
 0x3b5   :  { %1556 = vst [vmem:[%s3288_s11 + $0x68] sm:$0xff] %v1541_v45  ;;  %v1488_v23 = vmul.f32 %v1472_v59, %v3124_v38  ;;  %v1380_v38 = vmul.f32 %v3189_v41, %v3177_v46  ;;  %v1532_v55 = vsel %vm1501_vm1, %v1524_v5, %v1434_v32 }
 0x3b7   :  { %v1538_v7 = vsel %vm1510_vm2, %v1530_v50, %v1488_v23  ;;  %v1526_v20 = vsel %vm61_vm0, %v1316_v19, %v1380_v38 }
 0x3b8   :  { %1550 = vst [vmem:[%s3288_s11 + $0x38] sm:$0xff] %v1538_v7  ;;  %v1478_v0 = vpop.xlane.xlu1 %1477  ;;  %v1534_v51 = vsel %vm1501_vm1, %v1526_v20, %v1436_v12 }
 0x3b9   :  { %v1490_v61 = vmul.f32 %v1478_v0, %v3149_v21 }
 0x3bb   :  { %v1540_v15 = vsel %vm1510_vm2, %v1532_v55, %v1490_v61 }
 0x3bc   :  { %1554 = vst [vmem:[%s3288_s11 + $0x58] sm:$0xff] %v1540_v15  ;;  %v1484_v35 = vpop.xlane.xlu1 %1483 }
 0x3bd   :  { %v1492_v6 = vmul.f32 %v1484_v35, %v3177_v46 }
 0x3bf   :  { %v1542_v41 = vsel %vm1510_vm2, %v1534_v51, %v1492_v6 }
 0x3c0   :  { %1558 = vst [vmem:[%s3288_s11 + $0x78] sm:$0xff] %v1542_v41 }

</bundles_post_ra>
